<compile_context>
chip_gen: v6e
topology: v6e:2x2x1
jax: 0.10.0
libtpu: 0.0.40
codegen_flags: <defaults>
</compile_context>

<pallas_src>
import jax
import jax.numpy as jnp
import numpy as np
from jax.experimental import pallas as pl
from jax.experimental.pallas import tpu as pltpu

EPS = 1e-5
C = 352            # channels (fixed by the module)
CP = 384           # channel axis padded to a multiple of 128 (lane dense)
H = W = 7          # spatial size of the reference input
KH = KW = 3        # depthwise kernel
N_PIX = float(H * W)


def fused_kernel(xpad_ref, wdw_ref, g1_ref, b1_ref, wpw_ref, g2_ref, b2_ref,
                 out_ref):
    """xpad:(H+2,W+2,CP) f32   wdw:(3,3,CP) f32   g/b:(1,CP) f32
       wpw:(CP,CP) bf16        out:(H*W,CP) f32"""
    xpad = xpad_ref[...]                       # (H+2, W+2, CP)
    wdw = wdw_ref[...]                         # (KH, KW, CP)

    # --- depthwise 3x3 conv, stride 1 (input already zero-padded) ----------
    # 9 vectorized taps over the whole (H, W) plane; weight slice (1,1,CP)
    # broadcasts over sublanes, result never touches VMEM scratch.
    acc = xpad[0:H, 0:W, :] * wdw[0:1, 0:1, :]
    for kh in range(KH):
        for kw in range(KW):
            if kh == 0 and kw == 0:
                continue
            acc = acc + xpad[kh:kh + H, kw:kw + W, :] * wdw[kh:kh + 1, kw:kw + 1, :]
    y = acc.reshape(H * W, CP)                 # (49, 384)

    # --- BatchNorm2d #1 (training mode: biased batch variance) -------------
    # one-pass stats (E[y^2] - mean^2) + fused per-channel scale/shift.
    mean1 = jnp.sum(y, axis=0, keepdims=True) / N_PIX
    var1 = jnp.sum(y * y, axis=0, keepdims=True) / N_PIX - mean1 * mean1
    scale1 = g1_ref[...] * jax.lax.rsqrt(var1 + EPS)
    shift1 = b1_ref[...] - mean1 * scale1
    y = y * scale1 + shift1

    # --- 1x1 conv == channel matmul on the MXU (bf16 in, f32 accumulate) ---
    z = jnp.dot(y.astype(jnp.bfloat16), wpw_ref[...],
                preferred_element_type=jnp.float32)

    # --- BatchNorm2d #2 -----------------------------------------------------
    mean2 = jnp.sum(z, axis=0, keepdims=True) / N_PIX
    var2 = jnp.sum(z * z, axis=0, keepdims=True) / N_PIX - mean2 * mean2
    scale2 = g2_ref[...] * jax.lax.rsqrt(var2 + EPS)
    shift2 = b2_ref[...] - mean2 * scale2
    out_ref[...] = z * scale2 + shift2


def module_forward(x_nchw, wdw_hwc, g1, b1, wpw_io, g2, b2):
    """x_nchw: (1, C, H, W) float32  ->  (1, C, H, W) float32."""
    x_hwc = jnp.transpose(x_nchw[0], (1, 2, 0))                  # (H, W, C)
    # 1-pixel spatial zero pad for the 3x3 conv + channel pad to CP (lanes).
    xpad = jnp.pad(x_hwc, ((1, 1), (1, 1), (0, CP - C)))         # (H+2, W+2, CP)
    wdw_p = jnp.pad(wdw_hwc, ((0, 0), (0, 0), (0, CP - C)))      # (KH, KW, CP)
    wpw_p = jnp.pad(wpw_io, ((0, CP - C), (0, CP - C))).astype(jnp.bfloat16)
    pad1 = lambda v: jnp.pad(v, (0, CP - C)).reshape(1, CP)      # (1, CP)

    out2d = pl.pallas_call(
        fused_kernel,
        out_shape=jax.ShapeDtypeStruct((H * W, CP), jnp.float32),
        in_specs=[pl.BlockSpec(memory_space=pltpu.MemorySpace.VMEM)] * 7,
        out_specs=pl.BlockSpec(memory_space=pltpu.MemorySpace.VMEM),
    )(xpad, wdw_p, pad1(g1), pad1(b1), wpw_p, pad1(g2), pad1(b2))

    out = out2d[:, :C].reshape(H, W, C)
    return jnp.transpose(out, (2, 0, 1))[None]                   # (1, C, H, W)


def reference(x_nchw, wdw_hwc, g1, b1, wpw_io, g2, b2):
    """Pure-JAX f32 reference matching the PyTorch forward (training-mode BN)."""
    w_dw = jnp.transpose(wdw_hwc, (2, 0, 1))[:, None]            # (C, 1, 3, 3)
    y = jax.lax.conv_general_dilated(
        x_nchw, w_dw, (1, 1), ((1, 1), (1, 1)),
        dimension_numbers=("NCHW", "OIHW", "NCHW"),
        feature_group_count=C)

    def bn(t, g, b):
        m = jnp.mean(t, axis=(0, 2, 3), keepdims=True)
        v = jnp.mean((t - m) ** 2, axis=(0, 2, 3), keepdims=True)
        return ((t - m) * jax.lax.rsqrt(v + EPS) * g[None, :, None, None]
                + b[None, :, None, None])

    y = bn(y, g1, b1)
    w_pw = jnp.transpose(wpw_io)[:, :, None, None]               # (Cout, Cin, 1, 1)
    z = jax.lax.conv_general_dilated(
        y, w_pw, (1, 1), ((0, 0), (0, 0)),
        dimension_numbers=("NCHW", "OIHW", "NCHW"))
    return bn(z, g2, b2)


if __name__ == "__main__":
    key = jax.random.PRNGKey(0)
    k0, k1, k2, k3, k4, k5, k6 = jax.random.split(key, 7)

    # deterministic synthetic parameters (shapes follow the module __init__)
    x = jax.random.normal(k0, (1, C, H, W), jnp.float32)               # input
    wdw = 0.2 * jax.random.normal(k1, (KH, KW, C), jnp.float32)        # depthwise (3,3,C)
    wpw = jax.random.normal(k2, (C, C), jnp.float32) / jnp.sqrt(C)     # 1x1 conv, (Cin, Cout)
    g1 = 1.0 + 0.1 * jax.random.normal(k3, (C,), jnp.float32)
    b1 = 0.1 * jax.random.normal(k4, (C,), jnp.float32)
    g2 = 1.0 + 0.1 * jax.random.normal(k5, (C,), jnp.float32)
    b2 = 0.1 * jax.random.normal(k6, (C,), jnp.float32)

    out = jax.jit(module_forward)(x, wdw, g1, b1, wpw, g2, b2)
    out = jax.block_until_ready(out)

    ref = reference(x, wdw, g1, b1, wpw, g2, b2)
    # tolerance accounts for the bf16 MXU operands in the 1x1 conv
    # (f32 accumulate); elementwise / BN math stays in f32.
    np.testing.assert_allclose(np.asarray(out), np.asarray(ref),
                               rtol=2e-2, atol=2e-2)
    print("KERNEL_OK")
</pallas_src>

<mosaic_0001>
module attributes {stable_mosaic.version = 11 : i64} {
  func.func @fused_kernel(%arg0: memref<9x9x384xf32, #tpu.memory_space<vmem>>, %arg1: memref<3x3x384xf32, #tpu.memory_space<vmem>>, %arg2: memref<1x384xf32, #tpu.memory_space<vmem>>, %arg3: memref<1x384xf32, #tpu.memory_space<vmem>>, %arg4: memref<384x384xbf16, #tpu.memory_space<vmem>>, %arg5: memref<1x384xf32, #tpu.memory_space<vmem>>, %arg6: memref<1x384xf32, #tpu.memory_space<vmem>>, %arg7: memref<49x384xf32, #tpu.memory_space<vmem>>) attributes {dimension_semantics = [], scalar_prefetch = 0 : i64, scratch_operands = 0 : i64, tpu.core_type = #tpu.core_type<tc>} {
    %c0 = arith.constant 0 : index
    %c0_0 = arith.constant 0 : index
    %c0_1 = arith.constant 0 : index
    %0 = vector.load %arg0[%c0, %c0_0, %c0_1] : memref<9x9x384xf32, #tpu.memory_space<vmem>>, vector<9x9x384xf32>
    %c0_2 = arith.constant 0 : index
    %c0_3 = arith.constant 0 : index
    %c0_4 = arith.constant 0 : index
    %1 = vector.load %arg1[%c0_2, %c0_3, %c0_4] : memref<3x3x384xf32, #tpu.memory_space<vmem>>, vector<3x3x384xf32>
    %2 = vector.extract_strided_slice %0 {offsets = [0, 0, 0], sizes = [7, 7, 384], strides = [1, 1, 1]} : vector<9x9x384xf32> to vector<7x7x384xf32>
    %3 = vector.extract_strided_slice %1 {offsets = [0, 0, 0], sizes = [1, 1, 384], strides = [1, 1, 1]} : vector<3x3x384xf32> to vector<1x1x384xf32>
    %4 = vector.broadcast %3 : vector<1x1x384xf32> to vector<7x7x384xf32>
    %5 = arith.mulf %2, %4 : vector<7x7x384xf32>
    %6 = vector.extract_strided_slice %0 {offsets = [0, 1, 0], sizes = [7, 7, 384], strides = [1, 1, 1]} : vector<9x9x384xf32> to vector<7x7x384xf32>
    %7 = vector.extract_strided_slice %1 {offsets = [0, 1, 0], sizes = [1, 1, 384], strides = [1, 1, 1]} : vector<3x3x384xf32> to vector<1x1x384xf32>
    %8 = vector.broadcast %7 : vector<1x1x384xf32> to vector<7x7x384xf32>
    %9 = arith.mulf %6, %8 : vector<7x7x384xf32>
    %10 = arith.addf %5, %9 : vector<7x7x384xf32>
    %11 = vector.extract_strided_slice %0 {offsets = [0, 2, 0], sizes = [7, 7, 384], strides = [1, 1, 1]} : vector<9x9x384xf32> to vector<7x7x384xf32>
    %12 = vector.extract_strided_slice %1 {offsets = [0, 2, 0], sizes = [1, 1, 384], strides = [1, 1, 1]} : vector<3x3x384xf32> to vector<1x1x384xf32>
    %13 = vector.broadcast %12 : vector<1x1x384xf32> to vector<7x7x384xf32>
    %14 = arith.mulf %11, %13 : vector<7x7x384xf32>
    %15 = arith.addf %10, %14 : vector<7x7x384xf32>
    %16 = vector.extract_strided_slice %0 {offsets = [1, 0, 0], sizes = [7, 7, 384], strides = [1, 1, 1]} : vector<9x9x384xf32> to vector<7x7x384xf32>
    %17 = vector.extract_strided_slice %1 {offsets = [1, 0, 0], sizes = [1, 1, 384], strides = [1, 1, 1]} : vector<3x3x384xf32> to vector<1x1x384xf32>
    %18 = vector.broadcast %17 : vector<1x1x384xf32> to vector<7x7x384xf32>
    %19 = arith.mulf %16, %18 : vector<7x7x384xf32>
    %20 = arith.addf %15, %19 : vector<7x7x384xf32>
    %21 = vector.extract_strided_slice %0 {offsets = [1, 1, 0], sizes = [7, 7, 384], strides = [1, 1, 1]} : vector<9x9x384xf32> to vector<7x7x384xf32>
    %22 = vector.extract_strided_slice %1 {offsets = [1, 1, 0], sizes = [1, 1, 384], strides = [1, 1, 1]} : vector<3x3x384xf32> to vector<1x1x384xf32>
    %23 = vector.broadcast %22 : vector<1x1x384xf32> to vector<7x7x384xf32>
    %24 = arith.mulf %21, %23 : vector<7x7x384xf32>
    %25 = arith.addf %20, %24 : vector<7x7x384xf32>
    %26 = vector.extract_strided_slice %0 {offsets = [1, 2, 0], sizes = [7, 7, 384], strides = [1, 1, 1]} : vector<9x9x384xf32> to vector<7x7x384xf32>
    %27 = vector.extract_strided_slice %1 {offsets = [1, 2, 0], sizes = [1, 1, 384], strides = [1, 1, 1]} : vector<3x3x384xf32> to vector<1x1x384xf32>
    %28 = vector.broadcast %27 : vector<1x1x384xf32> to vector<7x7x384xf32>
    %29 = arith.mulf %26, %28 : vector<7x7x384xf32>
    %30 = arith.addf %25, %29 : vector<7x7x384xf32>
    %31 = vector.extract_strided_slice %0 {offsets = [2, 0, 0], sizes = [7, 7, 384], strides = [1, 1, 1]} : vector<9x9x384xf32> to vector<7x7x384xf32>
    %32 = vector.extract_strided_slice %1 {offsets = [2, 0, 0], sizes = [1, 1, 384], strides = [1, 1, 1]} : vector<3x3x384xf32> to vector<1x1x384xf32>
    %33 = vector.broadcast %32 : vector<1x1x384xf32> to vector<7x7x384xf32>
    %34 = arith.mulf %31, %33 : vector<7x7x384xf32>
    %35 = arith.addf %30, %34 : vector<7x7x384xf32>
    %36 = vector.extract_strided_slice %0 {offsets = [2, 1, 0], sizes = [7, 7, 384], strides = [1, 1, 1]} : vector<9x9x384xf32> to vector<7x7x384xf32>
    %37 = vector.extract_strided_slice %1 {offsets = [2, 1, 0], sizes = [1, 1, 384], strides = [1, 1, 1]} : vector<3x3x384xf32> to vector<1x1x384xf32>
    %38 = vector.broadcast %37 : vector<1x1x384xf32> to vector<7x7x384xf32>
    %39 = arith.mulf %36, %38 : vector<7x7x384xf32>
    %40 = arith.addf %35, %39 : vector<7x7x384xf32>
    %41 = vector.extract_strided_slice %0 {offsets = [2, 2, 0], sizes = [7, 7, 384], strides = [1, 1, 1]} : vector<9x9x384xf32> to vector<7x7x384xf32>
    %42 = vector.extract_strided_slice %1 {offsets = [2, 2, 0], sizes = [1, 1, 384], strides = [1, 1, 1]} : vector<3x3x384xf32> to vector<1x1x384xf32>
    %43 = vector.broadcast %42 : vector<1x1x384xf32> to vector<7x7x384xf32>
    %44 = arith.mulf %41, %43 : vector<7x7x384xf32>
    %45 = arith.addf %40, %44 : vector<7x7x384xf32>
    %46 = vector.shape_cast %45 : vector<7x7x384xf32> to vector<49x384xf32>
    %cst = arith.constant dense<0.000000e+00> : vector<384xf32>
    %47 = vector.multi_reduction <add>, %46, %cst [0] : vector<49x384xf32> to vector<384xf32>
    %48 = vector.shape_cast %47 : vector<384xf32> to vector<1x384xf32>
    %cst_5 = arith.constant 4.900000e+01 : f32
    %49 = vector.broadcast %cst_5 : f32 to vector<1x384xf32>
    %50 = arith.divf %48, %49 : vector<1x384xf32>
    %51 = arith.mulf %46, %46 : vector<49x384xf32>
    %cst_6 = arith.constant dense<0.000000e+00> : vector<384xf32>
    %52 = vector.multi_reduction <add>, %51, %cst_6 [0] : vector<49x384xf32> to vector<384xf32>
    %53 = vector.shape_cast %52 : vector<384xf32> to vector<1x384xf32>
    %cst_7 = arith.constant 4.900000e+01 : f32
    %54 = vector.broadcast %cst_7 : f32 to vector<1x384xf32>
    %55 = arith.divf %53, %54 : vector<1x384xf32>
    %56 = arith.mulf %50, %50 : vector<1x384xf32>
    %57 = arith.subf %55, %56 : vector<1x384xf32>
    %c0_8 = arith.constant 0 : index
    %c0_9 = arith.constant 0 : index
    %58 = vector.load %arg2[%c0_8, %c0_9] : memref<1x384xf32, #tpu.memory_space<vmem>>, vector<1x384xf32>
    %cst_10 = arith.constant 9.99999974E-6 : f32
    %59 = vector.broadcast %cst_10 : f32 to vector<1x384xf32>
    %60 = arith.addf %57, %59 : vector<1x384xf32>
    %61 = math.rsqrt %60 : vector<1x384xf32>
    %62 = arith.mulf %58, %61 : vector<1x384xf32>
    %c0_11 = arith.constant 0 : index
    %c0_12 = arith.constant 0 : index
    %63 = vector.load %arg3[%c0_11, %c0_12] : memref<1x384xf32, #tpu.memory_space<vmem>>, vector<1x384xf32>
    %64 = arith.mulf %50, %62 : vector<1x384xf32>
    %65 = arith.subf %63, %64 : vector<1x384xf32>
    %66 = vector.broadcast %62 : vector<1x384xf32> to vector<49x384xf32>
    %67 = arith.mulf %46, %66 : vector<49x384xf32>
    %68 = vector.broadcast %65 : vector<1x384xf32> to vector<49x384xf32>
    %69 = arith.addf %67, %68 : vector<49x384xf32>
    %70 = arith.truncf %69 : vector<49x384xf32> to vector<49x384xbf16>
    %c0_13 = arith.constant 0 : index
    %c0_14 = arith.constant 0 : index
    %71 = vector.load %arg4[%c0_13, %c0_14] : memref<384x384xbf16, #tpu.memory_space<vmem>>, vector<384x384xbf16>
    %cst_15 = arith.constant dense<0.000000e+00> : vector<49x384xf32>
    %72 = tpu.matmul %70, %71, %cst_15 {dimension_numbers = #tpu.dot_dimension_numbers<[1], [0], [0], [1], [0, 0, 1, 1], [], []>} : vector<49x384xbf16>, vector<384x384xbf16>, vector<49x384xf32> -> vector<49x384xf32>
    %cst_16 = arith.constant dense<0.000000e+00> : vector<384xf32>
    %73 = vector.multi_reduction <add>, %72, %cst_16 [0] : vector<49x384xf32> to vector<384xf32>
    %74 = vector.shape_cast %73 : vector<384xf32> to vector<1x384xf32>
    %cst_17 = arith.constant 4.900000e+01 : f32
    %75 = vector.broadcast %cst_17 : f32 to vector<1x384xf32>
    %76 = arith.divf %74, %75 : vector<1x384xf32>
    %77 = arith.mulf %72, %72 : vector<49x384xf32>
    %cst_18 = arith.constant dense<0.000000e+00> : vector<384xf32>
    %78 = vector.multi_reduction <add>, %77, %cst_18 [0] : vector<49x384xf32> to vector<384xf32>
    %79 = vector.shape_cast %78 : vector<384xf32> to vector<1x384xf32>
    %cst_19 = arith.constant 4.900000e+01 : f32
    %80 = vector.broadcast %cst_19 : f32 to vector<1x384xf32>
    %81 = arith.divf %79, %80 : vector<1x384xf32>
    %82 = arith.mulf %76, %76 : vector<1x384xf32>
    %83 = arith.subf %81, %82 : vector<1x384xf32>
    %c0_20 = arith.constant 0 : index
    %c0_21 = arith.constant 0 : index
    %84 = vector.load %arg5[%c0_20, %c0_21] : memref<1x384xf32, #tpu.memory_space<vmem>>, vector<1x384xf32>
    %cst_22 = arith.constant 9.99999974E-6 : f32
    %85 = vector.broadcast %cst_22 : f32 to vector<1x384xf32>
    %86 = arith.addf %83, %85 : vector<1x384xf32>
    %87 = math.rsqrt %86 : vector<1x384xf32>
    %88 = arith.mulf %84, %87 : vector<1x384xf32>
    %c0_23 = arith.constant 0 : index
    %c0_24 = arith.constant 0 : index
    %89 = vector.load %arg6[%c0_23, %c0_24] : memref<1x384xf32, #tpu.memory_space<vmem>>, vector<1x384xf32>
    %90 = arith.mulf %76, %88 : vector<1x384xf32>
    %91 = arith.subf %89, %90 : vector<1x384xf32>
    %92 = vector.broadcast %88 : vector<1x384xf32> to vector<49x384xf32>
    %93 = arith.mulf %72, %92 : vector<49x384xf32>
    %94 = vector.broadcast %91 : vector<1x384xf32> to vector<49x384xf32>
    %95 = arith.addf %93, %94 : vector<49x384xf32>
    %c0_25 = arith.constant 0 : index
    %c0_26 = arith.constant 0 : index
    %96 = vector.load %arg7[%c0_25, %c0_26] : memref<49x384xf32, #tpu.memory_space<vmem>>, vector<49x384xf32>
    tpu.vector_store %arg7[%c0_25, %c0_26], %95 {strides = array<i32>} : memref<49x384xf32, #tpu.memory_space<vmem>>, vector<49x384xf32>,
    return
  }
}

</mosaic_0001>

<bundles_post_ra>
// kernel: module_forward.1
= control target key start
LH: loop header
LB: loop body
LE: loop exit
PB: predicated region body
PF: predicated region fallthrough
CT: control target
= control target key end

     0   :  { %v8481_v1 = vmov 0   ;;  %v89_v41 = vlaneseq  ;;  %vm380_vm0 = vcmask 1045504   ;;  %vm2307_vm1 = vcmask 1040384   ;;  %s8473_s4 = inlined_call_operand.vmem [shape: bf16[384,384], index: 4, kind: input, shape index: {}]   ;;  %s8474_s1 = inlined_call_operand.vmem [shape: f32[3,3,384], index: 1, kind: input, shape index: {}]   ;;  %s8475_s0 = inlined_call_operand.vmem [shape: f32[9,9,384], index: 0, kind: input, shape index: {}]   ;;  %s8476_s2 = inlined_call_operand.vmem [shape: f32[1,384], index: 2, kind: input, shape index: {}]   ;;  %s8477_s3 = inlined_call_operand.vmem [shape: f32[1,384], index: 3, kind: input, shape index: {}]   ;;  %s8478_s5 = inlined_call_operand.vmem [shape: f32[1,384], index: 5, kind: input, shape index: {}]   ;;  %s8479_s6 = inlined_call_operand.vmem [shape: f32[1,384], index: 6, kind: input, shape index: {}]   ;;  %s8480_s7 = inlined_call_operand.vmem [shape: f32[49,384], index: 7, kind: output, shape index: {}]  }
   0x1   :  { %v4986_v0 = vld [vmem:[%s8473_s4 + $0xac] ss:$12 sps:$4 sm:$0xff]   ;;  %4372 = vmatprep.mubr.bf16.mxu1 %v8481_v1  ;;  %v4988_v2 = vld [vmem:[%s8473_s4 + $0xa8] ss:$12 sps:$4 sm:$0xff]   ;;  %v4991_v4 = vld [vmem:[%s8473_s4 + $0x90] ss:$12 sps:$4 sm:$0xff]  }
   0x2   :  { %4269 = vmatprep.subr.bf16.mxu0 %v4986_v0  ;;  %v4989_v3 = vld [vmem:[%s8473_s4 + $0x94] ss:$12 sps:$4 sm:$0xff]   ;;  %v4992_v5 = vld [vmem:[%s8473_s4 + $0x7c] ss:$12 sps:$4 sm:$0xff]   ;;  %v4994_v6 = vld [vmem:[%s8473_s4 + $0x78] ss:$12 sps:$4 sm:$0xff]  }
   0x3   :  { %4270 = vmatpush1.bf16.msra.mxu0 %v4988_v2  ;;  %v4995_v7 = vld [vmem:[%s8473_s4 + $0x64] ss:$12 sps:$4 sm:$0xff]   ;;  %v4997_v8 = vld [vmem:[%s8473_s4 + $0x60] ss:$12 sps:$4 sm:$0xff]   ;;  %v5012_v10 = vld [vmem:[%s8473_s4 + $0x228] ss:$12 sps:$4 sm:$0xff]  }
   0x4   :  { %4271 = vmatprep.subr.bf16.mxu0 %v4989_v3  ;;  %v5010_v9 = vld [vmem:[%s8473_s4 + $0x22c] ss:$12 sps:$4 sm:$0xff]   ;;  %v5016_v12 = vld [vmem:[%s8473_s4 + $0x214] ss:$12 sps:$4 sm:$0xff]   ;;  %v5018_v13 = vld [vmem:[%s8473_s4 + $0x210] ss:$12 sps:$4 sm:$0xff]  }
   0x5   :  { %v4998_v11 = vld [vmem:[%s8473_s4 + $0x4c] ss:$12 sps:$4 sm:$0xff]   ;;  %4340 = vmatprep.subr.bf16.mxu1 %v5010_v9  ;;  %v5000_v14 = vld [vmem:[%s8473_s4 + $0x48] ss:$12 sps:$4 sm:$0xff]   ;;  %v5003_v18 = vld [vmem:[%s8473_s4 + $0x30] ss:$12 sps:$4 sm:$0xff]  }
   0x6   :  { %4341 = vmatpush1.bf16.msra.mxu1 %v5012_v10  ;;  %v5001_v15 = vld [vmem:[%s8473_s4 + $0x34] ss:$12 sps:$4 sm:$0xff]   ;;  %v5022_v16 = vld [vmem:[%s8473_s4 + $0x1fc] ss:$12 sps:$4 sm:$0xff]   ;;  %v5024_v17 = vld [vmem:[%s8473_s4 + $0x1f8] ss:$12 sps:$4 sm:$0xff]  }
   0x7   :  { %4272 = vmatpush1.bf16.msra.mxu0 %v4991_v4  ;;  %4342 = vmatprep.subr.bf16.mxu1 %v5016_v12  ;;  %v5028_v19 = vld [vmem:[%s8473_s4 + $0x1e4] ss:$12 sps:$4 sm:$0xff]   ;;  %v5004_v20 = vld [vmem:[%s8473_s4 + $0x1c] ss:$12 sps:$4 sm:$0xff]   ;;  %v5030_v21 = vld [vmem:[%s8473_s4 + $0x1e0] ss:$12 sps:$4 sm:$0xff]  }
   0x8   :  { %4273 = vmatprep.subr.bf16.mxu0 %v4992_v5  ;;  %v5006_v22 = vld [vmem:[%s8473_s4 + $0x18] ss:$12 sps:$4 sm:$0xff]   ;;  %v5036_v25 = vld [vmem:[%s8473_s4 + $0x1c8] ss:$12 sps:$4 sm:$0xff]   ;;  %v5009_v26 = vld [vmem:[%s8473_s4] ss:$12 sps:$4 sm:$0xff]  }
   0x9   :  { %v5034_v23 = vld [vmem:[%s8473_s4 + $0x1cc] ss:$12 sps:$4 sm:$0xff]   ;;  %v5007_v24 = vld [vmem:[%s8473_s4 + $0x4] ss:$12 sps:$4 sm:$0xff]   ;;  %v5040_v27 = vld [vmem:[%s8473_s4 + $0x1b4] ss:$12 sps:$4 sm:$0xff]  }
   0xa   :  { %4343 = vmatpush1.bf16.msra.mxu1 %v5018_v13  ;;  %v5013_v28 = vld [vmem:[%s8473_s4 + $0x16c] ss:$12 sps:$4 sm:$0xff]   ;;  %v5042_v29 = vld [vmem:[%s8473_s4 + $0x1b0] ss:$12 sps:$4 sm:$0xff]   ;;  %v5015_v30 = vld [vmem:[%s8473_s4 + $0x168] ss:$12 sps:$4 sm:$0xff]  }
   0xb   :  { %4274 = vmatpush1.bf16.msra.mxu0 %v4994_v6  ;;  %4344 = vmatprep.subr.bf16.mxu1 %v5022_v16  ;;  %v5046_v31 = vld [vmem:[%s8473_s4 + $0x19c] ss:$12 sps:$4 sm:$0xff]   ;;  %v5019_v32 = vld [vmem:[%s8473_s4 + $0x154] ss:$12 sps:$4 sm:$0xff]   ;;  %v5048_v33 = vld [vmem:[%s8473_s4 + $0x198] ss:$12 sps:$4 sm:$0xff]  }
   0xc   :  { %4275 = vmatprep.subr.bf16.mxu0 %v4995_v7  ;;  %v5021_v34 = vld [vmem:[%s8473_s4 + $0x150] ss:$12 sps:$4 sm:$0xff]   ;;  %v5054_v37 = vld [vmem:[%s8473_s4 + $0x180] ss:$12 sps:$4 sm:$0xff]   ;;  %v5027_v38 = vld [vmem:[%s8473_s4 + $0x138] ss:$12 sps:$4 sm:$0xff]  }
   0xd   :  { %v5052_v35 = vld [vmem:[%s8473_s4 + $0x184] ss:$12 sps:$4 sm:$0xff]   ;;  %v5025_v36 = vld [vmem:[%s8473_s4 + $0x13c] ss:$12 sps:$4 sm:$0xff]   ;;  %v5033_v42 = vld [vmem:[%s8473_s4 + $0x120] ss:$12 sps:$4 sm:$0xff]  }
   0xe   :  { %4345 = vmatpush1.bf16.msra.mxu1 %v5024_v17  ;;  %v5058_v39 = vld [vmem:[%s8473_s4 + $0x170] ss:$12 sps:$4 sm:$0xff]   ;;  %v5037_v43 = vld [vmem:[%s8473_s4 + $0x10c] ss:$12 sps:$4 sm:$0xff]   ;;  %v5291_v44 = vshrl.u32 %v89_v41, 7  ;;  %v5362_v7 = vld [vmem:[%s8475_s0] sm:$0xff] }
   0xf   :  { %4276 = vmatpush1.bf16.msra.mxu0 %v4997_v8  ;;  %4346 = vmatprep.subr.bf16.mxu1 %v5028_v19  ;;  %v5031_v40 = vld [vmem:[%s8473_s4 + $0x124] ss:$12 sps:$4 sm:$0xff]   ;;  %v5039_v45 = vld [vmem:[%s8473_s4 + $0x108] ss:$12 sps:$4 sm:$0xff]   ;;  %v5057_v6 = vld [vmem:[%s8473_s4 + $0xc0] ss:$12 sps:$4 sm:$0xff]  }
  0x10   :  { %4277 = vmatprep.subr.bf16.mxu0 %v4998_v11  ;;  %8676 = vst [vmem:[#allocation2_spill] sm:$0xff] %v5291_v44  ;;  %v5043_v46 = vld [vmem:[%s8473_s4 + $0xf4] ss:$12 sps:$4 sm:$0xff]   ;;  %v5300_v47 = vsub.s32 0, %v5291_v44  ;;  %v5303_v48 = vsub.s32 4, %v5291_v44  ;;  %v5306_v49 = vsub.s32 1, %v5291_v44 }
  0x11   :  { %v5309_v50 = vsub.s32 5, %v5291_v44  ;;  %v5312_v51 = vsub.s32 2, %v5291_v44  ;;  %v5045_v52 = vld [vmem:[%s8473_s4 + $0xf0] ss:$12 sps:$4 sm:$0xff]   ;;  %v5320_v53 = vld [vmem:[%s8474_s1] sm:$0x77] }
  0x12   :  { %4347 = vmatpush1.bf16.msra.mxu1 %v5030_v21  ;;  %8677 = vst [vmem:[#allocation3_spill] sm:$0xff] %v5300_v47  ;;  %8678 = vst [vmem:[#allocation4_spill] sm:$0xff] %v5303_v48  ;;  %v5325_v54 = vld [vmem:[%s8474_s1 + $0x8] sm:$0x7]  ;;  %v92_v56 = vrot.slane %v5320_v53, %v5300_v47  ;;  %v96_v57 = vrot.slane %v5320_v53, %v5303_v48  ;;  %v5337_v59 = vsub.s32 6, %v5291_v44  ;;  %v5372_v9 = vld [vmem:[%s8475_s0 + $0x10] sm:$0xff] }
  0x13   :  { %4278 = vmatpush1.bf16.msra.mxu0 %v5000_v14  ;;  %4348 = vmatprep.subr.bf16.mxu1 %v5034_v23  ;;  %8679 = vst [vmem:[#allocation5_spill] sm:$0xff] %v5306_v49  ;;  %8680 = vst [vmem:[#allocation6_spill] sm:$0xff] %v5309_v50  ;;  %v5049_v55 = vld [vmem:[%s8473_s4 + $0xdc] ss:$12 sps:$4 sm:$0xff]   ;;  %v100_v58 = vrot.slane %v5325_v54, %v5300_v47  ;;  %v5051_v60 = vld [vmem:[%s8473_s4 + $0xd8] ss:$12 sps:$4 sm:$0xff]   ;;  %v140_v62 = vrot.slane %v5320_v53, %v5306_v49 }
  0x14   :  { %4279 = vmatprep.subr.bf16.mxu0 %v5001_v15  ;;  %8681 = vst [vmem:[#allocation7_spill] sm:$0xff] %v5312_v51  ;;  %8682 = vst [vmem:[#allocation8_spill] sm:$0xff] %v5337_v59  ;;  %v5055_v61 = vld [vmem:[%s8473_s4 + $0xc4] ss:$12 sps:$4 sm:$0xff]   ;;  %v144_v63 = vrot.slane %v5320_v53, %v5309_v50  ;;  %v148_v0 = vrot.slane %v5325_v54, %v5306_v49  ;;  %v107_v2 = vrot.slane %v92_v56, %v5300_v47  ;;  %v5367_v8 = vld [vmem:[%s8475_s0 + $0x8] sm:$0xff] }
  0x15   :  { %v111_v3 = vrot.slane %v96_v57, %v5300_v47  ;;  %v115_v4 = vrot.slane %v100_v58, %v5300_v47  ;;  %v272_v5 = vrot.slane %v5320_v53, %v5312_v51  ;;  %8683 = vst [vmem:[#allocation9_spill] sm:$0xff] %v5362_v7  ;;  %8684 = vst [vmem:[#allocation10_spill] sm:$0xff] %v5367_v8  ;;  %v5377_v10 = vld [vmem:[%s8475_s0 + $0x30] sm:$0xff]  ;;  %v5382_v11 = vld [vmem:[%s8475_s0 + $0x38] sm:$0xff] }
  0x16   :  { %4349 = vmatpush1.bf16.msra.mxu1 %v5036_v25  ;;  %8685 = vst [vmem:[#allocation11_spill] sm:$0xff] %v5372_v9  ;;  %8686 = vst [vmem:[#allocation12_spill] sm:$0xff] %v5377_v10  ;;  %v5387_v12 = vld [vmem:[%s8475_s0 + $0x40] sm:$0xff]  ;;  %v5399_v15 = vld [vmem:[%s8475_s0 + $0x68] sm:$0xff]  ;;  %v155_v19 = vrot.slane %v140_v62, %v5306_v49  ;;  %v163_v21 = vrot.slane %v148_v0, %v5306_v49 }
  0x17   :  { %4280 = vmatpush1.bf16.msra.mxu0 %v5003_v18  ;;  %4350 = vmatprep.subr.bf16.mxu1 %v5040_v27  ;;  %8687 = vst [vmem:[#allocation13_spill] sm:$0xff] %v5382_v11  ;;  %8688 = vst [vmem:[#allocation14_spill] sm:$0xff] %v5387_v12  ;;  %v5392_v13 = vld [vmem:[%s8475_s0 + $0x60] sm:$0xff]  ;;  %v5404_v16 = vld [vmem:[%s8475_s0 + $0x70] sm:$0xff]  ;;  %v5442_v27 = vmul.f32 %v107_v2, %v5362_v7  ;;  %v5496_v41 = vmul.f32 %v111_v3, %v5399_v15 }
  0x18   :  { %4281 = vmatprep.subr.bf16.mxu0 %v5004_v20  ;;  %8689 = vst [vmem:[#allocation15_spill] sm:$0xff] %v5392_v13  ;;  %8690 = vst [vmem:[#allocation16_spill] sm:$0xff] %v5399_v15  ;;  %v5409_v17 = vld [vmem:[%s8475_s0 + $0x90] sm:$0xff]  ;;  %v5414_v18 = vld [vmem:[%s8475_s0 + $0x98] sm:$0xff]  ;;  %v159_v20 = vrot.slane %v144_v63, %v5306_v49  ;;  %v164_v0 = vmul.f32 %v155_v19, %v5362_v7  ;;  %v167_v1 = vmul.f32 %v155_v19, %v5377_v10 }
  0x19   :  { %8691 = vst [vmem:[#allocation17_spill] sm:$0xff] %v5404_v16  ;;  %8692 = vst [vmem:[#allocation18_spill] sm:$0xff] %v5409_v17  ;;  %v5424_v23 = vld [vmem:[%s8475_s0 + $0xa0] sm:$0xff]  ;;  %v5434_v25 = vld [vmem:[%s8475_s0 + $0xc8] sm:$0xff]  ;;  %v169_v14 = vmul.f32 %v163_v21, %v5387_v12  ;;  %v172_v44 = vmul.f32 %v163_v21, %v5404_v16 }
  0x1a   :  { %4351 = vmatpush1.bf16.msra.mxu1 %v5042_v29  ;;  %8693 = vst [vmem:[#allocation19_spill] sm:$0xff] %v5414_v18  ;;  %8694 = vst [vmem:[#allocation20_spill] sm:$0xff] %v5424_v23  ;;  %v5448_v29 = vmul.f32 %v115_v4, %v5372_v9  ;;  %v174_v50 = vmul.f32 %v159_v20, %v5414_v18  ;;  %v175_v49 = vmul.f32 %v163_v21, %v5424_v23 }
  0x1b   :  { %4282 = vmatpush1.bf16.msra.mxu0 %v5006_v22  ;;  %4352 = vmatprep.subr.bf16.mxu1 %v5046_v31  ;;  %8696 = vst [vmem:[#allocation22_spill] sm:$0xff] %v5434_v25  ;;  %v5456_v31 = vld [vmem:[%s8475_s0 + $0xf0] sm:$0xff]  ;;  %v168_v22 = vmul.f32 %v159_v20, %v5382_v11  ;;  %v177_v47 = vmul.f32 %v159_v20, %v5434_v25  ;;  %v214_v7 = vrot.slane %v172_v44, 1 }
  0x1c   :  { %4283 = vmatprep.subr.bf16.mxu0 %v5007_v24  ;;  %v5429_v24 = vld [vmem:[%s8475_s0 + $0xc0] sm:$0xff]  ;;  %8699 = vst [vmem:[#allocation25_spill] sm:$0xff] %v5456_v31  ;;  %v5520_v57 = vmul.f32 %v107_v2, %v5456_v31 }
  0x1d   :  { %8695 = vst [vmem:[#allocation21_spill] sm:$0xff] %v5429_v24  ;;  %v176_v48 = vmul.f32 %v155_v19, %v5429_v24 }
  0x1e   :  { %4353 = vmatpush1.bf16.msra.mxu1 %v5048_v33  ;;  %v5466_v33 = vld [vmem:[%s8475_s0 + $0x100] sm:$0xff] }
  0x1f   :  { %4284 = vmatpush1.bf16.msra.mxu0 %v5009_v26  ;;  %4354 = vmatprep.subr.bf16.mxu1 %v5052_v35  ;;  %v5439_v26 = vld [vmem:[%s8475_s0 + $0xd0] sm:$0xff]  ;;  %8701 = vst [vmem:[#allocation27_spill] sm:$0xff] %v5466_v33  ;;  %v5474_v35 = vmul.f32 %v107_v2, %v5377_v10  ;;  %v210_v10 = vrot.slane %v168_v22, 1 }
  0x20   :  { %4285 = vmatprep.subr.bf16.mxu0 %v5013_v28  ;;  %8697 = vst [vmem:[#allocation23_spill] sm:$0xff] %v5439_v26  ;;  %v5445_v28 = vmul.f32 %v111_v3, %v5367_v8  ;;  %v5517_v56 = vmul.f32 %v115_v4, %v5439_v26 }
  0x22   :  { %4355 = vmatpush1.bf16.msra.mxu1 %v5054_v37  ;;  %v5480_v37 = vmul.f32 %v115_v4, %v5387_v12  ;;  %v179_v12 = vmul.f32 %v155_v19, %v5456_v31 }
  0x23   :  { %4286 = vmatpush2.bf16.msra.mxu0 %v5015_v30  ;;  %4892 = vmatprep.subr.bf16.mxu1 %v5058_v39  ;;  %v5451_v30 = vrot.slane %v272_v5, %v5312_v51  ;;  %v5488_v39 = vld [vmem:[%s8475_s0 + $0x128] sm:$0xff]  ;;  %v165_v5 = vmul.f32 %v159_v20, %v5367_v8  ;;  %v206_v8 = vrot.slane %v164_v0, 1 }
  0x24   :  { %4287 = vmatprep.subr.bf16.mxu0 %v5019_v32  ;;  %v5461_v32 = vld [vmem:[%s8475_s0 + $0xf8] sm:$0xff]  ;;  %8703 = vst [vmem:[#allocation29_spill] sm:$0xff] %v5488_v39  ;;  %v5532_v62 = vmul.f32 %v111_v3, %v5488_v39 }
  0x25   :  { %8698 = vst [vmem:[#allocation24_spill] sm:$0xff] %v5451_v30  ;;  %8700 = vst [vmem:[#allocation26_spill] sm:$0xff] %v5461_v32  ;;  %v5523_v58 = vmul.f32 %v111_v3, %v5461_v32 }
  0x26   :  { %8706 = vst [vmem:[#allocation32_spill] sm:$0xff] %v5532_v62  ;;  %v218_v62 = vrot.slane %v176_v48, 1 }
  0x27   :  { %4288 = vmatpush2.bf16.msra.mxu0 %v5021_v34  ;;  %v5471_v34 = vld [vmem:[%s8475_s0 + $0x120] sm:$0xff] }
  0x28   :  { %4289 = vmatprep.subr.bf16.mxu0 %v5025_v36  ;;  %8702 = vst [vmem:[#allocation28_spill] sm:$0xff] %v5471_v34  ;;  %v5477_v36 = vmul.f32 %v111_v3, %v5382_v11  ;;  %v178_v11 = vmul.f32 %v163_v21, %v5439_v26 }
  0x2b   :  { %4290 = vmatpush2.bf16.msra.mxu0 %v5027_v38  ;;  %v5483_v38 = vmul.f32 %v107_v2, %v5392_v13 }
  0x2c   :  { %4291 = vmatprep.subr.bf16.mxu0 %v5031_v40  ;;  %v5493_v40 = vld [vmem:[%s8475_s0 + $0x130] sm:$0xff] }
  0x2d   :  { %8704 = vst [vmem:[#allocation30_spill] sm:$0xff] %v5493_v40  ;;  %v5535_v63 = vmul.f32 %v115_v4, %v5493_v40 }
  0x2f   :  { %4292 = vmatpush2.bf16.msra.mxu0 %v5033_v42  ;;  %v5499_v42 = vmul.f32 %v115_v4, %v5404_v16  ;;  %8707 = vst [vmem:[#allocation33_spill] sm:$0xff] %v5535_v63  ;;  %v182_v16 = vmul.f32 %v155_v19, %v5471_v34  ;;  %v216_v63 = vrot.slane %v174_v50, 1 }
  0x30   :  { %4293 = vmatprep.subr.bf16.mxu0 %v5037_v43  ;;  %v5502_v43 = vmul.f32 %v107_v2, %v5409_v17 }
  0x33   :  { %4294 = vmatpush2.bf16.msra.mxu0 %v5039_v45  ;;  %v5505_v45 = vmul.f32 %v111_v3, %v5414_v18  ;;  %v184_v18 = vmul.f32 %v163_v21, %v5493_v40 }
  0x34   :  { %4295 = vmatprep.subr.bf16.mxu0 %v5043_v46  ;;  %v5508_v46 = vmul.f32 %v115_v4, %v5424_v23  ;;  %v207_v23 = vrot.slane %v165_v5, 1  ;;  %v5559_v5 = vadd.f32 %v206_v8, %v5442_v27  ;;  %v32_v27 = vld [vmem:[%s8475_s0 + $0x28] sm:$0x1] }
  0x35   :  { %v226_v0 = vrot.slane %v184_v18, 1  ;;  %v8716_v18 = vrot.slane %v5325_v54, %v5312_v51 }
  0x37   :  { %4296 = vmatpush2.bf16.msra.mxu0 %v5045_v52  ;;  %v5511_v52 = vmul.f32 %v107_v2, %v5429_v24  ;;  %v209_v24 = vrot.slane %v167_v1, 1  ;;  %v5562_v1 = vadd.f32 %v207_v23, %v5445_v28  ;;  %v5618_v22 = vrot.slane %v8716_v18, %v5312_v51  ;;  %v31_v23 = vld [vmem:[%s8475_s0 + $0x20] sm:$0x1]  ;;  %v5646_v28 = vld [vmem:[%s8475_s0 + $0x50] sm:$0x1] }
  0x38   :  { %4297 = vmatprep.subr.bf16.mxu0 %v5049_v55  ;;  %v5514_v55 = vmul.f32 %v111_v3, %v5434_v25  ;;  %v171_v3 = vmul.f32 %v159_v20, %v5399_v15  ;;  %v181_v15 = vmul.f32 %v163_v21, %v5466_v33  ;;  %v211_v25 = vrot.slane %v169_v14, 1  ;;  %v5600_v14 = vld [vmem:[%s8475_s0 + $0x48] sm:$0x1]  ;;  %8722 = vst [vmem:[#allocation46_spill] sm:$0xff] %v5646_v28 }
  0x39   :  { %8712 = vst [vmem:[#allocation38_spill] sm:$0xff] %v5600_v14 }
  0x3a   :  { %v213_v26 = vrot.slane %v171_v3, 1  ;;  %v5574_v48 = vadd.f32 %v211_v25, %v5480_v37  ;;  %v5722_v3 = vmul.f32 %v5618_v22, %v32_v27 }
  0x3b   :  { %4298 = vmatpush2.bf16.msra.mxu0 %v5051_v60  ;;  %v5526_v60 = vmul.f32 %v115_v4, %v5466_v33  ;;  %v173_v4 = vmul.f32 %v155_v19, %v5409_v17  ;;  %v183_v17 = vmul.f32 %v159_v20, %v5488_v39  ;;  %v219_v33 = vrot.slane %v177_v47, 1 }
  0x3c   :  { %4299 = vmatprep.subr.bf16.mxu0 %v5055_v61  ;;  %v5529_v61 = vmul.f32 %v107_v2, %v5471_v34  ;;  %v170_v2 = vmul.f32 %v155_v19, %v5392_v13  ;;  %v221_v19 = vrot.slane %v179_v12, 1  ;;  %v224_v39 = vrot.slane %v182_v16, 1 }
  0x3d   :  { %v215_v31 = vrot.slane %v173_v4, 1  ;;  %v5571_v47 = vadd.f32 %v210_v10, %v5477_v36  ;;  %v5580_v8 = vadd.f32 %v213_v26, %v5496_v41  ;;  %v5589_v12 = vadd.f32 %v216_v63, %v5505_v45  ;;  %v8730_v36 = vld [vmem:[#allocation24_spill] sm:$0xff]  ;;  %v5709_v63 = vld [vmem:[%s8475_s0 + $0xa8] sm:$0x1]  ;;  %v8741_v4 = vld [vmem:[#allocation13_spill] sm:$0xff] }
  0x3e   :  { %8705 = vst [vmem:[#allocation31_spill] sm:$0xff] %v5529_v61  ;;  %v212_v30 = vrot.slane %v170_v2, 1  ;;  %v220_v61 = vrot.slane %v178_v11, 1  ;;  %v8715_v16 = vrot.slane %v5320_v53, %v5337_v59  ;;  %v5632_v53 = vadd.f32 %v221_v19, %v5520_v57  ;;  %v5719_v2 = vld [vmem:[%s8475_s0 + $0xb8] sm:$0x1]  ;;  %v8756_v59 = vld [vmem:[#allocation23_spill] sm:$0xff] }
  0x3f   :  { %4300 = vmatpush2.bf16.msra.mxu0 %v5057_v6  ;;  %v166_v6 = vmul.f32 %v163_v21, %v5372_v9  ;;  %v180_v9 = vmul.f32 %v159_v20, %v5461_v32  ;;  %v217_v32 = vrot.slane %v175_v49, 1  ;;  %v223_v20 = vrot.slane %v181_v15, 1  ;;  %8710 = vst [vmem:[#allocation36_spill] sm:$0xff] %v5589_v12  ;;  %8740 = vst [vmem:[#allocation48_spill] sm:$0xff] %v5719_v2 }
  0x40   :  { %v225_v21 = vrot.slane %v183_v17, 1  ;;  %v5568_v49 = vadd.f32 %v209_v24, %v5474_v35  ;;  %v5577_v50 = vadd.f32 %v212_v30, %v5483_v38  ;;  %v5586_v11 = vadd.f32 %v215_v31, %v5502_v43  ;;  %v5626_v24 = vld [vmem:[%s8475_s0 + $0x78] sm:$0x1]  ;;  %8719 = vst [vmem:[#allocation43_spill] sm:$0xff] %v5632_v53  ;;  %v8725_v31 = vld [vmem:[#allocation32_spill] sm:$0xff] }
  0x41   :  { %v208_v13 = vrot.slane %v166_v6, 1  ;;  %v222_v34 = vrot.slane %v180_v9, 1  ;;  %v5583_v9 = vadd.f32 %v214_v7, %v5499_v42  ;;  %v5592_v10 = vadd.f32 %v217_v32, %v5508_v46  ;;  %8717 = vst [vmem:[#allocation41_spill] sm:$0xff] %v5626_v24  ;;  %v8729_v35 = vld [vmem:[#allocation9_spill] sm:$0xff]  ;;  %v8733_v42 = vld [vmem:[#allocation12_spill] sm:$0xff]  ;;  %v8734_v46 = vld [vmem:[#allocation15_spill] sm:$0xff] }
  0x42   :  { %8709 = vst [vmem:[#allocation35_spill] sm:$0xff] %v5586_v11  ;;  %v5603_v7 = vadd.f32 %v218_v62, %v5511_v52  ;;  %v5606_v15 = vadd.f32 %v219_v33, %v5514_v55  ;;  %v5612_v17 = vrot.slane %v8715_v16, %v5312_v51  ;;  %v5629_v25 = vadd.f32 %v220_v61, %v5517_v56  ;;  %v8727_v33 = vld [vmem:[#allocation33_spill] sm:$0xff]  ;;  %v5689_v55 = vld [vmem:[%s8475_s0 + $0x88] sm:$0x1]  ;;  %v8736_v56 = vld [vmem:[#allocation10_spill] sm:$0xff] }
  0x43   :  { %v5565_v44 = vadd.f32 %v208_v13, %v5448_v29  ;;  %8708 = vst [vmem:[#allocation34_spill] sm:$0xff] %v5583_v9  ;;  %8711 = vst [vmem:[#allocation37_spill] sm:$0xff] %v5592_v10  ;;  %v30_v13 = vld [vmem:[%s8475_s0 + $0x18] sm:$0x1]  ;;  %v5635_v26 = vadd.f32 %v222_v34, %v5523_v58  ;;  %v5638_v54 = vadd.f32 %v223_v20, %v5526_v60  ;;  %v8737_v58 = vld [vmem:[#allocation11_spill] sm:$0xff] }
  0x44   :  { %8713 = vst [vmem:[#allocation39_spill] sm:$0xff] %v5603_v7  ;;  %8714 = vst [vmem:[#allocation40_spill] sm:$0xff] %v5606_v15  ;;  %v5652_v32 = vadd.f32 %v225_v21, %v8725_v31  ;;  %v5655_v34 = vadd.f32 %v226_v0, %v8727_v33  ;;  %v5659_v37 = vmul.f32 %v8730_v36, %v8729_v35  ;;  %v5664_v38 = vld [vmem:[%s8475_s0 + $0x58] sm:$0x1]  ;;  %v5714_v6 = vld [vmem:[%s8475_s0 + $0xb0] sm:$0x1] }
  0x45   :  { %8718 = vst [vmem:[#allocation42_spill] sm:$0xff] %v5629_v25  ;;  %8720 = vst [vmem:[#allocation44_spill] sm:$0xff] %v5635_v26  ;;  %v8723_v29 = vld [vmem:[#allocation31_spill] sm:$0xff]  ;;  %v5672_v41 = vmul.f32 %v8730_v36, %v30_v13  ;;  %v5676_v43 = vmul.f32 %v8730_v36, %v8733_v42  ;;  %v5680_v45 = vmul.f32 %v8730_v36, %v5600_v14  ;;  %v8742_v20 = vld [vmem:[#allocation14_spill] sm:$0xff]  ;;  %v388_v15 = vrot.slane %v5722_v3, 2 }
  0x46   :  { %8721 = vst [vmem:[#allocation45_spill] sm:$0xff] %v5638_v54  ;;  %v5649_v30 = vadd.f32 %v224_v39, %v8723_v29  ;;  %8726 = vst [vmem:[#allocation32_spill] sm:$0xff] %v5652_v32  ;;  %v5669_v39 = vld [vmem:[%s8475_s0 + $0x80] sm:$0x1]  ;;  %v5684_v52 = vmul.f32 %v8730_v36, %v8734_v46  ;;  %v5693_v57 = vmul.f32 %v5612_v17, %v8736_v56  ;;  %v5739_v13 = vld [vmem:[%s8475_s0 + $0xd8] sm:$0x1] }
  0x47   :  { %8728 = vst [vmem:[#allocation33_spill] sm:$0xff] %v5655_v34  ;;  %8731 = vst [vmem:[#allocation9_spill] sm:$0xff] %v5664_v38  ;;  %v5697_v60 = vmul.f32 %v5618_v22, %v8737_v58  ;;  %v5700_v61 = vmul.f32 %v5612_v17, %v31_v23  ;;  %v5704_v62 = vmul.f32 %v8730_v36, %v5626_v24  ;;  %v5744_v16 = vld [vmem:[%s8475_s0 + $0xe0] sm:$0x1]  ;;  %v8745_v23 = vld [vmem:[#allocation16_spill] sm:$0xff]  ;;  %v382_v53 = vrot.slane %v5672_v41, 2 }
  0x48   :  { %8724 = vst [vmem:[#allocation31_spill] sm:$0xff] %v5649_v30  ;;  %8732 = vst [vmem:[#allocation24_spill] sm:$0xff] %v5669_v39  ;;  %v5726_v19 = vmul.f32 %v5612_v17, %v8741_v4  ;;  %v5730_v21 = vmul.f32 %v5618_v22, %v8742_v20  ;;  %v5734_v0 = vmul.f32 %v5612_v17, %v5646_v28  ;;  %v8746_v29 = vld [vmem:[#allocation17_spill] sm:$0xff]  ;;  %v5763_v35 = vld [vmem:[%s8475_s0 + $0xe8] sm:$0x1]  ;;  %v384_v25 = vrot.slane %v5693_v57, 2 }
  0x49   :  { %8735 = vst [vmem:[#allocation47_spill] sm:$0xff] %v5689_v55  ;;  %8738 = vst [vmem:[#allocation10_spill] sm:$0xff] %v5709_v63  ;;  %v307_v18 = vmul.f32 %v5618_v22, %v5664_v38  ;;  %v5750_v27 = vmul.f32 %v5612_v17, %v8745_v23  ;;  %v5754_v31 = vmul.f32 %v5618_v22, %v8746_v29  ;;  %v8748_v58 = vld [vmem:[#allocation18_spill] sm:$0xff]  ;;  %v8749_v28 = vld [vmem:[#allocation19_spill] sm:$0xff]  ;;  %v385_v51 = vrot.slane %v5700_v61, 2 }
  0x4a   :  { %8739 = vst [vmem:[#allocation11_spill] sm:$0xff] %v5714_v6  ;;  %8743 = vst [vmem:[#allocation49_spill] sm:$0xff] %v5739_v13  ;;  %v5758_v33 = vmul.f32 %v5612_v17, %v5669_v39  ;;  %v313_v56 = vmul.f32 %v5618_v22, %v5689_v55  ;;  %v5769_v38 = vmul.f32 %v8730_v36, %v8748_v58  ;;  %v8750_v14 = vld [vmem:[#allocation20_spill] sm:$0xff]  ;;  %v5782_v29 = vld [vmem:[%s8475_s0 + $0x108] sm:$0x1]  ;;  %v391_v41 = vrot.slane %v5680_v45, 2 }
  0x4b   :  { %8744 = vst [vmem:[#allocation50_spill] sm:$0xff] %v5744_v16  ;;  %8747 = vst [vmem:[#allocation51_spill] sm:$0xff] %v5763_v35  ;;  %v5773_v24 = vmul.f32 %v5612_v17, %v8749_v28  ;;  %v5777_v39 = vmul.f32 %v5618_v22, %v8750_v14  ;;  %v5787_v55 = vld [vmem:[%s8475_s0 + $0x110] sm:$0x1]  ;;  %v5792_v58 = vld [vmem:[%s8475_s0 + $0x118] sm:$0x1]  ;;  %v5796_v28 = vmul.f32 %v8730_v36, %v5709_v63 }
  0x4c   :  { %8751 = vst [vmem:[#allocation52_spill] sm:$0xff] %v5782_v29  ;;  %8752 = vst [vmem:[#allocation53_spill] sm:$0xff] %v5787_v55  ;;  %v5800_v14 = vmul.f32 %v5612_v17, %v5714_v6  ;;  %v5804_v23 = vmul.f32 %v5618_v22, %v5719_v2  ;;  %v8754_v46 = vld [vmem:[#allocation21_spill] sm:$0xff]  ;;  %v8755_v4 = vld [vmem:[#allocation22_spill] sm:$0xff]  ;;  %v5816_v63 = vmul.f32 %v5618_v22, %v8756_v59  ;;  %v393_v7 = vrot.slane %v5726_v19, 2 }
  0x4d   :  { %8753 = vst [vmem:[#allocation54_spill] sm:$0xff] %v5792_v58  ;;  %v5808_v20 = vmul.f32 %v8730_v36, %v8754_v46  ;;  %v5812_v42 = vmul.f32 %v5612_v17, %v8755_v4  ;;  %v5820_v6 = vmul.f32 %v8730_v36, %v5739_v13  ;;  %v5824_v2 = vmul.f32 %v5612_v17, %v5744_v16  ;;  %v8757_v34 = vld [vmem:[#allocation25_spill] sm:$0xff]  ;;  %v8758_v32 = vld [vmem:[#allocation26_spill] sm:$0xff]  ;;  %v8759_v30 = vld [vmem:[#allocation27_spill] sm:$0xff] }
  0x4e   :  { %v5828_v46 = vmul.f32 %v5618_v22, %v5763_v35  ;;  %v5832_v4 = vmul.f32 %v8730_v36, %v8757_v34  ;;  %v5836_v59 = vmul.f32 %v5612_v17, %v8758_v32  ;;  %v5840_v13 = vmul.f32 %v5618_v22, %v8759_v30  ;;  %v8760_v54 = vld [vmem:[#allocation28_spill] sm:$0xff]  ;;  %v5861_v30 = vld [vmem:[%s8475_s0 + $0x138] sm:$0x1] }
  0x4f   :  { %v5844_v16 = vmul.f32 %v8730_v36, %v5782_v29  ;;  %v5848_v35 = vmul.f32 %v5612_v17, %v5787_v55  ;;  %v5852_v34 = vmul.f32 %v5618_v22, %v5792_v58  ;;  %v5856_v32 = vmul.f32 %v8730_v36, %v8760_v54  ;;  %8761 = vst [vmem:[#allocation55_spill] sm:$0xff] %v5861_v30  ;;  %v8762_v26 = vld [vmem:[#allocation29_spill] sm:$0xff]  ;;  %v5876_v54 = vld [vmem:[%s8475_s0 + $0x140] sm:$0x1] }
  0x50   :  { %v5865_v29 = vmul.f32 %v5612_v17, %v8762_v26  ;;  %v5869_v55 = vmul.f32 %v5618_v22, %v5493_v40  ;;  %v381_v58 = vrot.slane %v5659_v37, 2  ;;  %8763 = vst [vmem:[#allocation56_spill] sm:$0xff] %v5876_v54  ;;  %v387_v26 = vrot.slane %v5697_v60, 2  ;;  %v5885_v40 = vld [vmem:[%s8475_s0 + $0x148] sm:$0x1] }
  0x51   :  { %8764 = vst [vmem:[#allocation57_spill] sm:$0xff] %v5885_v40  ;;  %v390_v37 = vrot.slane %v5676_v43, 2  ;;  %v394_v10 = vrot.slane %v5734_v0, 2  ;;  %v396_v57 = vrot.slane %v5730_v21, 2  ;;  %v397_v61 = vrot.slane %v307_v18, 2 }
  0x52   :  { %v399_v60 = vrot.slane %v5684_v52, 2  ;;  %v400_v3 = vrot.slane %v5704_v62, 2  ;;  %v402_v12 = vrot.slane %v5750_v27, 2  ;;  %v403_v11 = vrot.slane %v5758_v33, 2 }
  0x53   :  { %v405_v9 = vrot.slane %v5754_v31, 2  ;;  %v406_v43 = vrot.slane %v313_v56, 2  ;;  %v335_v45 = vmul.f32 %v8730_v36, %v5861_v30  ;;  %v336_v19 = vmul.f32 %v5612_v17, %v5876_v54  ;;  %v8804_v30 = vld [vmem:[#allocation27_spill] sm:$0xff] }
  0x54   :  { %v337_v21 = vmul.f32 %v5618_v22, %v5885_v40  ;;  %v383_v52 = vsel %vm380_vm0, %v381_v58, %v382_v53  ;;  %v386_v62 = vsel %vm380_vm0, %v384_v25, %v385_v51  ;;  %v389_v0 = vsel %vm380_vm0, %v387_v26, %v388_v15  ;;  %v8803_v40 = vld [vmem:[#allocation26_spill] sm:$0xff] }
  0x55   :  { %v392_v18 = vsel %vm380_vm0, %v390_v37, %v391_v41  ;;  %v395_v27 = vsel %vm380_vm0, %v393_v7, %v394_v10  ;;  %v398_v31 = vsel %vm380_vm0, %v396_v57, %v397_v61  ;;  %v401_v36 = vsel %vm380_vm0, %v399_v60, %v400_v3 }
  0x56   :  { %v408_v33 = vrot.slane %v5769_v38, 2  ;;  %v409_v17 = vrot.slane %v5796_v28, 2  ;;  %v404_v22 = vsel %vm380_vm0, %v402_v12, %v403_v11  ;;  %v407_v53 = vsel %vm380_vm0, %v405_v9, %v406_v43 }
  0x57   :  { %v411_v51 = vrot.slane %v5773_v24, 2  ;;  %v412_v15 = vrot.slane %v5800_v14, 2  ;;  %v414_v25 = vrot.slane %v5777_v39, 2  ;;  %v415_v10 = vrot.slane %v5804_v23, 2 }
  0x58   :  { %v417_v7 = vrot.slane %v5808_v20, 2  ;;  %v418_v26 = vrot.slane %v5820_v6, 2  ;;  %v420_v38 = vrot.slane %v5812_v42, 2  ;;  %v421_v28 = vrot.slane %v5824_v2, 2 }
  0x59   :  { %v423_v11 = vrot.slane %v5816_v63, 2  ;;  %v424_v9 = vrot.slane %v5828_v46, 2  ;;  %v426_v12 = vrot.slane %v5832_v4, 2  ;;  %v427_v14 = vrot.slane %v5844_v16, 2 }
  0x5a   :  { %v429_v24 = vrot.slane %v5836_v59, 2  ;;  %v430_v39 = vrot.slane %v5848_v35, 2  ;;  %v432_v20 = vrot.slane %v5840_v13, 2  ;;  %v433_v6 = vrot.slane %v5852_v34, 2  ;;  %v5940_v34 = vld [vmem:[%s8474_s1 + $0xc] sm:$0x77] }
  0x5b   :  { %v435_v42 = vrot.slane %v5856_v32, 2  ;;  %v436_v23 = vrot.slane %v335_v45, 2  ;;  %v438_v2 = vrot.slane %v5865_v29, 2  ;;  %v439_v63 = vrot.slane %v336_v19, 2  ;;  %8765 = vst [vmem:[#allocation58_spill] sm:$0xff] %v5940_v34 }
  0x5c   :  { %v441_v46 = vrot.slane %v5869_v55, 2  ;;  %v442_v56 = vrot.slane %v337_v21, 2  ;;  %v410_v4 = vsel %vm380_vm0, %v408_v33, %v409_v17  ;;  %v413_v16 = vsel %vm380_vm0, %v411_v51, %v412_v15  ;;  %v5945_v32 = vld [vmem:[%s8474_s1 + $0x14] sm:$0x7]  ;;  %v8767_v21 = vld [vmem:[#allocation3_spill] sm:$0xff]  ;;  %v8772_v15 = vld [vmem:[#allocation37_spill] sm:$0xff] }
  0x5d   :  { %v416_v59 = vsel %vm380_vm0, %v414_v25, %v415_v10  ;;  %v419_v35 = vsel %vm380_vm0, %v417_v7, %v418_v26  ;;  %8766 = vst [vmem:[#allocation59_spill] sm:$0xff] %v5945_v32  ;;  %v422_v55 = vsel %vm380_vm0, %v420_v38, %v421_v28  ;;  %v425_v13 = vsel %vm380_vm0, %v423_v11, %v424_v9  ;;  %v8768_v17 = vld [vmem:[#allocation4_spill] sm:$0xff]  ;;  %v8773_v10 = vld [vmem:[#allocation39_spill] sm:$0xff]  ;;  %v8775_v28 = vld [vmem:[#allocation5_spill] sm:$0xff] }
  0x5e   :  { %v428_v29 = vsel %vm380_vm0, %v426_v12, %v427_v14  ;;  %v431_v58 = vsel %vm380_vm0, %v429_v24, %v430_v39  ;;  %v434_v37 = vsel %vm380_vm0, %v432_v20, %v433_v6  ;;  %v437_v41 = vsel %vm380_vm0, %v435_v42, %v436_v23  ;;  %v8774_v26 = vld [vmem:[#allocation40_spill] sm:$0xff]  ;;  %v8778_v12 = vld [vmem:[#allocation42_spill] sm:$0xff]  ;;  %v8779_v24 = vld [vmem:[#allocation43_spill] sm:$0xff] }
  0x5f   :  { %v5954_v57 = vadd.f32 %v383_v52, %v5559_v5  ;;  %v5957_v61 = vadd.f32 %v386_v62, %v5562_v1  ;;  %v440_v60 = vsel %vm380_vm0, %v438_v2, %v439_v63  ;;  %v443_v3 = vsel %vm380_vm0, %v441_v46, %v442_v56  ;;  %v8780_v20 = vld [vmem:[#allocation44_spill] sm:$0xff]  ;;  %v8781_v42 = vld [vmem:[#allocation45_spill] sm:$0xff]  ;;  %v8782_v2 = vld [vmem:[#allocation31_spill] sm:$0xff] }
  0x60   :  { %v467_v43 = vadd.f32 %v389_v0, %v5565_v44  ;;  %v468_v45 = vadd.f32 %v392_v18, %v5568_v49  ;;  %v469_v19 = vadd.f32 %v395_v27, %v5571_v47  ;;  %v491_v33 = vrot.slane %v5940_v34, %v8767_v21  ;;  %v8769_v44 = vld [vmem:[#allocation34_spill] sm:$0xff]  ;;  %v8770_v49 = vld [vmem:[#allocation35_spill] sm:$0xff]  ;;  %v8771_v47 = vld [vmem:[#allocation36_spill] sm:$0xff] }
  0x61   :  { %v495_v5 = vrot.slane %v5940_v34, %v8768_v17  ;;  %v499_v1 = vrot.slane %v5945_v32, %v8767_v21  ;;  %v470_v52 = vadd.f32 %v398_v31, %v5574_v48  ;;  %v471_v62 = vadd.f32 %v401_v36, %v5577_v50  ;;  %v8776_v48 = vld [vmem:[#allocation6_spill] sm:$0xff]  ;;  %v8783_v46 = vld [vmem:[#allocation32_spill] sm:$0xff]  ;;  %v8802_v17 = vld [vmem:[#allocation25_spill] sm:$0xff] }
  0x62   :  { %v472_v51 = vadd.f32 %v404_v22, %v5580_v8  ;;  %v473_v0 = vadd.f32 %v407_v53, %v8769_v44  ;;  %v474_v18 = vadd.f32 %v410_v4, %v8770_v49  ;;  %v475_v27 = vadd.f32 %v413_v16, %v8771_v47  ;;  %v8777_v53 = vld [vmem:[#allocation7_spill] sm:$0xff]  ;;  %v8784_v4 = vld [vmem:[#allocation33_spill] sm:$0xff]  ;;  %v6019_v44 = vld [vmem:[%s8475_s0 + $0x150] sm:$0xff] }
  0x63   :  { %v476_v25 = vadd.f32 %v416_v59, %v8772_v15  ;;  %v477_v7 = vadd.f32 %v419_v35, %v8773_v10  ;;  %v478_v38 = vadd.f32 %v422_v55, %v8774_v26  ;;  %v560_v11 = vrot.slane %v5940_v34, %v8775_v28  ;;  %8790 = vst [vmem:[#allocation35_spill] sm:$0xff] %v6019_v44  ;;  %v8791_v49 = vld [vmem:[#allocation15_spill] sm:$0xff]  ;;  %v8792_v15 = vld [vmem:[#allocation16_spill] sm:$0xff]  ;;  %v8793_v26 = vld [vmem:[#allocation17_spill] sm:$0xff] }
  0x64   :  { %v564_v50 = vrot.slane %v5940_v34, %v8776_v48  ;;  %v568_v8 = vrot.slane %v5945_v32, %v8775_v28  ;;  %v506_v31 = vrot.slane %v491_v33, %v8767_v21  ;;  %v510_v36 = vrot.slane %v495_v5, %v8767_v21  ;;  %v8801_v48 = vld [vmem:[#allocation23_spill] sm:$0xff]  ;;  %v8805_v32 = vld [vmem:[#allocation28_spill] sm:$0xff] }
  0x65   :  { %v514_v22 = vrot.slane %v499_v1, %v8767_v21  ;;  %v692_v9 = vrot.slane %v5940_v34, %v8777_v53  ;;  %v479_v14 = vadd.f32 %v425_v13, %v8778_v12  ;;  %v480_v39 = vadd.f32 %v428_v29, %v8779_v24  ;;  %v6028_v12 = vld [vmem:[%s8475_s0 + $0x158] sm:$0xff]  ;;  %v8797_v24 = vld [vmem:[#allocation19_spill] sm:$0xff] }
  0x66   :  { %v481_v6 = vadd.f32 %v431_v58, %v8780_v20  ;;  %v482_v23 = vadd.f32 %v434_v37, %v8781_v42  ;;  %v483_v63 = vadd.f32 %v437_v41, %v8782_v2  ;;  %v484_v56 = vadd.f32 %v440_v60, %v8783_v46  ;;  %v8786_v37 = vld [vmem:[#allocation12_spill] sm:$0xff]  ;;  %v8787_v60 = vld [vmem:[#allocation13_spill] sm:$0xff]  ;;  %8795 = vst [vmem:[#allocation36_spill] sm:$0xff] %v6028_v12  ;;  %v8800_v58 = vld [vmem:[#allocation22_spill] sm:$0xff] }
  0x67   :  { %v485_v16 = vadd.f32 %v443_v3, %v8784_v4  ;;  %v6000_v55 = vrot.slane %v560_v11, %v8775_v28  ;;  %v6003_v13 = vrot.slane %v564_v50, %v8775_v28  ;;  %v6006_v29 = vrot.slane %v568_v8, %v8775_v28  ;;  %v8788_v3 = vld [vmem:[#allocation14_spill] sm:$0xff]  ;;  %v8798_v42 = vld [vmem:[#allocation20_spill] sm:$0xff]  ;;  %v8799_v46 = vld [vmem:[#allocation21_spill] sm:$0xff] }
  0x68   :  { %v515_v41 = vmul.f32 %v506_v31, %v8786_v37  ;;  %v516_v33 = vmul.f32 %v510_v36, %v8787_v60  ;;  %v517_v5 = vmul.f32 %v514_v22, %v8788_v3  ;;  %v6014_v1 = vrot.slane %v692_v9, %v8777_v53  ;;  %v8794_v50 = vld [vmem:[#allocation18_spill] sm:$0xff]  ;;  %v8806_v34 = vld [vmem:[#allocation29_spill] sm:$0xff] }
  0x69   :  { %v518_v47 = vmul.f32 %v506_v31, %v8791_v49  ;;  %v519_v10 = vmul.f32 %v510_v36, %v8792_v15  ;;  %v520_v11 = vmul.f32 %v514_v22, %v8793_v26  ;;  %v521_v8 = vmul.f32 %v506_v31, %v8794_v50  ;;  %v6033_v9 = vld [vmem:[%s8475_s0 + $0x160] sm:$0xff] }
  0x6a   :  { %8789 = vst [vmem:[#allocation34_spill] sm:$0xff] %v6014_v1  ;;  %8796 = vst [vmem:[#allocation37_spill] sm:$0xff] %v6033_v9  ;;  %v522_v20 = vmul.f32 %v510_v36, %v8797_v24  ;;  %v523_v2 = vmul.f32 %v514_v22, %v8798_v42  ;;  %v524_v4 = vmul.f32 %v506_v31, %v8799_v46  ;;  %v8807_v50 = vld [vmem:[#allocation30_spill] sm:$0xff] }
  0x6b   :  { %v525_v35 = vmul.f32 %v510_v36, %v8800_v58  ;;  %v526_v28 = vmul.f32 %v514_v22, %v8801_v48  ;;  %v527_v21 = vmul.f32 %v506_v31, %v8802_v17  ;;  %v528_v54 = vmul.f32 %v510_v36, %v8803_v40 }
  0x6c   :  { %v529_v1 = vmul.f32 %v514_v22, %v8804_v30  ;;  %v530_v59 = vmul.f32 %v506_v31, %v8805_v32  ;;  %v531_v53 = vmul.f32 %v510_v36, %v8806_v34  ;;  %v532_v24 = vmul.f32 %v514_v22, %v8807_v50 }
  0x6d   :  { %v533_v42 = vmul.f32 %v506_v31, %v6019_v44  ;;  %v534_v46 = vmul.f32 %v510_v36, %v6028_v12  ;;  %v535_v58 = vmul.f32 %v514_v22, %v6033_v9  ;;  %v6050_v48 = vadd.f32 %v515_v41, %v5954_v57 }
  0x6e   :  { %v6053_v17 = vadd.f32 %v516_v33, %v5957_v61  ;;  %v6055_v40 = vadd.f32 %v517_v5, %v467_v43  ;;  %v6057_v30 = vadd.f32 %v518_v47, %v468_v45  ;;  %v6059_v32 = vadd.f32 %v519_v10, %v469_v19  ;;  %v8814_v33 = vld [vmem:[#allocation25_spill] sm:$0xff]  ;;  %v8816_v10 = vld [vmem:[#allocation27_spill] sm:$0xff] }
  0x6f   :  { %v6061_v34 = vadd.f32 %v520_v11, %v470_v52  ;;  %v6063_v50 = vadd.f32 %v521_v8, %v471_v62  ;;  %v6065_v31 = vadd.f32 %v522_v20, %v472_v51  ;;  %v6067_v36 = vadd.f32 %v523_v2, %v473_v0  ;;  %v8817_v8 = vld [vmem:[#allocation28_spill] sm:$0xff]  ;;  %v8818_v20 = vld [vmem:[#allocation29_spill] sm:$0xff]  ;;  %v8819_v2 = vld [vmem:[#allocation30_spill] sm:$0xff] }
  0x70   :  { %v6069_v22 = vadd.f32 %v524_v4, %v474_v18  ;;  %v6071_v57 = vadd.f32 %v525_v35, %v475_v27  ;;  %v6073_v61 = vadd.f32 %v526_v28, %v476_v25  ;;  %v6075_v43 = vadd.f32 %v527_v21, %v477_v7 }
  0x71   :  { %v6077_v45 = vadd.f32 %v528_v54, %v478_v38  ;;  %v6079_v19 = vadd.f32 %v529_v1, %v479_v14  ;;  %v6081_v52 = vadd.f32 %v530_v59, %v480_v39  ;;  %v6083_v62 = vadd.f32 %v531_v53, %v481_v6  ;;  %v8808_v53 = vld [vmem:[#allocation18_spill] sm:$0xff]  ;;  %v8809_v39 = vld [vmem:[#allocation19_spill] sm:$0xff] }
  0x72   :  { %v6085_v51 = vadd.f32 %v532_v24, %v482_v23  ;;  %v6087_v0 = vadd.f32 %v533_v42, %v483_v63  ;;  %v6089_v18 = vadd.f32 %v534_v46, %v484_v56  ;;  %v6091_v27 = vadd.f32 %v535_v58, %v485_v16  ;;  %v8810_v23 = vld [vmem:[#allocation20_spill] sm:$0xff]  ;;  %v8811_v56 = vld [vmem:[#allocation21_spill] sm:$0xff]  ;;  %v8812_v59 = vld [vmem:[#allocation22_spill] sm:$0xff] }
  0x73   :  { %v584_v21 = vmul.f32 %v6000_v55, %v8786_v37  ;;  %v585_v54 = vmul.f32 %v6003_v13, %v8787_v60  ;;  %v586_v25 = vmul.f32 %v6006_v29, %v8788_v3  ;;  %v587_v7 = vmul.f32 %v6000_v55, %v8791_v49  ;;  %v8813_v58 = vld [vmem:[#allocation23_spill] sm:$0xff]  ;;  %v8815_v1 = vld [vmem:[#allocation26_spill] sm:$0xff] }
  0x74   :  { %v588_v38 = vmul.f32 %v6003_v13, %v8792_v15  ;;  %v589_v28 = vmul.f32 %v6006_v29, %v8793_v26  ;;  %v590_v14 = vmul.f32 %v6000_v55, %v8808_v53  ;;  %v591_v6 = vmul.f32 %v6003_v13, %v8809_v39 }
  0x75   :  { %v592_v63 = vmul.f32 %v6006_v29, %v8810_v23  ;;  %v593_v16 = vmul.f32 %v6000_v55, %v8811_v56  ;;  %v594_v35 = vmul.f32 %v6003_v13, %v8812_v59  ;;  %v595_v41 = vmul.f32 %v6006_v29, %v8813_v58 }
  0x76   :  { %v596_v5 = vmul.f32 %v6000_v55, %v8814_v33  ;;  %v597_v47 = vmul.f32 %v6003_v13, %v8815_v1  ;;  %v598_v11 = vmul.f32 %v6006_v29, %v8816_v10  ;;  %v599_v24 = vmul.f32 %v6000_v55, %v8817_v8 }
  0x77   :  { %v600_v42 = vmul.f32 %v6003_v13, %v8818_v20  ;;  %v601_v46 = vmul.f32 %v6006_v29, %v8819_v2  ;;  %v602_v4 = vmul.f32 %v6000_v55, %v6019_v44  ;;  %v603_v33 = vmul.f32 %v6003_v13, %v6028_v12 }
  0x78   :  { %v604_v1 = vmul.f32 %v6006_v29, %v6033_v9  ;;  %v626_v58 = vrot.slane %v584_v21, 1  ;;  %v627_v10 = vrot.slane %v585_v54, 1  ;;  %v628_v59 = vrot.slane %v586_v25, 1 }
  0x79   :  { %v629_v56 = vrot.slane %v587_v7, 1  ;;  %v630_v8 = vrot.slane %v588_v38, 1  ;;  %v631_v23 = vrot.slane %v589_v28, 1  ;;  %v632_v39 = vrot.slane %v590_v14, 1 }
  0x7a   :  { %v633_v20 = vrot.slane %v591_v6, 1  ;;  %v634_v26 = vrot.slane %v592_v63, 1  ;;  %v635_v15 = vrot.slane %v593_v16, 1  ;;  %v636_v2 = vrot.slane %v594_v35, 1  ;;  %v8846_v35 = vld [vmem:[#allocation18_spill] sm:$0xff] }
  0x7b   :  { %v637_v53 = vrot.slane %v595_v41, 1  ;;  %v638_v3 = vrot.slane %v596_v5, 1  ;;  %v639_v55 = vrot.slane %v597_v47, 1  ;;  %v640_v44 = vrot.slane %v598_v11, 1  ;;  %v8847_v41 = vld [vmem:[#allocation9_spill] sm:$0xff]  ;;  %v8848_v5 = vld [vmem:[#allocation16_spill] sm:$0xff] }
  0x7c   :  { %v641_v60 = vrot.slane %v599_v24, 1  ;;  %v642_v13 = vrot.slane %v600_v42, 1  ;;  %v643_v12 = vrot.slane %v601_v46, 1  ;;  %v644_v49 = vrot.slane %v602_v4, 1  ;;  %v8849_v47 = vld [vmem:[#allocation17_spill] sm:$0xff]  ;;  %v8850_v11 = vld [vmem:[#allocation24_spill] sm:$0xff] }
  0x7d   :  { %v645_v29 = vrot.slane %v603_v33, 1  ;;  %v646_v21 = vrot.slane %v604_v1, 1  ;;  %v6136_v54 = vadd.f32 %v626_v58, %v6050_v48  ;;  %v6139_v25 = vadd.f32 %v627_v10, %v6053_v17  ;;  %v8851_v24 = vld [vmem:[#allocation47_spill] sm:$0xff]  ;;  %v8853_v46 = vld [vmem:[#allocation20_spill] sm:$0xff] }
  0x7e   :  { %v6142_v7 = vadd.f32 %v628_v59, %v6055_v40  ;;  %v6145_v38 = vadd.f32 %v629_v56, %v6057_v30  ;;  %v6148_v28 = vadd.f32 %v630_v8, %v6059_v32  ;;  %v6151_v14 = vadd.f32 %v631_v23, %v6061_v34  ;;  %v8827_v23 = vld [vmem:[#allocation8_spill] sm:$0xff]  ;;  %v8845_v59 = vld [vmem:[#allocation46_spill] sm:$0xff]  ;;  %v8852_v42 = vld [vmem:[#allocation19_spill] sm:$0xff] }
  0x7f   :  { %v6154_v6 = vadd.f32 %v632_v39, %v6063_v50  ;;  %v6157_v48 = vadd.f32 %v633_v20, %v6065_v31  ;;  %v6160_v17 = vadd.f32 %v634_v26, %v6067_v36  ;;  %v6163_v40 = vadd.f32 %v635_v15, %v6069_v22  ;;  %v8825_v50 = vld [vmem:[#allocation7_spill] sm:$0xff]  ;;  %v8826_v39 = vld [vmem:[#allocation58_spill] sm:$0xff] }
  0x80   :  { %v6166_v30 = vadd.f32 %v636_v2, %v6071_v57  ;;  %v6169_v32 = vadd.f32 %v637_v53, %v6073_v61  ;;  %v6172_v34 = vadd.f32 %v638_v3, %v6075_v43  ;;  %v8828_v31 = vrot.slane %v8826_v39, %v8827_v23  ;;  %v8829_v26 = vld [vmem:[#allocation59_spill] sm:$0xff]  ;;  %v8856_v39 = vld [vmem:[#allocation48_spill] sm:$0xff]  ;;  %v8871_v23 = vld [vmem:[#allocation30_spill] sm:$0xff] }
  0x81   :  { %8820 = vst [vmem:[#allocation39_spill] sm:$0xff] %v6160_v17  ;;  %8821 = vst [vmem:[#allocation40_spill] sm:$0xff] %v6163_v40  ;;  %v8830_v15 = vrot.slane %v8829_v26, %v8825_v50  ;;  %v6187_v22 = vadd.f32 %v639_v55, %v6077_v45  ;;  %v6190_v57 = vadd.f32 %v640_v44, %v6079_v19  ;;  %v8839_v44 = vld [vmem:[#allocation34_spill] sm:$0xff]  ;;  %v8857_v26 = vld [vmem:[#allocation21_spill] sm:$0xff] }
  0x82   :  { %8822 = vst [vmem:[#allocation42_spill] sm:$0xff] %v6166_v30  ;;  %8823 = vst [vmem:[#allocation43_spill] sm:$0xff] %v6169_v32  ;;  %v6178_v63 = vrot.slane %v8828_v31, %v8825_v50  ;;  %v6193_v3 = vadd.f32 %v641_v60, %v6081_v52  ;;  %v6196_v61 = vadd.f32 %v642_v13, %v6083_v62  ;;  %v8840_v60 = vld [vmem:[#allocation38_spill] sm:$0xff]  ;;  %v8841_v62 = vld [vmem:[#allocation15_spill] sm:$0xff] }
  0x83   :  { %8824 = vst [vmem:[#allocation44_spill] sm:$0xff] %v6172_v34  ;;  %v6184_v36 = vrot.slane %v8830_v15, %v8825_v50  ;;  %8831 = vst [vmem:[#allocation45_spill] sm:$0xff] %v6187_v22  ;;  %v6199_v43 = vadd.f32 %v643_v12, %v6085_v51  ;;  %v6202_v53 = vadd.f32 %v644_v49, %v6087_v0  ;;  %v8842_v51 = vld [vmem:[#allocation41_spill] sm:$0xff]  ;;  %v8854_v55 = vld [vmem:[#allocation10_spill] sm:$0xff] }
  0x84   :  { %8832 = vst [vmem:[#allocation31_spill] sm:$0xff] %v6190_v57  ;;  %8833 = vst [vmem:[#allocation32_spill] sm:$0xff] %v6193_v3  ;;  %v6205_v56 = vadd.f32 %v645_v29, %v6089_v18  ;;  %v6208_v45 = vadd.f32 %v646_v21, %v6091_v27  ;;  %v6212_v19 = vmul.f32 %v8839_v44, %v8786_v37  ;;  %v8843_v0 = vld [vmem:[#allocation13_spill] sm:$0xff]  ;;  %v8844_v27 = vld [vmem:[#allocation14_spill] sm:$0xff] }
  0x85   :  { %8834 = vst [vmem:[#allocation33_spill] sm:$0xff] %v6196_v61  ;;  %8835 = vst [vmem:[#allocation12_spill] sm:$0xff] %v6199_v43  ;;  %v719_v52 = vmul.f32 %v8839_v44, %v8840_v60  ;;  %v6218_v12 = vmul.f32 %v8839_v44, %v8841_v62  ;;  %v6222_v49 = vmul.f32 %v8839_v44, %v8842_v51  ;;  %v8855_v29 = vld [vmem:[#allocation11_spill] sm:$0xff]  ;;  %v8858_v60 = vld [vmem:[#allocation22_spill] sm:$0xff] }
  0x86   :  { %8836 = vst [vmem:[#allocation58_spill] sm:$0xff] %v6202_v53  ;;  %8837 = vst [vmem:[#allocation59_spill] sm:$0xff] %v6205_v56  ;;  %v717_v18 = vmul.f32 %v6178_v63, %v8843_v0  ;;  %v718_v16 = vmul.f32 %v6184_v36, %v8844_v27  ;;  %v720_v37 = vmul.f32 %v6178_v63, %v8845_v59  ;;  %v8859_v51 = vld [vmem:[#allocation23_spill] sm:$0xff]  ;;  %v8860_v27 = vld [vmem:[#allocation49_spill] sm:$0xff] }
  0x87   :  { %8838 = vst [vmem:[#allocation60_spill] sm:$0xff] %v6208_v45  ;;  %v728_v58 = vmul.f32 %v8839_v44, %v8846_v35  ;;  %v721_v33 = vmul.f32 %v6184_v36, %v8847_v41  ;;  %v723_v1 = vmul.f32 %v6178_v63, %v8848_v5  ;;  %v724_v10 = vmul.f32 %v6184_v36, %v8849_v47  ;;  %v8861_v35 = vld [vmem:[#allocation50_spill] sm:$0xff]  ;;  %v8862_v5 = vld [vmem:[#allocation51_spill] sm:$0xff]  ;;  %v8873_v45 = vld [vmem:[#allocation56_spill] sm:$0xff] }
  0x88   :  { %v726_v8 = vmul.f32 %v6178_v63, %v8850_v11  ;;  %v727_v20 = vmul.f32 %v6184_v36, %v8851_v24  ;;  %v729_v2 = vmul.f32 %v6178_v63, %v8852_v42  ;;  %v6246_v4 = vmul.f32 %v6184_v36, %v8853_v46  ;;  %v8863_v11 = vld [vmem:[#allocation25_spill] sm:$0xff]  ;;  %v8864_v42 = vld [vmem:[#allocation26_spill] sm:$0xff]  ;;  %v8872_v50 = vld [vmem:[#allocation55_spill] sm:$0xff] }
  0x89   :  { %v731_v13 = vmul.f32 %v8839_v44, %v8854_v55  ;;  %v732_v21 = vmul.f32 %v6178_v63, %v8855_v29  ;;  %v6254_v31 = vmul.f32 %v6184_v36, %v8856_v39  ;;  %v6258_v15 = vmul.f32 %v8839_v44, %v8857_v26  ;;  %v8865_v55 = vld [vmem:[#allocation27_spill] sm:$0xff]  ;;  %v8866_v39 = vld [vmem:[#allocation52_spill] sm:$0xff]  ;;  %v8874_v56 = vld [vmem:[#allocation57_spill] sm:$0xff] }
  0x8a   :  { %v6262_v62 = vmul.f32 %v6178_v63, %v8858_v60  ;;  %v6266_v0 = vmul.f32 %v6184_v36, %v8859_v51  ;;  %v6270_v59 = vmul.f32 %v8839_v44, %v8860_v27  ;;  %v6274_v41 = vmul.f32 %v6178_v63, %v8861_v35  ;;  %v8867_v60 = vld [vmem:[#allocation53_spill] sm:$0xff]  ;;  %v8868_v27 = vld [vmem:[#allocation54_spill] sm:$0xff]  ;;  %v8878_v34 = vld [vmem:[#allocation35_spill] sm:$0xff] }
  0x8b   :  { %v6278_v47 = vmul.f32 %v6184_v36, %v8862_v5  ;;  %v6282_v24 = vmul.f32 %v8839_v44, %v8863_v11  ;;  %v6286_v46 = vmul.f32 %v6178_v63, %v8864_v42  ;;  %v6290_v29 = vmul.f32 %v6184_v36, %v8865_v55  ;;  %v8869_v5 = vld [vmem:[#allocation28_spill] sm:$0xff]  ;;  %v8870_v42 = vld [vmem:[#allocation29_spill] sm:$0xff] }
  0x8c   :  { %v6294_v26 = vmul.f32 %v8839_v44, %v8866_v39  ;;  %v6298_v51 = vmul.f32 %v6178_v63, %v8867_v60  ;;  %v6302_v35 = vmul.f32 %v6184_v36, %v8868_v27  ;;  %v6306_v11 = vmul.f32 %v8839_v44, %v8869_v5  ;;  %v6344_v22 = vld [vmem:[%s8475_s0 + $0x178] sm:$0x1]  ;;  %v8879_v30 = vld [vmem:[#allocation36_spill] sm:$0xff] }
  0x8d   :  { %v6310_v55 = vmul.f32 %v6178_v63, %v8870_v42  ;;  %v6314_v39 = vmul.f32 %v6184_v36, %v8871_v23  ;;  %v6318_v60 = vmul.f32 %v8839_v44, %v8872_v50  ;;  %v6322_v27 = vmul.f32 %v6178_v63, %v8873_v45  ;;  %v6331_v42 = vld [vmem:[%s8475_s0 + $0x168] sm:$0x1]  ;;  %v6337_v50 = vld [vmem:[%s8475_s0 + $0x170] sm:$0x1]  ;;  %8877 = vst [vmem:[#allocation15_spill] sm:$0xff] %v6344_v22 }
  0x8e   :  { %v6326_v5 = vmul.f32 %v6184_v36, %v8874_v56  ;;  %8875 = vst [vmem:[#allocation34_spill] sm:$0xff] %v6331_v42  ;;  %v800_v23 = vrot.slane %v6212_v19, 2  ;;  %v801_v53 = vrot.slane %v719_v52, 2  ;;  %v803_v43 = vrot.slane %v717_v18, 2  ;;  %8876 = vst [vmem:[#allocation38_spill] sm:$0xff] %v6337_v50 }
  0x8f   :  { %v804_v61 = vrot.slane %v720_v37, 2  ;;  %v806_v45 = vrot.slane %v718_v16, 2  ;;  %v807_v3 = vrot.slane %v721_v33, 2  ;;  %v809_v56 = vrot.slane %v6218_v12, 2 }
  0x90   :  { %v810_v57 = vrot.slane %v6222_v49, 2  ;;  %v812_v19 = vrot.slane %v723_v1, 2  ;;  %v813_v52 = vrot.slane %v726_v8, 2  ;;  %v815_v18 = vrot.slane %v724_v10, 2 }
  0x91   :  { %v816_v37 = vrot.slane %v727_v20, 2  ;;  %v752_v32 = vmul.f32 %v8839_v44, %v8878_v34  ;;  %v753_v16 = vmul.f32 %v6178_v63, %v8879_v30  ;;  %v818_v33 = vrot.slane %v728_v58, 2 }
  0x92   :  { %v819_v40 = vrot.slane %v731_v13, 2  ;;  %v6352_v12 = vmul.f32 %v6184_v36, %v6033_v9  ;;  %v755_v49 = vmul.f32 %v8839_v44, %v6331_v42  ;;  %v821_v17 = vrot.slane %v729_v2, 2  ;;  %v6607_v42 = vld [vmem:[%s8475_s0 + $0x130] sm:$0xff] }
  0x93   :  { %v822_v1 = vrot.slane %v732_v21, 2  ;;  %v756_v10 = vmul.f32 %v6178_v63, %v6337_v50  ;;  %v757_v8 = vmul.f32 %v6184_v36, %v6344_v22  ;;  %v802_v20 = vsel %vm380_vm0, %v800_v23, %v801_v53  ;;  %v6601_v22 = vld [vmem:[%s8475_s0 + $0x128] sm:$0xff]  ;;  %8916 = vst [vmem:[#allocation23_spill] sm:$0xff] %v6607_v42 }
  0x94   :  { %v805_v58 = vsel %vm380_vm0, %v803_v43, %v804_v61  ;;  %v808_v13 = vsel %vm380_vm0, %v806_v45, %v807_v3  ;;  %v811_v9 = vsel %vm380_vm0, %v809_v56, %v810_v57  ;;  %v814_v30 = vsel %vm380_vm0, %v812_v19, %v813_v52  ;;  %8915 = vst [vmem:[#allocation22_spill] sm:$0xff] %v6601_v22 }
  0x95   :  { %v817_v44 = vsel %vm380_vm0, %v815_v18, %v816_v37  ;;  %v820_v2 = vsel %vm380_vm0, %v818_v33, %v819_v40  ;;  %v824_v21 = vrot.slane %v6246_v4, 2  ;;  %v825_v63 = vrot.slane %v6254_v31, 2 }
  0x96   :  { %v827_v36 = vrot.slane %v6258_v15, 2  ;;  %v823_v53 = vsel %vm380_vm0, %v821_v17, %v822_v1  ;;  %v828_v61 = vrot.slane %v6270_v59, 2  ;;  %v830_v3 = vrot.slane %v6262_v62, 2 }
  0x97   :  { %v831_v57 = vrot.slane %v6274_v41, 2  ;;  %v833_v43 = vrot.slane %v6266_v0, 2  ;;  %v834_v56 = vrot.slane %v6278_v47, 2  ;;  %v836_v40 = vrot.slane %v6282_v24, 2 }
  0x98   :  { %v837_v45 = vrot.slane %v6294_v26, 2  ;;  %v839_v4 = vrot.slane %v6286_v46, 2  ;;  %v840_v31 = vrot.slane %v6298_v51, 2  ;;  %v842_v17 = vrot.slane %v6290_v29, 2 }
  0x99   :  { %v843_v15 = vrot.slane %v6302_v35, 2  ;;  %v845_v62 = vrot.slane %v6306_v11, 2  ;;  %v846_v59 = vrot.slane %v6318_v60, 2  ;;  %v848_v0 = vrot.slane %v6310_v55, 2 }
  0x9a   :  { %v849_v41 = vrot.slane %v6322_v27, 2  ;;  %v851_v47 = vrot.slane %v6314_v39, 2  ;;  %v852_v24 = vrot.slane %v6326_v5, 2  ;;  %v854_v26 = vrot.slane %v752_v32, 2  ;;  %v6397_v39 = vld [vmem:[%s8474_s1 + $0x18] sm:$0x77] }
  0x9b   :  { %v855_v46 = vrot.slane %v755_v49, 2  ;;  %v826_v51 = vsel %vm380_vm0, %v824_v21, %v825_v63  ;;  %v829_v29 = vsel %vm380_vm0, %v827_v36, %v828_v61  ;;  %v857_v23 = vrot.slane %v753_v16, 2  ;;  %8880 = vst [vmem:[#allocation41_spill] sm:$0xff] %v6397_v39  ;;  %v6402_v32 = vld [vmem:[%s8474_s1 + $0x20] sm:$0x7]  ;;  %v8882_v63 = vld [vmem:[#allocation3_spill] sm:$0xff] }
  0x9c   :  { %v858_v35 = vrot.slane %v756_v10, 2  ;;  %v832_v11 = vsel %vm380_vm0, %v830_v3, %v831_v57  ;;  %v835_v60 = vsel %vm380_vm0, %v833_v43, %v834_v56  ;;  %v838_v55 = vsel %vm380_vm0, %v836_v40, %v837_v45  ;;  %8881 = vst [vmem:[#allocation13_spill] sm:$0xff] %v6402_v32  ;;  %v8883_v61 = vld [vmem:[#allocation4_spill] sm:$0xff]  ;;  %v8886_v3 = vld [vmem:[#allocation42_spill] sm:$0xff]  ;;  %v8887_v43 = vld [vmem:[#allocation43_spill] sm:$0xff] }
  0x9d   :  { %v841_v27 = vsel %vm380_vm0, %v839_v4, %v840_v31  ;;  %v844_v5 = vsel %vm380_vm0, %v842_v17, %v843_v15  ;;  %v847_v19 = vsel %vm380_vm0, %v845_v62, %v846_v59  ;;  %v860_v52 = vrot.slane %v6352_v12, 2  ;;  %v8891_v45 = vld [vmem:[#allocation45_spill] sm:$0xff]  ;;  %v8892_v62 = vld [vmem:[#allocation31_spill] sm:$0xff] }
  0x9e   :  { %v861_v18 = vrot.slane %v757_v8, 2  ;;  %v850_v37 = vsel %vm380_vm0, %v848_v0, %v849_v41  ;;  %v853_v16 = vsel %vm380_vm0, %v851_v47, %v852_v24  ;;  %v856_v33 = vsel %vm380_vm0, %v854_v26, %v855_v46  ;;  %v8893_v0 = vld [vmem:[#allocation32_spill] sm:$0xff]  ;;  %v8894_v47 = vld [vmem:[#allocation33_spill] sm:$0xff] }
  0x9f   :  { %v6411_v49 = vadd.f32 %v802_v20, %v6136_v54  ;;  %v859_v1 = vsel %vm380_vm0, %v857_v23, %v858_v35  ;;  %v6415_v10 = vadd.f32 %v805_v58, %v6139_v25  ;;  %v6418_v21 = vadd.f32 %v808_v13, %v6142_v7  ;;  %v8885_v58 = vld [vmem:[#allocation40_spill] sm:$0xff]  ;;  %v8897_v23 = vld [vmem:[#allocation59_spill] sm:$0xff] }
  0xa0   :  { %v6421_v12 = vadd.f32 %v811_v9, %v6145_v38  ;;  %v6424_v8 = vadd.f32 %v814_v30, %v6148_v28  ;;  %v910_v36 = vrot.slane %v6397_v39, %v8882_v63  ;;  %v914_v54 = vrot.slane %v6397_v39, %v8883_v61  ;;  %v8884_v28 = vld [vmem:[#allocation39_spill] sm:$0xff]  ;;  %v8895_v26 = vld [vmem:[#allocation12_spill] sm:$0xff] }
  0xa1   :  { %v918_v20 = vrot.slane %v6402_v32, %v8882_v63  ;;  %v862_v25 = vsel %vm380_vm0, %v860_v52, %v861_v18  ;;  %v6434_v7 = vadd.f32 %v817_v44, %v6151_v14  ;;  %v6437_v9 = vadd.f32 %v820_v2, %v6154_v6  ;;  %v8888_v14 = vld [vmem:[#allocation44_spill] sm:$0xff]  ;;  %v8889_v6 = vld [vmem:[#allocation5_spill] sm:$0xff] }
  0xa2   :  { %v6440_v38 = vadd.f32 %v823_v53, %v6157_v48  ;;  %v6443_v30 = vadd.f32 %v826_v51, %v8884_v28  ;;  %v6446_v13 = vadd.f32 %v829_v29, %v8885_v58  ;;  %v6449_v57 = vadd.f32 %v832_v11, %v8886_v3  ;;  %v8890_v48 = vld [vmem:[#allocation6_spill] sm:$0xff]  ;;  %v8898_v11 = vld [vmem:[#allocation60_spill] sm:$0xff]  ;;  %v6537_v3 = vld [vmem:[%s8475_s0 + $0x98] sm:$0xff] }
  0xa3   :  { %v6452_v56 = vadd.f32 %v835_v60, %v8887_v43  ;;  %v6455_v44 = vadd.f32 %v838_v55, %v8888_v14  ;;  %v979_v2 = vrot.slane %v6397_v39, %v8889_v6  ;;  %v983_v53 = vrot.slane %v6397_v39, %v8890_v48  ;;  %v8896_v51 = vld [vmem:[#allocation58_spill] sm:$0xff]  ;;  %v6518_v61 = vld [vmem:[%s8475_s0 + $0x70] sm:$0xff]  ;;  %8905 = vst [vmem:[#allocation16_spill] sm:$0xff] %v6537_v3 }
  0xa4   :  { %v987_v40 = vrot.slane %v6402_v32, %v8889_v6  ;;  %v6464_v4 = vadd.f32 %v841_v27, %v8891_v45  ;;  %v925_v31 = vrot.slane %v910_v36, %v8882_v63  ;;  %v929_v17 = vrot.slane %v914_v54, %v8882_v63  ;;  %8902 = vst [vmem:[#allocation46_spill] sm:$0xff] %v6518_v61  ;;  %v6531_v28 = vld [vmem:[%s8475_s0 + $0x90] sm:$0xff]  ;;  %v6543_v14 = vld [vmem:[%s8475_s0 + $0xa0] sm:$0xff] }
  0xa5   :  { %v933_v15 = vrot.slane %v918_v20, %v8882_v63  ;;  %v6470_v59 = vadd.f32 %v844_v5, %v8892_v62  ;;  %v6473_v41 = vadd.f32 %v847_v19, %v8893_v0  ;;  %v6476_v24 = vadd.f32 %v850_v37, %v8894_v47  ;;  %8904 = vst [vmem:[#allocation9_spill] sm:$0xff] %v6531_v28  ;;  %v6549_v48 = vld [vmem:[%s8475_s0 + $0xc0] sm:$0xff]  ;;  %v6560_v45 = vld [vmem:[%s8475_s0 + $0x190] sm:$0xff]  ;;  %v6565_v62 = vld [vmem:[%s8475_s0 + $0xc8] sm:$0xff] }
  0xa6   :  { %v6479_v46 = vadd.f32 %v853_v16, %v8895_v26  ;;  %v6482_v29 = vadd.f32 %v856_v33, %v8896_v51  ;;  %v6485_v35 = vadd.f32 %v859_v1, %v8897_v23  ;;  %v6488_v60 = vadd.f32 %v862_v25, %v8898_v11  ;;  %v6506_v16 = vld [vmem:[%s8475_s0 + $0x60] sm:$0xff]  ;;  %v6512_v1 = vld [vmem:[%s8475_s0 + $0x68] sm:$0xff]  ;;  %8906 = vst [vmem:[#allocation17_spill] sm:$0xff] %v6543_v14  ;;  %v6571_v47 = vld [vmem:[%s8475_s0 + $0xd0] sm:$0xff] }
  0xa7   :  { %v6493_v5 = vrot.slane %v979_v2, %v8889_v6  ;;  %v6496_v19 = vrot.slane %v983_v53, %v8889_v6  ;;  %v6499_v52 = vrot.slane %v987_v40, %v8889_v6  ;;  %v934_v33 = vmul.f32 %v6506_v16, %v925_v31  ;;  %8901 = vst [vmem:[#allocation14_spill] sm:$0xff] %v6512_v1  ;;  %v6526_v25 = vld [vmem:[%s8475_s0 + $0x180] sm:$0xff]  ;;  %v6555_v40 = vld [vmem:[%s8475_s0 + $0x188] sm:$0xff]  ;;  %v6577_v51 = vld [vmem:[%s8475_s0 + $0xf0] sm:$0xff] }
  0xa8   :  { %v935_v36 = vmul.f32 %v6512_v1, %v929_v17  ;;  %v936_v54 = vmul.f32 %v6518_v61, %v933_v15  ;;  %8903 = vst [vmem:[#allocation18_spill] sm:$0xff] %v6526_v25  ;;  %v937_v58 = vmul.f32 %v6531_v28, %v925_v31  ;;  %v938_v43 = vmul.f32 %v6537_v3, %v929_v17  ;;  %v6583_v11 = vld [vmem:[%s8475_s0 + $0xf8] sm:$0xff]  ;;  %v6589_v37 = vld [vmem:[%s8475_s0 + $0x100] sm:$0xff]  ;;  %v8917_v39 = vld [vmem:[#allocation36_spill] sm:$0xff] }
  0xa9   :  { %v939_v2 = vmul.f32 %v6543_v14, %v933_v15  ;;  %8907 = vst [vmem:[#allocation24_spill] sm:$0xff] %v6549_v48  ;;  %v940_v53 = vmul.f32 %v6549_v48, %v925_v31  ;;  %8908 = vst [vmem:[#allocation47_spill] sm:$0xff] %v6555_v40  ;;  %v941_v0 = vmul.f32 %v6565_v62, %v929_v17  ;;  %v6595_v6 = vld [vmem:[%s8475_s0 + $0x120] sm:$0xff] }
  0xaa   :  { %8909 = vst [vmem:[#allocation19_spill] sm:$0xff] %v6565_v62  ;;  %8910 = vst [vmem:[#allocation20_spill] sm:$0xff] %v6571_v47  ;;  %v942_v26 = vmul.f32 %v6571_v47, %v933_v15  ;;  %v943_v23 = vmul.f32 %v6577_v51, %v925_v31  ;;  %v944_v20 = vmul.f32 %v6583_v11, %v929_v17 }
  0xab   :  { %8911 = vst [vmem:[#allocation10_spill] sm:$0xff] %v6577_v51  ;;  %8912 = vst [vmem:[#allocation11_spill] sm:$0xff] %v6583_v11  ;;  %v945_v27 = vmul.f32 %v6589_v37, %v933_v15  ;;  %v946_v63 = vmul.f32 %v6595_v6, %v925_v31  ;;  %v947_v50 = vmul.f32 %v6601_v22, %v929_v17 }
  0xac   :  { %8913 = vst [vmem:[#allocation48_spill] sm:$0xff] %v6589_v37  ;;  %8914 = vst [vmem:[#allocation21_spill] sm:$0xff] %v6595_v6  ;;  %v948_v32 = vmul.f32 %v6607_v42, %v933_v15  ;;  %v949_v18 = vmul.f32 %v925_v31, %v8878_v34  ;;  %v950_v55 = vmul.f32 %v929_v17, %v8917_v39  ;;  %v8918_v37 = vld [vmem:[#allocation37_spill] sm:$0xff] }
  0xad   :  { %v951_v6 = vmul.f32 %v933_v15, %v8918_v37  ;;  %v952_v11 = vmul.f32 %v925_v31, %v6526_v25  ;;  %v953_v51 = vmul.f32 %v929_v17, %v6555_v40  ;;  %v954_v47 = vmul.f32 %v933_v15, %v6560_v45 }
  0xae   :  { %v6617_v22 = vadd.f32 %v934_v33, %v6411_v49  ;;  %v6620_v62 = vadd.f32 %v935_v36, %v6415_v10  ;;  %v6623_v42 = vadd.f32 %v936_v54, %v6418_v21  ;;  %v6626_v34 = vadd.f32 %v937_v58, %v6421_v12  ;;  %v8925_v58 = vld [vmem:[#allocation22_spill] sm:$0xff] }
  0xaf   :  { %v6629_v37 = vadd.f32 %v938_v43, %v6424_v8  ;;  %v6632_v31 = vadd.f32 %v939_v2, %v6434_v7  ;;  %v6635_v17 = vadd.f32 %v940_v53, %v6437_v9  ;;  %v6638_v49 = vadd.f32 %v941_v0, %v6440_v38  ;;  %v8926_v2 = vld [vmem:[#allocation23_spill] sm:$0xff] }
  0xb0   :  { %v6641_v10 = vadd.f32 %v942_v26, %v6443_v30  ;;  %v6644_v21 = vadd.f32 %v943_v23, %v6446_v13  ;;  %v6647_v12 = vadd.f32 %v944_v20, %v6449_v57  ;;  %v6650_v8 = vadd.f32 %v945_v27, %v6452_v56  ;;  %v8927_v0 = vld [vmem:[#allocation35_spill] sm:$0xff] }
  0xb1   :  { %v6653_v7 = vadd.f32 %v946_v63, %v6455_v44  ;;  %v6656_v9 = vadd.f32 %v947_v50, %v6464_v4  ;;  %v6659_v38 = vadd.f32 %v948_v32, %v6470_v59  ;;  %v6662_v30 = vadd.f32 %v949_v18, %v6473_v41 }
  0xb2   :  { %v6665_v13 = vadd.f32 %v950_v55, %v6476_v24  ;;  %v6668_v57 = vadd.f32 %v951_v6, %v6479_v46  ;;  %v6671_v56 = vadd.f32 %v952_v11, %v6482_v29  ;;  %v6674_v63 = vadd.f32 %v953_v51, %v6485_v35  ;;  %v8919_v24 = vld [vmem:[#allocation19_spill] sm:$0xff]  ;;  %v8920_v29 = vld [vmem:[#allocation20_spill] sm:$0xff]  ;;  %v8928_v51 = vld [vmem:[#allocation37_spill] sm:$0xff] }
  0xb3   :  { %v6677_v50 = vadd.f32 %v954_v47, %v6488_v60  ;;  %v1003_v32 = vmul.f32 %v6506_v16, %v6493_v5  ;;  %v1004_v44 = vmul.f32 %v6512_v1, %v6496_v19  ;;  %v1005_v4 = vmul.f32 %v6518_v61, %v6499_v52  ;;  %v8921_v60 = vld [vmem:[#allocation10_spill] sm:$0xff]  ;;  %v8922_v27 = vld [vmem:[#allocation11_spill] sm:$0xff]  ;;  %v8923_v33 = vld [vmem:[#allocation48_spill] sm:$0xff] }
  0xb4   :  { %v1006_v6 = vmul.f32 %v6531_v28, %v6493_v5  ;;  %v1007_v15 = vmul.f32 %v6537_v3, %v6496_v19  ;;  %v1008_v59 = vmul.f32 %v6543_v14, %v6499_v52  ;;  %v1009_v41 = vmul.f32 %v6549_v48, %v6493_v5  ;;  %v8924_v54 = vld [vmem:[#allocation21_spill] sm:$0xff] }
  0xb5   :  { %v1010_v46 = vmul.f32 %v8919_v24, %v6496_v19  ;;  %v1011_v35 = vmul.f32 %v8920_v29, %v6499_v52  ;;  %v1012_v55 = vmul.f32 %v8921_v60, %v6493_v5  ;;  %v1013_v18 = vmul.f32 %v8922_v27, %v6496_v19 }
  0xb6   :  { %v1014_v36 = vmul.f32 %v8923_v33, %v6499_v52  ;;  %v1015_v20 = vmul.f32 %v8924_v54, %v6493_v5  ;;  %v1016_v43 = vmul.f32 %v8925_v58, %v6496_v19  ;;  %v1017_v53 = vmul.f32 %v8926_v2, %v6499_v52 }
  0xb7   :  { %v1018_v47 = vmul.f32 %v6493_v5, %v8927_v0  ;;  %v1019_v26 = vmul.f32 %v6496_v19, %v8917_v39  ;;  %v1020_v23 = vmul.f32 %v6499_v52, %v8928_v51  ;;  %v1021_v11 = vmul.f32 %v6493_v5, %v6526_v25 }
  0xb8   :  { %v1022_v54 = vmul.f32 %v6496_v19, %v6555_v40  ;;  %v1023_v58 = vmul.f32 %v6499_v52, %v6560_v45  ;;  %v1045_v33 = vrot.slane %v1003_v32, 1  ;;  %v1046_v2 = vrot.slane %v1004_v44, 1 }
  0xb9   :  { %v1047_v27 = vrot.slane %v1005_v4, 1  ;;  %v1048_v60 = vrot.slane %v1006_v6, 1  ;;  %v1049_v0 = vrot.slane %v1007_v15, 1  ;;  %v1050_v29 = vrot.slane %v1008_v59, 1 }
  0xba   :  { %v1051_v24 = vrot.slane %v1009_v41, 1  ;;  %v1052_v39 = vrot.slane %v1010_v46, 1  ;;  %v1053_v48 = vrot.slane %v1011_v35, 1  ;;  %v1054_v14 = vrot.slane %v1012_v55, 1  ;;  %v8930_v35 = vld [vmem:[#allocation41_spill] sm:$0xff] }
  0xbb   :  { %v1055_v51 = vrot.slane %v1013_v18, 1  ;;  %v1056_v3 = vrot.slane %v1014_v36, 1  ;;  %v1057_v28 = vrot.slane %v1015_v20, 1  ;;  %v1058_v5 = vrot.slane %v1016_v43, 1  ;;  %v8951_v18 = vld [vmem:[#allocation16_spill] sm:$0xff]  ;;  %v8952_v36 = vld [vmem:[#allocation17_spill] sm:$0xff] }
  0xbc   :  { %v1059_v25 = vrot.slane %v1017_v53, 1  ;;  %v1060_v61 = vrot.slane %v1018_v47, 1  ;;  %v1061_v19 = vrot.slane %v1019_v26, 1  ;;  %v1062_v40 = vrot.slane %v1020_v23, 1  ;;  %v5112_v20 = vld [vmem:[%s8475_s0 + $0xa8] sm:$0x1] }
  0xbd   :  { %v1063_v1 = vrot.slane %v1021_v11, 1  ;;  %v1064_v52 = vrot.slane %v1022_v54, 1  ;;  %v1065_v32 = vrot.slane %v1023_v58, 1  ;;  %v6722_v44 = vadd.f32 %v1045_v33, %v6617_v22  ;;  %v5113_v43 = vld [vmem:[%s8475_s0 + $0xb0] sm:$0x1] }
  0xbe   :  { %v6725_v4 = vadd.f32 %v1046_v2, %v6620_v62  ;;  %v6728_v6 = vadd.f32 %v1047_v27, %v6623_v42  ;;  %v6731_v15 = vadd.f32 %v1048_v60, %v6626_v34  ;;  %v6734_v59 = vadd.f32 %v1049_v0, %v6629_v37  ;;  %v8929_v42 = vld [vmem:[#allocation7_spill] sm:$0xff]  ;;  %v8932_v37 = vld [vmem:[#allocation8_spill] sm:$0xff]  ;;  %v5114_v53 = vld [vmem:[%s8475_s0 + $0xb8] sm:$0x1] }
  0xbf   :  { %v6737_v41 = vadd.f32 %v1050_v29, %v6632_v31  ;;  %v6740_v46 = vadd.f32 %v1051_v24, %v6635_v17  ;;  %v6743_v22 = vadd.f32 %v1052_v39, %v6638_v49  ;;  %v6746_v62 = vadd.f32 %v1053_v48, %v6641_v10  ;;  %v8937_v49 = vld [vmem:[#allocation13_spill] sm:$0xff]  ;;  %v8953_v47 = vld [vmem:[#allocation24_spill] sm:$0xff] }
  0xc0   :  { %v8931_v34 = vrot.slane %v8930_v35, %v8929_v42  ;;  %v8933_v31 = vrot.slane %v8930_v35, %v8932_v37  ;;  %v6761_v17 = vadd.f32 %v1054_v14, %v6644_v21  ;;  %v6764_v39 = vadd.f32 %v1055_v51, %v6647_v12  ;;  %v8954_v51 = vld [vmem:[#allocation19_spill] sm:$0xff]  ;;  %v8955_v11 = vld [vmem:[#allocation20_spill] sm:$0xff] }
  0xc1   :  { %v6767_v48 = vadd.f32 %v1056_v3, %v6650_v8  ;;  %v8938_v10 = vrot.slane %v8937_v49, %v8929_v42  ;;  %v6776_v55 = vadd.f32 %v1057_v28, %v6653_v7  ;;  %v6779_v27 = vadd.f32 %v1058_v5, %v6656_v9 }
  0xc2   :  { %v6752_v60 = vrot.slane %v8931_v34, %v8929_v42  ;;  %v6758_v29 = vrot.slane %v8933_v31, %v8929_v42  ;;  %8934 = vst [vmem:[#allocation49_spill] sm:$0xff] %v6761_v17  ;;  %8935 = vst [vmem:[#allocation50_spill] sm:$0xff] %v6764_v39  ;;  %v6782_v14 = vadd.f32 %v1059_v25, %v6659_v38  ;;  %v5117_v34 = vld [vmem:[%s8475_s0 + $0xe8] sm:$0x1]  ;;  %v8956_v31 = vld [vmem:[#allocation10_spill] sm:$0xff] }
  0xc3   :  { %8936 = vst [vmem:[#allocation51_spill] sm:$0xff] %v6767_v48  ;;  %v6773_v24 = vrot.slane %v8938_v10, %v8929_v42  ;;  %8939 = vst [vmem:[#allocation25_spill] sm:$0xff] %v6776_v55  ;;  %v6785_v21 = vadd.f32 %v1060_v61, %v6662_v30  ;;  %v6788_v3 = vadd.f32 %v1061_v19, %v6665_v13  ;;  %v8948_v61 = vld [vmem:[#allocation14_spill] sm:$0xff]  ;;  %v5115_v19 = vld [vmem:[%s8475_s0 + $0xd8] sm:$0x1] }
  0xc4   :  { %8940 = vst [vmem:[#allocation26_spill] sm:$0xff] %v6779_v27  ;;  %8941 = vst [vmem:[#allocation27_spill] sm:$0xff] %v6782_v14  ;;  %v6791_v12 = vadd.f32 %v1062_v40, %v6668_v57  ;;  %v6794_v8 = vadd.f32 %v1063_v1, %v6671_v56  ;;  %v6797_v28 = vadd.f32 %v1064_v52, %v6674_v63  ;;  %v8949_v40 = vld [vmem:[#allocation46_spill] sm:$0xff]  ;;  %v5109_v1 = vld [vmem:[%s8475_s0 + $0x78] sm:$0x1] }
  0xc5   :  { %8942 = vst [vmem:[#allocation52_spill] sm:$0xff] %v6785_v21  ;;  %8943 = vst [vmem:[#allocation53_spill] sm:$0xff] %v6788_v3  ;;  %v6800_v7 = vadd.f32 %v1065_v32, %v6677_v50  ;;  %v6804_v25 = vmul.f32 %v6506_v16, %v6752_v60  ;;  %v6808_v9 = vmul.f32 %v8948_v61, %v6758_v29  ;;  %v5110_v16 = vld [vmem:[%s8475_s0 + $0x80] sm:$0x1]  ;;  %v5111_v57 = vld [vmem:[%s8475_s0 + $0x88] sm:$0x1] }
  0xc6   :  { %8944 = vst [vmem:[#allocation54_spill] sm:$0xff] %v6791_v12  ;;  %8945 = vst [vmem:[#allocation28_spill] sm:$0xff] %v6794_v8  ;;  %v6812_v38 = vmul.f32 %v8949_v40, %v6773_v24  ;;  %v6818_v30 = vmul.f32 %v5109_v1, %v6752_v60  ;;  %v6824_v13 = vmul.f32 %v5110_v16, %v6758_v29  ;;  %v8950_v63 = vld [vmem:[#allocation9_spill] sm:$0xff]  ;;  %v5116_v32 = vld [vmem:[%s8475_s0 + $0xe0] sm:$0x1] }
  0xc7   :  { %8946 = vst [vmem:[#allocation29_spill] sm:$0xff] %v6797_v28  ;;  %8947 = vst [vmem:[#allocation30_spill] sm:$0xff] %v6800_v7  ;;  %v6830_v56 = vmul.f32 %v5111_v57, %v6773_v24  ;;  %v6834_v50 = vmul.f32 %v8950_v63, %v6752_v60  ;;  %v6838_v33 = vmul.f32 %v8951_v18, %v6758_v29  ;;  %v8957_v10 = vld [vmem:[#allocation11_spill] sm:$0xff]  ;;  %v8958_v40 = vld [vmem:[#allocation48_spill] sm:$0xff]  ;;  %v1219_v8 = vrot.slane %v6804_v25, 2 }
  0xc8   :  { %v6842_v54 = vmul.f32 %v8952_v36, %v6773_v24  ;;  %v6848_v58 = vmul.f32 %v5112_v20, %v6752_v60  ;;  %v6854_v2 = vmul.f32 %v5113_v43, %v6758_v29  ;;  %v6860_v0 = vmul.f32 %v5114_v53, %v6773_v24  ;;  %v5118_v16 = vld [vmem:[%s8475_s0 + $0x108] sm:$0x1]  ;;  %v5119_v63 = vld [vmem:[%s8475_s0 + $0x110] sm:$0x1]  ;;  %v5120_v36 = vld [vmem:[%s8475_s0 + $0x118] sm:$0x1] }
  0xc9   :  { %v6864_v26 = vmul.f32 %v8953_v47, %v6752_v60  ;;  %v6868_v23 = vmul.f32 %v8954_v51, %v6758_v29  ;;  %v6872_v5 = vmul.f32 %v8955_v11, %v6773_v24  ;;  %v1150_v52 = vmul.f32 %v5115_v19, %v6752_v60  ;;  %v8959_v43 = vld [vmem:[#allocation21_spill] sm:$0xff]  ;;  %v8960_v47 = vld [vmem:[#allocation22_spill] sm:$0xff]  ;;  %v8961_v11 = vld [vmem:[#allocation23_spill] sm:$0xff] }
  0xca   :  { %v1151_v35 = vmul.f32 %v5116_v32, %v6758_v29  ;;  %v6886_v37 = vmul.f32 %v5117_v34, %v6773_v24  ;;  %v6890_v49 = vmul.f32 %v8956_v31, %v6752_v60  ;;  %v6894_v61 = vmul.f32 %v8957_v10, %v6758_v29  ;;  %v8962_v32 = vld [vmem:[#allocation55_spill] sm:$0xff]  ;;  %v8963_v31 = vld [vmem:[#allocation56_spill] sm:$0xff]  ;;  %v8968_v42 = vld [vmem:[#allocation34_spill] sm:$0xff] }
  0xcb   :  { %v6898_v1 = vmul.f32 %v8958_v40, %v6773_v24  ;;  %v6904_v57 = vmul.f32 %v5118_v16, %v6752_v60  ;;  %v6910_v18 = vmul.f32 %v5119_v63, %v6758_v29  ;;  %v6916_v20 = vmul.f32 %v5120_v36, %v6773_v24  ;;  %v8964_v40 = vld [vmem:[#allocation57_spill] sm:$0xff]  ;;  %v8965_v63 = vld [vmem:[#allocation35_spill] sm:$0xff]  ;;  %v8969_v7 = vld [vmem:[#allocation38_spill] sm:$0xff] }
  0xcc   :  { %v6920_v53 = vmul.f32 %v8959_v43, %v6752_v60  ;;  %v6924_v51 = vmul.f32 %v8960_v47, %v6758_v29  ;;  %v6928_v19 = vmul.f32 %v8961_v11, %v6773_v24  ;;  %v6932_v34 = vmul.f32 %v6752_v60, %v8962_v32  ;;  %v8966_v43 = vld [vmem:[#allocation36_spill] sm:$0xff]  ;;  %v8967_v11 = vld [vmem:[#allocation37_spill] sm:$0xff]  ;;  %v8970_v28 = vld [vmem:[#allocation15_spill] sm:$0xff] }
  0xcd   :  { %v6936_v10 = vmul.f32 %v6758_v29, %v8963_v31  ;;  %v6940_v16 = vmul.f32 %v6773_v24, %v8964_v40  ;;  %v6944_v36 = vmul.f32 %v6752_v60, %v8965_v63  ;;  %v6948_v47 = vmul.f32 %v6758_v29, %v8966_v43  ;;  %v78_v40 = vld [vmem:[%s8475_s0 + $0x198] sm:$0x1]  ;;  %v8972_v39 = vld [vmem:[#allocation47_spill] sm:$0xff] }
  0xce   :  { %v6952_v32 = vmul.f32 %v6773_v24, %v8967_v11  ;;  %v6956_v31 = vmul.f32 %v6752_v60, %v8968_v42  ;;  %v6963_v63 = vmul.f32 %v6758_v29, %v8969_v7  ;;  %v6967_v43 = vmul.f32 %v6773_v24, %v8970_v28  ;;  %v79_v42 = vld [vmem:[%s8475_s0 + $0x1a0] sm:$0x1]  ;;  %v80_v28 = vld [vmem:[%s8475_s0 + $0x1a8] sm:$0x1] }
  0xcf   :  { %v1220_v11 = vrot.slane %v6818_v30, 2  ;;  %v1222_v12 = vrot.slane %v6808_v9, 2  ;;  %v1223_v3 = vrot.slane %v6824_v13, 2  ;;  %v1225_v21 = vrot.slane %v6812_v38, 2 }
  0xd0   :  { %v1226_v7 = vrot.slane %v6830_v56, 2  ;;  %v1228_v25 = vrot.slane %v6834_v50, 2  ;;  %v1229_v30 = vrot.slane %v6848_v58, 2  ;;  %v1231_v14 = vrot.slane %v6838_v33, 2  ;;  %v8971_v56 = vld [vmem:[#allocation18_spill] sm:$0xff] }
  0xd1   :  { %v1232_v27 = vrot.slane %v6854_v2, 2  ;;  %v1234_v9 = vrot.slane %v6842_v54, 2  ;;  %v1235_v13 = vrot.slane %v6860_v0, 2  ;;  %v1237_v38 = vrot.slane %v6864_v26, 2 }
  0xd2   :  { %v1238_v55 = vrot.slane %v1150_v52, 2  ;;  %v1171_v48 = vmul.f32 %v6752_v60, %v8971_v56  ;;  %v1172_v17 = vmul.f32 %v6758_v29, %v8972_v39  ;;  %v1240_v50 = vrot.slane %v6868_v23, 2 }
  0xd3   :  { %v1241_v58 = vrot.slane %v1151_v35, 2  ;;  %v1173_v33 = vmul.f32 %v6773_v24, %v6560_v45  ;;  %v1174_v2 = vmul.f32 %v6752_v60, %v78_v40  ;;  %v1175_v54 = vmul.f32 %v6758_v29, %v79_v42 }
  0xd4   :  { %v1176_v0 = vmul.f32 %v6773_v24, %v80_v28  ;;  %v1221_v26 = vsel %vm380_vm0, %v1219_v8, %v1220_v11  ;;  %v1224_v52 = vsel %vm380_vm0, %v1222_v12, %v1223_v3  ;;  %v1227_v56 = vsel %vm380_vm0, %v1225_v21, %v1226_v7 }
  0xd5   :  { %v1230_v39 = vsel %vm380_vm0, %v1228_v25, %v1229_v30  ;;  %v1233_v23 = vsel %vm380_vm0, %v1231_v14, %v1232_v27  ;;  %v1236_v35 = vsel %vm380_vm0, %v1234_v9, %v1235_v13  ;;  %v1239_v45 = vsel %vm380_vm0, %v1237_v38, %v1238_v55 }
  0xd6   :  { %v1243_v60 = vrot.slane %v6872_v5, 2  ;;  %v1242_v29 = vsel %vm380_vm0, %v1240_v50, %v1241_v58  ;;  %v1244_v24 = vrot.slane %v6886_v37, 2  ;;  %v1246_v8 = vrot.slane %v6890_v49, 2 }
  0xd7   :  { %v1247_v3 = vrot.slane %v6904_v57, 2  ;;  %v1249_v21 = vrot.slane %v6894_v61, 2  ;;  %v1250_v12 = vrot.slane %v6910_v18, 2  ;;  %v1252_v27 = vrot.slane %v6898_v1, 2 }
  0xd8   :  { %v1253_v14 = vrot.slane %v6916_v20, 2  ;;  %v1255_v55 = vrot.slane %v6920_v53, 2  ;;  %v1256_v5 = vrot.slane %v6932_v34, 2  ;;  %v1258_v40 = vrot.slane %v6924_v51, 2 }
  0xd9   :  { %v1259_v37 = vrot.slane %v6936_v10, 2  ;;  %v1261_v49 = vrot.slane %v6928_v19, 2  ;;  %v1262_v57 = vrot.slane %v6940_v16, 2  ;;  %v1264_v61 = vrot.slane %v6944_v36, 2 }
  0xda   :  { %v1265_v18 = vrot.slane %v6956_v31, 2  ;;  %v1267_v1 = vrot.slane %v6948_v47, 2  ;;  %v1268_v20 = vrot.slane %v6963_v63, 2  ;;  %v1270_v53 = vrot.slane %v6952_v32, 2 }
  0xdb   :  { %v1271_v34 = vrot.slane %v6967_v43, 2  ;;  %v1273_v11 = vrot.slane %v1171_v48, 2  ;;  %v1274_v51 = vrot.slane %v1174_v2, 2  ;;  %v1276_v42 = vrot.slane %v1172_v17, 2 }
  0xdc   :  { %v1277_v10 = vrot.slane %v1175_v54, 2  ;;  %v1245_v19 = vsel %vm380_vm0, %v1243_v60, %v1244_v24  ;;  %v1248_v16 = vsel %vm380_vm0, %v1246_v8, %v1247_v3  ;;  %v1279_v7 = vrot.slane %v1173_v33, 2  ;;  %v8973_v24 = vld [vmem:[#allocation49_spill] sm:$0xff] }
  0xdd   :  { %v1280_v36 = vrot.slane %v1176_v0, 2  ;;  %v1251_v31 = vsel %vm380_vm0, %v1249_v21, %v1250_v12  ;;  %v1254_v47 = vsel %vm380_vm0, %v1252_v27, %v1253_v14  ;;  %v1257_v63 = vsel %vm380_vm0, %v1255_v55, %v1256_v5  ;;  %v8980_v21 = vld [vmem:[#allocation53_spill] sm:$0xff]  ;;  %v8981_v5 = vld [vmem:[#allocation54_spill] sm:$0xff] }
  0xde   :  { %v1260_v32 = vsel %vm380_vm0, %v1258_v40, %v1259_v37  ;;  %v1263_v43 = vsel %vm380_vm0, %v1261_v49, %v1262_v57  ;;  %v1266_v48 = vsel %vm380_vm0, %v1264_v61, %v1265_v18  ;;  %v1269_v17 = vsel %vm380_vm0, %v1267_v1, %v1268_v20  ;;  %v8982_v37 = vld [vmem:[#allocation28_spill] sm:$0xff]  ;;  %v8983_v57 = vld [vmem:[#allocation29_spill] sm:$0xff]  ;;  %v8984_v18 = vld [vmem:[#allocation2_spill] sm:$0xff] }
  0xdf   :  { %v1272_v28 = vsel %vm380_vm0, %v1270_v53, %v1271_v34  ;;  %v1275_v25 = vsel %vm380_vm0, %v1273_v11, %v1274_v51  ;;  %v1278_v30 = vsel %vm380_vm0, %v1276_v42, %v1277_v10  ;;  %v1303_v9 = vadd.f32 %v1221_v26, %v6722_v44  ;;  %v8974_v26 = vld [vmem:[#allocation50_spill] sm:$0xff] }
  0xe0   :  { %v1304_v13 = vadd.f32 %v1224_v52, %v6725_v4  ;;  %v1281_v38 = vsel %vm380_vm0, %v1279_v7, %v1280_v36  ;;  %v1305_v50 = vadd.f32 %v1227_v56, %v6728_v6  ;;  %v1306_v58 = vadd.f32 %v1230_v39, %v6731_v15  ;;  %v8975_v52 = vld [vmem:[#allocation51_spill] sm:$0xff]  ;;  %v8976_v15 = vld [vmem:[#allocation25_spill] sm:$0xff]  ;;  %v8985_v20 = vld [vmem:[#allocation30_spill] sm:$0xff] }
  0xe1   :  { %v1307_v33 = vadd.f32 %v1233_v23, %v6734_v59  ;;  %v1308_v2 = vadd.f32 %v1236_v35, %v6737_v41  ;;  %v1309_v54 = vadd.f32 %v1239_v45, %v6740_v46  ;;  %v1310_v0 = vadd.f32 %v1242_v29, %v6743_v22  ;;  %v8977_v59 = vld [vmem:[#allocation26_spill] sm:$0xff]  ;;  %v8978_v46 = vld [vmem:[#allocation27_spill] sm:$0xff]  ;;  %v8979_v22 = vld [vmem:[#allocation52_spill] sm:$0xff] }
  0xe2   :  { %v1311_v60 = vadd.f32 %v1245_v19, %v6746_v62  ;;  %v1312_v44 = vadd.f32 %v1248_v16, %v8973_v24  ;;  %v1313_v4 = vadd.f32 %v1251_v31, %v8974_v26  ;;  %v7051_v8 = vadd.f32 %v1254_v47, %v8975_v52 }
  0xe3   :  { %v5123_v6 = vmov 1966171168   ;;  %v7054_v39 = vadd.f32 %v1257_v63, %v8976_v15  ;;  %v7057_v41 = vadd.f32 %v1260_v32, %v8977_v59  ;;  %v7060_v23 = vadd.f32 %v1263_v43, %v8978_v46 }
  0xe4   :  { %v1349_v56 = vunpack.c.l.s4 %v5123_v6  ;;  %v7063_v62 = vadd.f32 %v1266_v48, %v8979_v22  ;;  %v1345_v35 = vcombine.low %v1303_v9, %v1304_v13  ;;  %v1346_v45 = vcombine.high %v1303_v9, %v1304_v13 }
  0xe5   :  { %v1347_v29 = vcombine.high %v1305_v50, %v1305_v50  ;;  %v7066_v12 = vadd.f32 %v1269_v17, %v8980_v21  ;;  %v1411_v27 = vcombine.low %v1306_v58, %v1307_v33  ;;  %v1412_v14 = vcombine.high %v1306_v58, %v1307_v33 }
  0xe6   :  { %v1350_v3 = vunpack.c.0.s8 %v1349_v56  ;;  %v1413_v55 = vcombine.high %v1308_v2, %v1308_v2  ;;  %v7069_v40 = vadd.f32 %v1272_v28, %v8981_v5  ;;  %v7072_v49 = vadd.f32 %v1275_v25, %v8982_v37 }
  0xe7   :  { %v7075_v61 = vadd.f32 %v1278_v30, %v8983_v57  ;;  %v7081_v53 = vadd.f32 %v1281_v38, %v8985_v20  ;;  %v1477_v34 = vcombine.low %v1309_v54, %v1310_v0  ;;  %v1478_v11 = vcombine.high %v1309_v54, %v1310_v0 }
  0xe8   :  { %v7078_v1 = vsub.s32 %v1350_v3, %v8984_v18  ;;  %v1479_v51 = vcombine.high %v1311_v60, %v1311_v60  ;;  %v1543_v63 = vcombine.low %v1312_v44, %v1313_v4  ;;  %v1544_v32 = vcombine.high %v1312_v44, %v1313_v4 }
  0xe9   :  { %v1545_v43 = vcombine.high %v7051_v8, %v7051_v8  ;;  %v1609_v48 = vcombine.low %v7054_v39, %v7057_v41  ;;  %v1610_v25 = vcombine.high %v7054_v39, %v7057_v41  ;;  %v1611_v30 = vcombine.high %v7060_v23, %v7060_v23 }
  0xea   :  { %v1354_v42 = vrot.slane %v1345_v35, %v7078_v1  ;;  %v1361_v10 = vrot.slane %v1346_v45, %v7078_v1  ;;  %v1368_v19 = vrot.slane %v1305_v50, %v7078_v1  ;;  %v1375_v16 = vrot.slane %v1347_v29, %v7078_v1 }
  0xeb   :  { %v1420_v7 = vrot.slane %v1411_v27, %v7078_v1  ;;  %v1427_v36 = vrot.slane %v1412_v14, %v7078_v1  ;;  %v1434_v31 = vrot.slane %v1308_v2, %v7078_v1  ;;  %v1441_v47 = vrot.slane %v1413_v55, %v7078_v1 }
  0xec   :  { %v1378_v17 = vcombine.low %v1361_v10, %v1375_v16  ;;  %v1675_v9 = vcombine.low %v7063_v62, %v7066_v12  ;;  %v1676_v13 = vcombine.high %v7063_v62, %v7066_v12  ;;  %v1677_v38 = vcombine.high %v7069_v40, %v7069_v40 }
  0xed   :  { %v1442_v28 = vcombine.low %v1420_v7, %v1434_v31  ;;  %v1741_v50 = vcombine.low %v7072_v49, %v7075_v61  ;;  %v1376_v58 = vcombine.low %v1354_v42, %v1368_v19  ;;  %v1444_v33 = vcombine.low %v1427_v36, %v1441_v47 }
  0xee   :  { %v1742_v2 = vcombine.high %v7072_v49, %v7075_v61  ;;  %v1743_v54 = vcombine.high %v7081_v53, %v7081_v53  ;;  %v1377_v0 = vcombine.high %v1354_v42, %v1368_v19  ;;  %v1379_v24 = vcombine.high %v1361_v10, %v1375_v16 }
  0xef   :  { %v1443_v44 = vcombine.high %v1420_v7, %v1434_v31  ;;  %v1445_v26 = vcombine.high %v1427_v36, %v1441_v47  ;;  %v7112_v4 = vrot.slane %v1378_v17, %v7078_v1  ;;  %v7115_v52 = vrot.slane %v1442_v28, %v7078_v1 }
  0xf0   :  { %v1486_v6 = vrot.slane %v1477_v34, %v7078_v1  ;;  %v1493_v56 = vrot.slane %v1478_v11, %v7078_v1  ;;  %v1500_v15 = vrot.slane %v1311_v60, %v7078_v1  ;;  %v1507_v39 = vrot.slane %v1479_v51, %v7078_v1 }
  0xf1   :  { %8986 = vst [vmem:[#allocation4_spill] sm:$0xff] %v7112_v4  ;;  %8987 = vst [vmem:[#allocation39_spill] sm:$0xff] %v7115_v52  ;;  %v1552_v59 = vrot.slane %v1543_v63, %v7078_v1  ;;  %v1559_v41 = vrot.slane %v1544_v32, %v7078_v1  ;;  %v7124_v46 = vrot.slane %v1376_v58, %v7078_v1 }
  0xf2   :  { %v7127_v22 = vrot.slane %v1444_v33, %v7078_v1  ;;  %v1566_v62 = vrot.slane %v7051_v8, %v7078_v1  ;;  %v1573_v35 = vrot.slane %v1545_v43, %v7078_v1  ;;  %v7133_v45 = vrot.slane %v1377_v0, %v7078_v1 }
  0xf3   :  { %v7136_v60 = vrot.slane %v1379_v24, %v7078_v1  ;;  %v7139_v29 = vrot.slane %v1443_v44, %v7078_v1  ;;  %v1510_v3 = vcombine.low %v1493_v56, %v1507_v39  ;;  %v7142_v21 = vrot.slane %v1445_v26, %v7078_v1 }
  0xf4   :  { %8988 = vst [vmem:[#allocation40_spill] sm:$0xff] %v7127_v22  ;;  %v1508_v12 = vcombine.low %v1486_v6, %v1500_v15  ;;  %v1509_v27 = vcombine.high %v1486_v6, %v1500_v15  ;;  %v1574_v14 = vcombine.low %v1552_v59, %v1566_v62  ;;  %v7146_v8 = vcombine.high %v7112_v4, %v7112_v4 }
  0xf5   :  { %8989 = vst [vmem:[#allocation42_spill] sm:$0xff] %v7136_v60  ;;  %8990 = vst [vmem:[#allocation43_spill] sm:$0xff] %v7139_v29  ;;  %v7150_v55 = vcombine.high %v7115_v52, %v7115_v52  ;;  %v1511_v5 = vcombine.high %v1493_v56, %v1507_v39  ;;  %v1576_v37 = vcombine.low %v1559_v41, %v1573_v35 }
  0xf6   :  { %8991 = vst [vmem:[#allocation44_spill] sm:$0xff] %v7142_v21  ;;  %8992 = vst [vmem:[#allocation6_spill] sm:$0xff] %v7146_v8  ;;  %v7154_v57 = vcombine.high %v7127_v22, %v7127_v22  ;;  %v1575_v18 = vcombine.high %v1552_v59, %v1566_v62  ;;  %v1618_v20 = vrot.slane %v1609_v48, %v7078_v1 }
  0xf7   :  { %8993 = vst [vmem:[#allocation45_spill] sm:$0xff] %v7150_v55  ;;  %v1625_v34 = vrot.slane %v1610_v25, %v7078_v1  ;;  %v7159_v11 = vrot.slane %v1510_v3, %v7078_v1  ;;  %v1577_v51 = vcombine.high %v1559_v41, %v1573_v35  ;;  %v7162_v42 = vrot.slane %v1574_v14, %v7078_v1 }
  0xf8   :  { %8994 = vst [vmem:[#allocation31_spill] sm:$0xff] %v7154_v57  ;;  %v1632_v10 = vrot.slane %v7060_v23, %v7078_v1  ;;  %v7168_v19 = vcombine.high %v7139_v29, %v7139_v29  ;;  %v7171_v16 = vrot.slane %v1508_v12, %v7078_v1  ;;  %v7174_v7 = vrot.slane %v1509_v27, %v7078_v1 }
  0xf9   :  { %8995 = vst [vmem:[#allocation32_spill] sm:$0xff] %v7159_v11  ;;  %8996 = vst [vmem:[#allocation33_spill] sm:$0xff] %v7162_v42  ;;  %v1639_v36 = vrot.slane %v1611_v30, %v7078_v1  ;;  %v7178_v31 = vrot.slane %v1511_v5, %v7078_v1  ;;  %v7181_v47 = vrot.slane %v1576_v37, %v7078_v1 }
  0xfa   :  { %8997 = vst [vmem:[#allocation12_spill] sm:$0xff] %v7168_v19  ;;  %8998 = vst [vmem:[#allocation58_spill] sm:$0xff] %v7171_v16  ;;  %v1684_v23 = vrot.slane %v1675_v9, %v7078_v1  ;;  %v1691_v63 = vrot.slane %v1676_v13, %v7078_v1  ;;  %v7186_v32 = vrot.slane %v1575_v18, %v7078_v1 }
  0xfb   :  { %8999 = vst [vmem:[#allocation59_spill] sm:$0xff] %v7174_v7  ;;  %9000 = vst [vmem:[#allocation60_spill] sm:$0xff] %v7178_v31  ;;  %v1642_v43 = vcombine.low %v1625_v34, %v1639_v36  ;;  %v1698_v48 = vrot.slane %v7069_v40, %v7078_v1  ;;  %v1705_v17 = vrot.slane %v1677_v38, %v7078_v1 }
  0xfc   :  { %9001 = vst [vmem:[#allocation41_spill] sm:$0xff] %v7181_v47  ;;  %9002 = vst [vmem:[#allocation8_spill] sm:$0xff] %v7186_v32  ;;  %v7193_v28 = vcombine.high %v7159_v11, %v7159_v11  ;;  %v7196_v25 = vrot.slane %v1577_v51, %v7078_v1  ;;  %v7200_v30 = vcombine.high %v7162_v42, %v7162_v42 }
  0xfd   :  { %v1640_v9 = vcombine.low %v1618_v20, %v1632_v10  ;;  %v1641_v13 = vcombine.high %v1618_v20, %v1632_v10  ;;  %v1643_v58 = vcombine.high %v1625_v34, %v1639_v36  ;;  %v1706_v33 = vcombine.low %v1684_v23, %v1698_v48 }
  0xfe   :  { %9003 = vst [vmem:[#allocation13_spill] sm:$0xff] %v7193_v28  ;;  %9004 = vst [vmem:[#allocation14_spill] sm:$0xff] %v7196_v25  ;;  %v1707_v0 = vcombine.high %v1684_v23, %v1698_v48  ;;  %v7203_v40 = vrot.slane %v1642_v43, %v7078_v1  ;;  %v1708_v38 = vcombine.low %v1691_v63, %v1705_v17 }
  0xff   :  { %9005 = vst [vmem:[#allocation46_spill] sm:$0xff] %v7200_v30  ;;  %v1709_v24 = vcombine.high %v1691_v63, %v1705_v17  ;;  %v1750_v44 = vrot.slane %v1741_v50, %v7078_v1  ;;  %v7211_v26 = vcombine.high %v7181_v47, %v7181_v47  ;;  %v7214_v6 = vrot.slane %v1706_v33, %v7078_v1 }
 0x100   :  { %9006 = vst [vmem:[#allocation9_spill] sm:$0xff] %v7203_v40  ;;  %v7217_v56 = vrot.slane %v1707_v0, %v7078_v1  ;;  %v1764_v15 = vrot.slane %v7081_v53, %v7078_v1  ;;  %v7223_v39 = vcombine.high %v7186_v32, %v7186_v32  ;;  %v1757_v50 = vrot.slane %v1742_v2, %v7078_v1 }
 0x101   :  { %9007 = vst [vmem:[#allocation16_spill] sm:$0xff] %v7211_v26  ;;  %9008 = vst [vmem:[#allocation17_spill] sm:$0xff] %v7214_v6  ;;  %v1771_v59 = vrot.slane %v1743_v54, %v7078_v1  ;;  %v1856_v41 = vcombine.low %v7124_v46, %v7133_v45  ;;  %v7236_v62 = vrot.slane %v1640_v9, %v7078_v1 }
 0x102   :  { %9009 = vst [vmem:[#allocation24_spill] sm:$0xff] %v7217_v56  ;;  %9010 = vst [vmem:[#allocation19_spill] sm:$0xff] %v7223_v39  ;;  %v7239_v35 = vrot.slane %v1641_v13, %v7078_v1  ;;  %v7242_v3 = vrot.slane %v1643_v58, %v7078_v1  ;;  %v7245_v49 = vrot.slane %v1708_v38, %v7078_v1 }
 0x103   :  { %9011 = vst [vmem:[#allocation20_spill] sm:$0xff] %v7236_v62  ;;  %v7249_v61 = vcombine.high %v7203_v40, %v7203_v40  ;;  %v7252_v53 = vrot.slane %v1709_v24, %v7078_v1  ;;  %v1772_v2 = vcombine.low %v1750_v44, %v1764_v15  ;;  %v4816_v54 = vcombine.high %v7124_v46, %v7133_v45 }
 0x104   :  { %9012 = vst [vmem:[#allocation10_spill] sm:$0xff] %v7239_v35  ;;  %9013 = vst [vmem:[#allocation11_spill] sm:$0xff] %v7242_v3  ;;  %v7258_v12 = vcombine.high %v7214_v6, %v7214_v6  ;;  %v7262_v27 = vcombine.high %v7217_v56, %v7217_v56  ;;  %v1858_v14 = vcombine.low %v7112_v4, %v7136_v60 }
 0x105   :  { %9014 = vst [vmem:[#allocation48_spill] sm:$0xff] %v7245_v49  ;;  %9015 = vst [vmem:[#allocation21_spill] sm:$0xff] %v7249_v61  ;;  %v1859_v5 = vcombine.low %v7146_v8, %v7115_v52  ;;  %v1773_v37 = vcombine.high %v1750_v44, %v1764_v15  ;;  %v1774_v18 = vcombine.low %v1757_v50, %v1771_v59 }
 0x106   :  { %9016 = vst [vmem:[#allocation22_spill] sm:$0xff] %v7252_v53  ;;  %9017 = vst [vmem:[#allocation23_spill] sm:$0xff] %v7258_v12  ;;  %v1866_v20 = vrot.slane %v1856_v41, %v7078_v1  ;;  %v1873_v34 = vrot.slane %v4816_v54, %v7078_v1  ;;  %v7272_v51 = vcombine.high %v7245_v49, %v7245_v49 }
 0x107   :  { %9018 = vst [vmem:[#allocation55_spill] sm:$0xff] %v7262_v27  ;;  %v1775_v10 = vcombine.high %v1757_v50, %v1771_v59  ;;  %v1880_v36 = vrot.slane %v1858_v14, %v7078_v1  ;;  %v1887_v23 = vrot.slane %v1859_v5, %v7078_v1  ;;  %v7277_v63 = vrot.slane %v1772_v2, %v7078_v1 }
 0x108   :  { %9019 = vst [vmem:[#allocation56_spill] sm:$0xff] %v7272_v51  ;;  %v1888_v43 = vcombine.low %v1866_v20, %v1873_v34  ;;  %v1889_v48 = vcombine.high %v1866_v20, %v1873_v34  ;;  %v1923_v17 = vcombine.low %v7139_v29, %v7150_v55  ;;  %v1924_v58 = vcombine.low %v7168_v19, %v7127_v22 }
 0x109   :  { %9020 = vst [vmem:[#allocation57_spill] sm:$0xff] %v7277_v63  ;;  %v1890_v9 = vcombine.low %v1880_v36, %v1887_v23  ;;  %v1891_v13 = vcombine.high %v1880_v36, %v1887_v23  ;;  %v1925_v33 = vcombine.low %v7142_v21, %v7154_v57  ;;  %v7286_v0 = vrot.slane %v1774_v18, %v7078_v1 }
 0x10a   :  { %v7289_v38 = vrot.slane %v1773_v37, %v7078_v1  ;;  %v1926_v24 = vcombine.low %v7171_v16, %v7174_v7  ;;  %v1933_v44 = vrot.slane %v1923_v17, %v7078_v1  ;;  %v7295_v15 = vrot.slane %v1888_v43, %v7078_v1 }
 0x10b   :  { %9021 = vst [vmem:[#allocation35_spill] sm:$0xff] %v7286_v0  ;;  %v7298_v50 = vrot.slane %v1890_v9, %v7078_v1  ;;  %v1940_v59 = vrot.slane %v1924_v58, %v7078_v1  ;;  %v1947_v41 = vrot.slane %v1925_v33, %v7078_v1  ;;  %v4817_v54 = vcombine.high %v7171_v16, %v7174_v7 }
 0x10c   :  { %9022 = vst [vmem:[#allocation36_spill] sm:$0xff] %v7289_v38  ;;  %v1954_v2 = vrot.slane %v1926_v24, %v7078_v1  ;;  %v1991_v14 = vcombine.low %v7159_v11, %v7178_v31  ;;  %v1992_v5 = vcombine.low %v7193_v28, %v7162_v42  ;;  %v7310_v37 = vrot.slane %v1775_v10, %v7078_v1 }
 0x10d   :  { %v7313_v18 = vrot.slane %v1889_v48, %v7078_v1  ;;  %v7316_v20 = vrot.slane %v1891_v13, %v7078_v1  ;;  %v1955_v34 = vcombine.low %v1933_v44, %v1940_v59  ;;  %v1956_v36 = vcombine.high %v1933_v44, %v1940_v59 }
 0x10e   :  { %9023 = vst [vmem:[#allocation37_spill] sm:$0xff] %v7310_v37  ;;  %v1957_v23 = vcombine.low %v1947_v41, %v1954_v2  ;;  %v1958_v43 = vcombine.high %v1947_v41, %v1954_v2  ;;  %v1993_v17 = vcombine.low %v7186_v32, %v7200_v30  ;;  %v2000_v58 = vrot.slane %v4817_v54, %v7078_v1 }
 0x10f   :  { %v7321_v9 = vrot.slane %v1955_v34, %v7078_v1  ;;  %v2007_v10 = vrot.slane %v1991_v14, %v7078_v1  ;;  %v2014_v48 = vrot.slane %v1992_v5, %v7078_v1  ;;  %v7328_v13 = vcombine.high %v7286_v0, %v7286_v0 }
 0x110   :  { %v7333_v24 = vrot.slane %v1957_v23, %v7078_v1  ;;  %v2021_v44 = vrot.slane %v1993_v17, %v7078_v1  ;;  %v7337_v59 = vrot.slane %v1956_v36, %v7078_v1  ;;  %v7340_v41 = vrot.slane %v1958_v43, %v7078_v1 }
 0x111   :  { %9024 = vst [vmem:[#allocation34_spill] sm:$0xff] %v7328_v13  ;;  %v2057_v2 = vcombine.low %v7223_v39, %v7181_v47  ;;  %v2058_v54 = vcombine.low %v7196_v25, %v7211_v26  ;;  %v1922_v5 = vcombine.low %v7313_v18, %v7316_v20  ;;  %v2022_v34 = vcombine.low %v2000_v58, %v2007_v10 }
 0x112   :  { %v2024_v23 = vcombine.low %v2014_v48, %v2021_v44  ;;  %v1987_v36 = vcombine.low %v7321_v9, %v7333_v24  ;;  %v2023_v17 = vcombine.high %v2000_v58, %v2007_v10  ;;  %v2025_v43 = vcombine.high %v2014_v48, %v2021_v44 }
 0x113   :  { %v2059_v33 = vcombine.low %v7236_v62, %v7239_v35  ;;  %v1988_v47 = vcombine.high %v7321_v9, %v7333_v24  ;;  %v4818_v26 = vcombine.high %v7236_v62, %v7239_v35  ;;  %v2067_v14 = vrot.slane %v2057_v2, %v7078_v1 }
 0x114   :  { %v2074_v18 = vrot.slane %v2058_v54, %v7078_v1  ;;  %v1989_v20 = vcombine.low %v7337_v59, %v7340_v41  ;;  %v2124_v58 = vcombine.low %v7203_v40, %v7242_v3  ;;  %v2125_v10 = vcombine.low %v7249_v61, %v7214_v6 }
 0x115   :  { %v2081_v25 = vrot.slane %v2059_v33, %v7078_v1  ;;  %v2032_v9 = vrot.slane %v2022_v34, %v7078_v1  ;;  %v2046_v48 = vrot.slane %v2024_v23, %v7078_v1  ;;  %v2088_v24 = vrot.slane %v4818_v26, %v7078_v1 }
 0x116   :  { %v2089_v44 = vcombine.low %v2067_v14, %v2074_v18  ;;  %v2039_v2 = vrot.slane %v2023_v17, %v7078_v1  ;;  %v2053_v54 = vrot.slane %v2025_v43, %v7078_v1  ;;  %v2126_v33 = vcombine.low %v7217_v56, %v7258_v12 }
 0x117   :  { %v2127_v59 = vcombine.low %v7262_v27, %v7245_v49  ;;  %v2090_v41 = vcombine.high %v2067_v14, %v2074_v18  ;;  %v2091_v3 = vcombine.low %v2081_v25, %v2088_v24  ;;  %v2092_v6 = vcombine.high %v2081_v25, %v2088_v24 }
 0x118   :  { %v2134_v34 = vrot.slane %v2124_v58, %v7078_v1  ;;  %v2099_v23 = vrot.slane %v2089_v44, %v7078_v1  ;;  %v2141_v26 = vrot.slane %v2125_v10, %v7078_v1  ;;  %v2148_v61 = vrot.slane %v2126_v33, %v7078_v1 }
 0x119   :  { %v2155_v17 = vrot.slane %v2127_v59, %v7078_v1  ;;  %v2054_v43 = vcombine.low %v2032_v9, %v2046_v48  ;;  %v2113_v40 = vrot.slane %v2091_v3, %v7078_v1  ;;  %v2191_v12 = vcombine.low %v7252_v53, %v7272_v51 }
 0x11a   :  { %v2192_v14 = vcombine.low %v7277_v63, %v7289_v38  ;;  %v2156_v25 = vcombine.low %v2134_v34, %v2141_v26  ;;  %v2157_v18 = vcombine.high %v2134_v34, %v2141_v26  ;;  %v2055_v44 = vcombine.high %v2032_v9, %v2046_v48 }
 0x11b   :  { %v2158_v58 = vcombine.low %v2148_v61, %v2155_v17  ;;  %v2159_v24 = vcombine.high %v2148_v61, %v2155_v17  ;;  %v2056_v49 = vcombine.low %v2039_v2, %v2053_v54  ;;  %v2106_v10 = vrot.slane %v2090_v41, %v7078_v1 }
 0x11c   :  { %v4819_v33 = vcombine.high %v7277_v63, %v7289_v38  ;;  %v2120_v59 = vrot.slane %v2092_v6, %v7078_v1  ;;  %v2121_v3 = vcombine.low %v2099_v23, %v2113_v40  ;;  %v2122_v27 = vcombine.high %v2099_v23, %v2113_v40 }
 0x11d   :  { %v2166_v51 = vrot.slane %v2156_v25, %v7078_v1  ;;  %v2194_v53 = vcombine.low %v7286_v0, %v7310_v37  ;;  %v2201_v34 = vrot.slane %v2191_v12, %v7078_v1  ;;  %v2208_v61 = vrot.slane %v2192_v14, %v7078_v1 }
 0x11e   :  { %v2215_v9 = vrot.slane %v4819_v33, %v7078_v1  ;;  %v2173_v48 = vrot.slane %v2157_v18, %v7078_v1  ;;  %v2180_v2 = vrot.slane %v2158_v58, %v7078_v1  ;;  %v2187_v54 = vrot.slane %v2159_v24, %v7078_v1 }
 0x11f   :  { %v2264_v40 = vrot.slane %v7328_v13, %v7078_v1  ;;  %v2222_v6 = vrot.slane %v2194_v53, %v7078_v1  ;;  %v2223_v41 = vcombine.low %v2201_v34, %v2208_v61  ;;  %v2224_v23 = vcombine.high %v2201_v34, %v2208_v61 }
 0x120   :  { %v9025_v12 = vcombine.low %v7295_v15, %v7298_v50  ;;  %v2123_v17 = vcombine.low %v2106_v10, %v2120_v59  ;;  %v2316_v25 = vadd.f32 %v1989_v20, %v1922_v5  ;;  %v9026_v18 = vcombine.high %v7295_v15, %v7298_v50 }
 0x121   :  { %v2265_v14 = vcombine.high %v2264_v40, %v2264_v40  ;;  %v2225_v33 = vcombine.low %v2215_v9, %v2222_v6  ;;  %v2226_v24 = vcombine.high %v2215_v9, %v2222_v6  ;;  %v2233_v37 = vrot.slane %v2223_v41, %v7078_v1 }
 0x122   :  { %v2302_v26 = vadd.f32 %v1987_v36, %v9025_v12  ;;  %v2329_v58 = vadd.f32 %v1988_v47, %v9026_v18  ;;  %v2240_v13 = vrot.slane %v2224_v23, %v7078_v1  ;;  %v2188_v53 = vcombine.low %v2166_v51, %v2180_v2 }
 0x123   :  { %v2190_v0 = vcombine.low %v2173_v48, %v2187_v54  ;;  %v2272_v34 = vrot.slane %v2264_v40, %v7078_v1  ;;  %v2247_v36 = vrot.slane %v2225_v33, %v7078_v1  ;;  %v2254_v10 = vrot.slane %v2226_v24, %v7078_v1 }
 0x124   :  { %v2303_v61 = vadd.f32 %v2302_v26, %v2054_v43  ;;  %v2317_v5 = vadd.f32 %v2316_v25, %v2056_v49  ;;  %v2330_v20 = vadd.f32 %v2329_v58, %v2055_v44  ;;  %v2189_v59 = vcombine.high %v2166_v51, %v2180_v2 }
 0x125   :  { %v2279_v47 = vrot.slane %v2265_v14, %v7078_v1  ;;  %v2255_v50 = vcombine.low %v2233_v37, %v2247_v36  ;;  %v2257_v9 = vcombine.low %v2240_v13, %v2254_v10  ;;  %v2256_v48 = vcombine.high %v2233_v37, %v2247_v36 }
 0x126   :  { %v2304_v15 = vadd.f32 %v2303_v61, %v2121_v3  ;;  %v2318_v6 = vadd.f32 %v2317_v5, %v2123_v17  ;;  %v2331_v23 = vadd.f32 %v2330_v20, %v2122_v27  ;;  %v2308_v54 = vsel %vm2307_vm1, %v2272_v34, 0.0 }
 0x127   :  { %v2280_v40 = vcombine.high %v2272_v34, %v2272_v34  ;;  %v2321_v26 = vsel %vm2307_vm1, %v2279_v47, 0.0  ;;  %v7418_v51 = vcombine.high %v7124_v46, %v7124_v46  ;;  %v7422_v44 = vcombine.high %v7133_v45, %v7133_v45 }
 0x128   :  { %v2305_v41 = vadd.f32 %v2304_v15, %v2188_v53  ;;  %v2319_v43 = vadd.f32 %v2318_v6, %v2190_v0  ;;  %v2332_v49 = vadd.f32 %v2331_v23, %v2189_v59  ;;  %v7426_v27 = vcombine.high %v7171_v16, %v7171_v16 }
 0x129   :  { %9027 = vst [vmem:[#allocation38_spill] sm:$0xff] %v7418_v51  ;;  %9028 = vst [vmem:[#allocation15_spill] sm:$0xff] %v7422_v44  ;;  %v7430_v0 = vcombine.high %v7174_v7, %v7174_v7  ;;  %v7434_v3 = vcombine.high %v7236_v62, %v7236_v62  ;;  %v7438_v2 = vcombine.high %v7239_v35, %v7239_v35  ;;  %v2334_v33 = vsel %vm2307_vm1, %v2280_v40, 0.0 }
 0x12a   :  { %v2306_v12 = vadd.f32 %v2305_v41, %v2255_v50  ;;  %v2320_v13 = vadd.f32 %v2319_v43, %v2257_v9  ;;  %9029 = vst [vmem:[#allocation18_spill] sm:$0xff] %v7426_v27  ;;  %v2333_v14 = vadd.f32 %v2332_v49, %v2256_v48  ;;  %v7442_v25 = vcombine.high %v7277_v63, %v7277_v63 }
 0x12b   :  { %9030 = vst [vmem:[#allocation47_spill] sm:$0xff] %v7430_v0  ;;  %9031 = vst [vmem:[#allocation49_spill] sm:$0xff] %v7434_v3  ;;  %v7446_v18 = vcombine.high %v7289_v38, %v7289_v38  ;;  %v2346_v24 = vmul.f32 %v7124_v46, %v7124_v46  ;;  %v2347_v53 = vmul.f32 %v7133_v45, %v7133_v45 }
 0x12c   :  { %v2309_v37 = vadd.f32 %v2308_v54, %v2306_v12  ;;  %9032 = vst [vmem:[#allocation50_spill] sm:$0xff] %v7438_v2  ;;  %v2322_v17 = vadd.f32 %v2321_v26, %v2320_v13  ;;  %9033 = vst [vmem:[#allocation51_spill] sm:$0xff] %v7442_v25  ;;  %v2348_v34 = vmul.f32 %v7418_v51, %v7418_v51 }
 0x12d   :  { %9034 = vst [vmem:[#allocation25_spill] sm:$0xff] %v7446_v18  ;;  %v2349_v61 = vmul.f32 %v7422_v44, %v7422_v44  ;;  %v2350_v36 = vmul.f32 %v7112_v4, %v7112_v4  ;;  %v2351_v10 = vmul.f32 %v7136_v60, %v7136_v60  ;;  %v2352_v5 = vmul.f32 %v7146_v8, %v7146_v8 }
 0x12e   :  { %v2310_v58 = vrot.slane %v2309_v37, 4  ;;  %v2353_v20 = vmul.f32 %v7115_v52, %v7115_v52  ;;  %v2323_v59 = vrot.slane %v2322_v17, 4  ;;  %v7465_v47 = vadd.f32 %v2334_v33, %v2333_v14 }
 0x12f   :  { %v2354_v15 = vmul.f32 %v7139_v29, %v7139_v29  ;;  %v2355_v50 = vmul.f32 %v7150_v55, %v7150_v55  ;;  %v2356_v6 = vmul.f32 %v7168_v19, %v7168_v19  ;;  %v2357_v41 = vmul.f32 %v7127_v22, %v7127_v22  ;;  %v9044_v22 = vld [vmem:[#allocation48_spill] sm:$0xff]  ;;  %v9045_v19 = vld [vmem:[#allocation22_spill] sm:$0xff] }
 0x130   :  { %v7471_v9 = vadd.f32 %v2310_v58, %v2309_v37  ;;  %v2358_v23 = vmul.f32 %v7142_v21, %v7142_v21  ;;  %v2359_v48 = vmul.f32 %v7154_v57, %v7154_v57  ;;  %v2360_v54 = vmul.f32 %v7171_v16, %v7171_v16  ;;  %v9041_v16 = vld [vmem:[#allocation17_spill] sm:$0xff]  ;;  %v9042_v57 = vld [vmem:[#allocation23_spill] sm:$0xff]  ;;  %v9046_v55 = vld [vmem:[#allocation56_spill] sm:$0xff] }
 0x131   :  { %v2361_v43 = vmul.f32 %v7174_v7, %v7174_v7  ;;  %v7487_v40 = vmul.f32 %v7426_v27, %v7426_v27  ;;  %v7491_v12 = vmul.f32 %v7430_v0, %v7430_v0  ;;  %v7495_v26 = vmul.f32 %v7159_v11, %v7159_v11  ;;  %v9039_v27 = vld [vmem:[#allocation11_spill] sm:$0xff]  ;;  %v9040_v7 = vld [vmem:[#allocation21_spill] sm:$0xff] }
 0x132   :  { %v7499_v49 = vmul.f32 %v7178_v31, %v7178_v31  ;;  %v7503_v13 = vmul.f32 %v7193_v28, %v7193_v28  ;;  %v7505_v37 = vadd.f32 %v2323_v59, %v2322_v17  ;;  %v7510_v58 = vmul.f32 %v7162_v42, %v7162_v42  ;;  %v9035_v59 = vld [vmem:[#allocation41_spill] sm:$0xff]  ;;  %v9036_v42 = vld [vmem:[#allocation14_spill] sm:$0xff]  ;;  %v9043_v21 = vld [vmem:[#allocation55_spill] sm:$0xff] }
 0x133   :  { %v7514_v33 = vmul.f32 %v7186_v32, %v7186_v32  ;;  %v7519_v31 = vmul.f32 %v7200_v30, %v7200_v30  ;;  %v7523_v17 = vmul.f32 %v7223_v39, %v7223_v39  ;;  %v7527_v14 = vmul.f32 %v9035_v59, %v9035_v59  ;;  %v9037_v32 = vld [vmem:[#allocation16_spill] sm:$0xff]  ;;  %v9038_v30 = vld [vmem:[#allocation9_spill] sm:$0xff] }
 0x134   :  { %v7531_v28 = vmul.f32 %v9036_v42, %v9036_v42  ;;  %v7535_v0 = vmul.f32 %v9037_v32, %v9037_v32  ;;  %v7539_v11 = vmul.f32 %v7236_v62, %v7236_v62  ;;  %v7543_v39 = vmul.f32 %v7239_v35, %v7239_v35 }
 0x135   :  { %v7547_v59 = vmul.f32 %v7434_v3, %v7434_v3  ;;  %v7551_v42 = vmul.f32 %v7438_v2, %v7438_v2  ;;  %v7555_v32 = vmul.f32 %v9038_v30, %v9038_v30  ;;  %v7559_v62 = vmul.f32 %v9039_v27, %v9039_v27 }
 0x136   :  { %v7563_v35 = vmul.f32 %v9040_v7, %v9040_v7  ;;  %v7567_v3 = vmul.f32 %v9041_v16, %v9041_v16  ;;  %v7571_v2 = vmul.f32 %v7217_v56, %v7217_v56  ;;  %v7575_v30 = vmul.f32 %v9042_v57, %v9042_v57  ;;  %v7596_v57 = vld [vmem:[%s8473_s4 + $0x230] ss:$12 sps:$4 sm:$0xff]  }
 0x137   :  { %v7579_v27 = vmul.f32 %v9043_v21, %v9043_v21  ;;  %v7583_v7 = vmul.f32 %v9044_v22, %v9044_v22  ;;  %v7587_v16 = vmul.f32 %v9045_v19, %v9045_v19  ;;  %v7591_v56 = vmul.f32 %v9046_v55, %v9046_v55  ;;  %4944 = vmatprep.subr.bf16.mxu0 %v7596_v57 }
 0x138   :  { %v7600_v21 = vmul.f32 %v7277_v63, %v7277_v63  ;;  %v7604_v22 = vmul.f32 %v7289_v38, %v7289_v38  ;;  %v2444_v29 = vcombine.low %v2346_v24, %v2347_v53  ;;  %v2445_v19 = vcombine.low %v2348_v34, %v2349_v61 }
 0x139   :  { %v7608_v52 = vmul.f32 %v7442_v25, %v7442_v25  ;;  %v2446_v55 = vcombine.low %v2350_v36, %v2351_v10  ;;  %v2447_v8 = vcombine.low %v2352_v5, %v2353_v20  ;;  %v2511_v60 = vcombine.low %v2354_v15, %v2355_v50 }
 0x13a   :  { %v2454_v44 = vrot.slane %v2444_v29, %v7078_v1  ;;  %v2461_v63 = vrot.slane %v2445_v19, %v7078_v1  ;;  %v2512_v51 = vcombine.low %v2356_v6, %v2357_v41  ;;  %v2513_v4 = vcombine.low %v2358_v23, %v2359_v48  ;;  %v9047_v6 = vld [vmem:[#allocation35_spill] sm:$0xff] }
 0x13b   :  { %v2468_v38 = vrot.slane %v2446_v55, %v7078_v1  ;;  %v2475_v24 = vrot.slane %v2447_v8, %v7078_v1  ;;  %v2514_v53 = vcombine.low %v2360_v54, %v2361_v43  ;;  %v2521_v34 = vrot.slane %v2511_v60, %v7078_v1 }
 0x13c   :  { %v7618_v61 = vmul.f32 %v7446_v18, %v7446_v18  ;;  %v2476_v36 = vcombine.low %v2454_v44, %v2461_v63  ;;  %v2528_v10 = vrot.slane %v2512_v51, %v7078_v1  ;;  %v2535_v29 = vrot.slane %v2513_v4, %v7078_v1  ;;  %v9048_v51 = vld [vmem:[#allocation37_spill] sm:$0xff] }
 0x13d   :  { %v2477_v5 = vcombine.high %v2454_v44, %v2461_v63  ;;  %v2478_v19 = vcombine.low %v2468_v38, %v2475_v24  ;;  %v2479_v20 = vcombine.high %v2468_v38, %v2475_v24  ;;  %v2542_v15 = vrot.slane %v2514_v53, %v7078_v1  ;;  %v9049_v44 = vld [vmem:[#allocation34_spill] sm:$0xff] }
 0x13e   :  { %v7624_v55 = vrot.slane %v2476_v36, %v7078_v1  ;;  %v2543_v8 = vcombine.low %v2521_v34, %v2528_v10  ;;  %v2544_v50 = vcombine.high %v2521_v34, %v2528_v10  ;;  %v2578_v60 = vcombine.low %v7487_v40, %v7491_v12 }
 0x13f   :  { %v7630_v41 = vmul.f32 %v9047_v6, %v9047_v6  ;;  %v7634_v4 = vmul.f32 %v9048_v51, %v9048_v51  ;;  %v7637_v63 = vrot.slane %v2478_v19, %v7078_v1  ;;  %v2545_v38 = vcombine.low %v2535_v29, %v2542_v15 }
 0x140   :  { %v7641_v23 = vmul.f32 %v9049_v44, %v9049_v44  ;;  %v2546_v48 = vcombine.high %v2535_v29, %v2542_v15  ;;  %v2579_v54 = vcombine.low %v7495_v26, %v7499_v49  ;;  %v2580_v43 = vcombine.low %v7503_v13, %v7510_v58 }
 0x141   :  { %v7648_v40 = vrot.slane %v2477_v5, %v7078_v1  ;;  %v7651_v12 = vrot.slane %v2479_v20, %v7078_v1  ;;  %v7654_v24 = vrot.slane %v2543_v8, %v7078_v1  ;;  %v7657_v53 = vrot.slane %v2544_v50, %v7078_v1 }
 0x142   :  { %v2508_v34 = vcombine.low %v7624_v55, %v7637_v63  ;;  %v2581_v26 = vcombine.low %v7514_v33, %v7519_v31  ;;  %v2588_v49 = vrot.slane %v2578_v60, %v7078_v1  ;;  %v2595_v13 = vrot.slane %v2579_v54, %v7078_v1 }
 0x143   :  { %v2509_v58 = vcombine.high %v7624_v55, %v7637_v63  ;;  %v7668_v36 = vrot.slane %v2545_v38, %v7078_v1  ;;  %v2602_v10 = vrot.slane %v2580_v43, %v7078_v1  ;;  %v2645_v29 = vcombine.low %v7523_v17, %v7527_v14 }
 0x144   :  { %v7674_v5 = vrot.slane %v2546_v48, %v7078_v1  ;;  %v2609_v31 = vrot.slane %v2581_v26, %v7078_v1  ;;  %v2610_v33 = vcombine.low %v2588_v49, %v2595_v13  ;;  %v2611_v19 = vcombine.high %v2588_v49, %v2595_v13 }
 0x145   :  { %v2646_v20 = vcombine.low %v7531_v28, %v7535_v0  ;;  %v2647_v15 = vcombine.low %v7539_v11, %v7543_v39  ;;  %v2648_v8 = vcombine.low %v7547_v59, %v7551_v42  ;;  %v2655_v50 = vrot.slane %v2645_v29, %v7078_v1 }
 0x146   :  { %v2612_v60 = vcombine.low %v2602_v10, %v2609_v31  ;;  %v2613_v14 = vcombine.high %v2602_v10, %v2609_v31  ;;  %v7685_v17 = vrot.slane %v2610_v33, %v7078_v1  ;;  %v7688_v38 = vrot.slane %v2611_v19, %v7078_v1 }
 0x147   :  { %v2662_v48 = vrot.slane %v2646_v20, %v7078_v1  ;;  %v2669_v28 = vrot.slane %v2647_v15, %v7078_v1  ;;  %v2676_v0 = vrot.slane %v2648_v8, %v7078_v1  ;;  %v2712_v11 = vcombine.low %v7555_v32, %v7559_v62 }
 0x148   :  { %v7696_v42 = vrot.slane %v2612_v60, %v7078_v1  ;;  %v7699_v39 = vrot.slane %v2613_v14, %v7078_v1  ;;  %v2713_v59 = vcombine.low %v7563_v35, %v7567_v3  ;;  %v2714_v54 = vcombine.low %v7571_v2, %v7575_v30 }
 0x149   :  { %v2677_v43 = vcombine.low %v2655_v50, %v2662_v48  ;;  %v2678_v26 = vcombine.high %v2655_v50, %v2662_v48  ;;  %v2679_v49 = vcombine.low %v2669_v28, %v2676_v0  ;;  %v2680_v13 = vcombine.high %v2669_v28, %v2676_v0 }
 0x14a   :  { %v2510_v10 = vcombine.low %v7648_v40, %v7651_v12  ;;  %v2575_v32 = vcombine.low %v7654_v24, %v7668_v36  ;;  %v2576_v62 = vcombine.high %v7654_v24, %v7668_v36  ;;  %v2715_v29 = vcombine.low %v7579_v27, %v7583_v7 }
 0x14b   :  { %v7714_v35 = vrot.slane %v2677_v43, %v7078_v1  ;;  %v2694_v30 = vrot.slane %v2678_v26, %v7078_v1  ;;  %v7718_v3 = vrot.slane %v2679_v49, %v7078_v1  ;;  %v2708_v2 = vrot.slane %v2680_v13, %v7078_v1 }
 0x14c   :  { %v2722_v40 = vrot.slane %v2712_v11, %v7078_v1  ;;  %v2729_v12 = vrot.slane %v2713_v59, %v7078_v1  ;;  %v2736_v31 = vrot.slane %v2714_v54, %v7078_v1  ;;  %v2743_v24 = vrot.slane %v2715_v29, %v7078_v1 }
 0x14d   :  { %v2577_v7 = vcombine.low %v7657_v53, %v7674_v5  ;;  %v2642_v27 = vcombine.low %v7685_v17, %v7696_v42  ;;  %v2644_v36 = vcombine.low %v7688_v38, %v7699_v39  ;;  %v2779_v33 = vcombine.low %v7587_v16, %v7591_v56 }
 0x14e   :  { %v2744_v19 = vcombine.low %v2722_v40, %v2729_v12  ;;  %v2745_v20 = vcombine.high %v2722_v40, %v2729_v12  ;;  %v2746_v15 = vcombine.low %v2736_v31, %v2743_v24  ;;  %v2747_v8 = vcombine.high %v2736_v31, %v2743_v24 }
 0x14f   :  { %v2780_v50 = vcombine.low %v7600_v21, %v7604_v22  ;;  %v2781_v60 = vcombine.low %v7608_v52, %v7618_v61  ;;  %v2782_v53 = vcombine.low %v7630_v41, %v7634_v4  ;;  %v2789_v5 = vrot.slane %v2779_v33, %v7078_v1 }
 0x150   :  { %v2709_v14 = vcombine.low %v7714_v35, %v7718_v3  ;;  %v2711_v38 = vcombine.low %v2694_v30, %v2708_v2  ;;  %v2754_v16 = vrot.slane %v2744_v19, %v7078_v1  ;;  %v2768_v56 = vrot.slane %v2746_v15, %v7078_v1 }
 0x151   :  { %v2796_v48 = vrot.slane %v2780_v50, %v7078_v1  ;;  %v2803_v22 = vrot.slane %v2781_v60, %v7078_v1  ;;  %v2810_v21 = vrot.slane %v2782_v53, %v7078_v1  ;;  %v2852_v52 = vrot.slane %v7641_v23, %v7078_v1 }
 0x152   :  { %v2761_v61 = vrot.slane %v2745_v20, %v7078_v1  ;;  %v2775_v41 = vrot.slane %v2747_v8, %v7078_v1  ;;  %v2776_v4 = vcombine.low %v2754_v16, %v2768_v56  ;;  %v2890_v28 = vadd.f32 %v2575_v32, %v2508_v34 }
 0x153   :  { %v2811_v0 = vcombine.low %v2789_v5, %v2796_v48  ;;  %v2812_v11 = vcombine.high %v2789_v5, %v2796_v48  ;;  %v2813_v39 = vcombine.low %v2803_v22, %v2810_v21  ;;  %v2814_v59 = vcombine.high %v2803_v22, %v2810_v21 }
 0x154   :  { %v2853_v54 = vcombine.high %v2852_v52, %v2852_v52  ;;  %v2860_v43 = vrot.slane %v2852_v52, %v7078_v1  ;;  %v2891_v26 = vadd.f32 %v2890_v28, %v2642_v27  ;;  %v2903_v49 = vadd.f32 %v2577_v7, %v2510_v10 }
 0x155   :  { %v2821_v23 = vrot.slane %v2811_v0, %v7078_v1  ;;  %v2828_v13 = vrot.slane %v2812_v11, %v7078_v1  ;;  %v2835_v29 = vrot.slane %v2813_v39, %v7078_v1  ;;  %v2842_v30 = vrot.slane %v2814_v59, %v7078_v1 }
 0x156   :  { %v2325_v2 = vrot.slane %v7505_v37, 2  ;;  %v9050_v34 = vrot.slane %v7465_v47, 4  ;;  %v2643_v40 = vcombine.high %v7685_v17, %v7696_v42  ;;  %v2892_v12 = vadd.f32 %v2891_v26, %v2709_v14 }
 0x157   :  { %v9051_v10 = vrot.slane %v7471_v9, 2  ;;  %v2778_v24 = vcombine.low %v2761_v61, %v2775_v41  ;;  %v2843_v7 = vcombine.low %v2821_v23, %v2835_v29  ;;  %v2904_v27 = vadd.f32 %v2903_v49, %v2644_v36 }
 0x158   :  { %v2337_v32 = vadd.f32 %v9050_v34, %v7465_v47  ;;  %v2710_v33 = vcombine.high %v7714_v35, %v7718_v3  ;;  %v2867_v19 = vrot.slane %v2853_v54, %v7078_v1  ;;  %v2893_v20 = vadd.f32 %v2892_v12, %v2776_v4 }
 0x159   :  { %v2313_v31 = vadd.f32 %v9051_v10, %v7471_v9  ;;  %v2916_v47 = vadd.f32 %v2576_v62, %v2509_v58  ;;  %v2845_v15 = vcombine.low %v2828_v13, %v2842_v30  ;;  %v2895_v17 = vsel %vm2307_vm1, %v2860_v43, 0.0 }
 0x15a   :  { %v2905_v42 = vadd.f32 %v2904_v27, %v2711_v38  ;;  %v2338_v8 = vrot.slane %v2337_v32, 2  ;;  %v2777_v50 = vcombine.high %v2754_v16, %v2768_v56  ;;  %v2894_v9 = vadd.f32 %v2893_v20, %v2843_v7 }
 0x15b   :  { %v2917_v60 = vadd.f32 %v2916_v47, %v2643_v40  ;;  %v2314_v53 = vrot.slane %v2313_v31, 1  ;;  %v2326_v36 = vadd.f32 %v2325_v2, %v7505_v37  ;;  %v2868_v5 = vcombine.high %v2860_v43, %v2860_v43 }
 0x15c   :  { %v2906_v35 = vadd.f32 %v2905_v42, %v2778_v24  ;;  %v2844_v3 = vcombine.high %v2821_v23, %v2835_v29  ;;  %v2896_v14 = vadd.f32 %v2895_v17, %v2894_v9  ;;  %v2908_v48 = vsel %vm2307_vm1, %v2867_v19, 0.0 }
 0x15d   :  { %v2918_v22 = vadd.f32 %v2917_v60, %v2710_v33  ;;  %v2339_v63 = vadd.f32 %v2338_v8, %v2337_v32  ;;  %v2327_v21 = vrot.slane %v2326_v36, 1  ;;  %v2921_v16 = vsel %vm2307_vm1, %v2868_v5, 0.0 }
 0x15e   :  { %v2907_v55 = vadd.f32 %v2906_v35, %v2845_v15  ;;  %v2897_v58 = vrot.slane %v2896_v14, 4  ;;  %v2315_v56 = vadd.f32 %v2314_v53, %v2313_v31 }
 0x15f   :  { %v2919_v62 = vadd.f32 %v2918_v22, %v2777_v50  ;;  %v2340_v37 = vrot.slane %v2339_v63, 1  ;;  %v2328_v0 = vadd.f32 %v2327_v21, %v2326_v36  ;;  %v9054_v21 = vld [vmem:[#allocation7_spill] sm:$0xff] }
 0x160   :  { %v2909_v38 = vadd.f32 %v2908_v48, %v2907_v55  ;;  %v2898_v52 = vadd.f32 %v2897_v58, %v2896_v14  ;;  %v2343_v39 = vmul.f32 0.020408163, %v2315_v56  ;;  %v2938_v14 = vld [vmem:[%s8476_s2] sm:$0x7]  ;;  %v9052_v55 = vld [vmem:[#allocation3_spill] sm:$0xff]  ;;  %v9053_v58 = vld [vmem:[#allocation5_spill] sm:$0xff] }
 0x161   :  { %v2920_v61 = vadd.f32 %v2919_v62, %v2844_v3  ;;  %v2341_v26 = vadd.f32 %v2340_v37, %v2339_v63  ;;  %v2344_v13 = vmul.f32 0.020408163, %v2328_v0 }
 0x162   :  { %v2910_v41 = vrot.slane %v2909_v38, 4  ;;  %v2899_v4 = vrot.slane %v2898_v52, 2  ;;  %v2932_v34 = vmul.f32 %v2343_v39, %v2343_v39 }
 0x163   :  { %v2922_v28 = vadd.f32 %v2921_v16, %v2920_v61  ;;  %v2345_v40 = vmul.f32 0.020408163, %v2341_v26  ;;  %v2933_v24 = vmul.f32 %v2344_v13, %v2344_v13 }
 0x164   :  { %v2911_v11 = vadd.f32 %v2910_v41, %v2909_v38  ;;  %v2900_v59 = vadd.f32 %v2899_v4, %v2898_v52 }
 0x165   :  { %v2923_v54 = vrot.slane %v2922_v28, 4  ;;  %v2934_v20 = vmul.f32 %v2345_v40, %v2345_v40 }
 0x166   :  { %v2912_v43 = vrot.slane %v2911_v11, 2  ;;  %v2901_v49 = vrot.slane %v2900_v59, 1 }
 0x167   :  { %v2924_v23 = vadd.f32 %v2923_v54, %v2922_v28 }
 0x168   :  { %v2913_v29 = vadd.f32 %v2912_v43, %v2911_v11  ;;  %v2902_v30 = vadd.f32 %v2901_v49, %v2900_v59 }
 0x169   :  { %v2925_v2 = vrot.slane %v2924_v23, 2 }
 0x16a   :  { %v2914_v32 = vrot.slane %v2913_v29, 1  ;;  %v2929_v10 = vmul.f32 0.020408163, %v2902_v30 }
 0x16b   :  { %v2926_v12 = vadd.f32 %v2925_v2, %v2924_v23  ;;  %v2973_v2 = vld [vmem:[%s8477_s3] sm:$0x7] }
 0x16c   :  { %v2915_v31 = vadd.f32 %v2914_v32, %v2913_v29  ;;  %v2935_v27 = vsub.f32 %v2929_v10, %v2932_v34 }
 0x16d   :  { %v2927_v7 = vrot.slane %v2926_v12, 1 }
 0x16e   :  { %v2930_v33 = vmul.f32 0.020408163, %v2915_v31  ;;  %v2939_v47 = vadd.f32 1e-05, %v2935_v27 }
 0x16f   :  { %v2928_v19 = vadd.f32 %v2927_v7, %v2926_v12 }
 0x170   :  { %v2936_v15 = vsub.f32 %v2930_v33, %v2933_v24  ;;  %5082 = vrsqrt.f32 %v2939_v47  ;;  %v9055_v33 = vld [vmem:[#allocation4_spill] sm:$0xff]  ;;  %v9056_v47 = vld [vmem:[#allocation38_spill] sm:$0xff] }
 0x171   :  { %v2931_v17 = vmul.f32 0.020408163, %v2928_v19 }
 0x172   :  { %v2940_v42 = vadd.f32 1e-05, %v2936_v15 }
 0x173   :  { %v2937_v8 = vsub.f32 %v2931_v17, %v2934_v20  ;;  %v9057_v17 = vld [vmem:[#allocation15_spill] sm:$0xff] }
 0x174   :  { %5084 = vrsqrt.f32 %v2940_v42  ;;  %v9058_v42 = vld [vmem:[#allocation42_spill] sm:$0xff] }
 0x175   :  { %v2941_v50 = vadd.f32 1e-05, %v2937_v8 }
 0x177   :  { %5086 = vrsqrt.f32 %v2941_v50  ;;  %v9059_v50 = vld [vmem:[#allocation6_spill] sm:$0xff] }
 0x17d   :  { %v5083_v9 = vpop.eup %5082 }
 0x181   :  { %v5085_v60 = vpop.eup %5084 }
 0x182   :  { %v2948_v53 = vcombine.low %v5083_v9, %v5085_v60  ;;  %v9060_v60 = vld [vmem:[#allocation39_spill] sm:$0xff] }
 0x184   :  { %v5087_v36 = vpop.eup %5086  ;;  %v2955_v5 = vrot.slane %v2948_v53, %v7078_v1 }
 0x185   :  { %v2962_v35 = vrot.slane %v5087_v36, %v7078_v1 }
 0x187   :  { %v2963_v3 = vcombine.low %v2955_v5, %v2962_v35  ;;  %v9062_v5 = vld [vmem:[#allocation45_spill] sm:$0xff] }
 0x189   :  { %v2970_v48 = vrot.slane %v2963_v3, %v7078_v1  ;;  %v9063_v3 = vld [vmem:[#allocation12_spill] sm:$0xff] }
 0x18b   :  { %v2972_v22 = vmul.f32 %v2970_v48, %v2938_v14  ;;  %v9064_v48 = vld [vmem:[#allocation40_spill] sm:$0xff] }
 0x18d   :  { %v2978_v63 = vrot.slane %v2972_v22, %v9052_v55  ;;  %v2982_v62 = vrot.slane %v2972_v22, %v9053_v58  ;;  %v2986_v38 = vrot.slane %v2972_v22, %v9054_v21 }
 0x18f   :  { %v2990_v16 = vmul.f32 %v2978_v63, %v2343_v39  ;;  %v2991_v56 = vmul.f32 %v2982_v62, %v2344_v13  ;;  %v2992_v52 = vmul.f32 %v2986_v38, %v2345_v40  ;;  %v3021_v61 = vcombine.low %v2978_v63, %v2982_v62 }
 0x190   :  { %v3022_v41 = vcombine.high %v2978_v63, %v2982_v62  ;;  %v3023_v37 = vcombine.high %v2986_v38, %v2986_v38  ;;  %v3044_v4 = vrot.slane %v2986_v38, %v7078_v1  ;;  %v9065_v63 = vld [vmem:[#allocation44_spill] sm:$0xff]  ;;  %v9066_v38 = vld [vmem:[#allocation31_spill] sm:$0xff] }
 0x191   :  { %v2996_v28 = vcombine.low %v2990_v16, %v2991_v56  ;;  %v3010_v0 = vrot.slane %v2992_v52, %v7078_v1  ;;  %v3030_v11 = vrot.slane %v3021_v61, %v7078_v1  ;;  %v9067_v56 = vld [vmem:[#allocation58_spill] sm:$0xff]  ;;  %v9068_v61 = vld [vmem:[#allocation59_spill] sm:$0xff] }
 0x192   :  { %v3037_v59 = vrot.slane %v3022_v41, %v7078_v1  ;;  %v3051_v54 = vrot.slane %v3023_v37, %v7078_v1 }
 0x193   :  { %v3003_v43 = vrot.slane %v2996_v28, %v7078_v1  ;;  %v3052_v26 = vcombine.low %v3030_v11, %v3044_v4  ;;  %v3053_v39 = vcombine.high %v3030_v11, %v3044_v4 }
 0x194   :  { %v3054_v49 = vcombine.low %v3037_v59, %v3051_v54  ;;  %v3055_v23 = vcombine.high %v3037_v59, %v3051_v54  ;;  %v9070_v59 = vld [vmem:[#allocation47_spill] sm:$0xff] }
 0x195   :  { %v3011_v13 = vcombine.low %v3003_v43, %v3010_v0  ;;  %v7794_v29 = vrot.slane %v3052_v26, %v7078_v1  ;;  %v7797_v30 = vrot.slane %v3053_v39, %v7078_v1  ;;  %v9069_v0 = vld [vmem:[#allocation18_spill] sm:$0xff]  ;;  %v9071_v43 = vld [vmem:[#allocation32_spill] sm:$0xff] }
 0x196   :  { %v7803_v34 = vrot.slane %v3054_v49, %v7078_v1  ;;  %v7806_v32 = vrot.slane %v3055_v23, %v7078_v1  ;;  %v9072_v23 = vld [vmem:[#allocation60_spill] sm:$0xff] }
 0x197   :  { %v3018_v40 = vrot.slane %v3011_v13, %v7078_v1  ;;  %v7811_v12 = vcombine.high %v7794_v29, %v7794_v29  ;;  %v7815_v10 = vcombine.high %v7797_v30, %v7797_v30  ;;  %v3096_v31 = vmul.f32 %v7794_v29, %v7124_v46 }
 0x198   :  { %v7821_v24 = vcombine.high %v7803_v34, %v7803_v34  ;;  %v7825_v7 = vcombine.high %v7806_v32, %v7806_v32  ;;  %v3097_v27 = vmul.f32 %v7797_v30, %v7133_v45  ;;  %v3100_v19 = vmul.f32 %v7803_v34, %v9055_v33  ;;  %v9061_v45 = vld [vmem:[#allocation43_spill] sm:$0xff] }
 0x199   :  { %v3020_v20 = vsub.f32 %v2973_v2, %v3018_v40  ;;  %v3098_v15 = vmul.f32 %v7811_v12, %v9056_v47  ;;  %v3099_v46 = vmul.f32 %v7815_v10, %v9057_v17  ;;  %v3101_v8 = vmul.f32 %v7806_v32, %v9058_v42  ;;  %v9073_v2 = vld [vmem:[#allocation13_spill] sm:$0xff]  ;;  %v9075_v42 = vld [vmem:[#allocation8_spill] sm:$0xff] }
 0x19a   :  { %v3102_v9 = vmul.f32 %v7821_v24, %v9059_v50  ;;  %v3103_v53 = vmul.f32 %v7825_v7, %v9060_v60  ;;  %v3104_v36 = vmul.f32 %v7794_v29, %v9061_v45  ;;  %v3105_v35 = vmul.f32 %v7797_v30, %v9062_v5  ;;  %v9074_v47 = vld [vmem:[#allocation33_spill] sm:$0xff]  ;;  %v9076_v5 = vld [vmem:[#allocation46_spill] sm:$0xff] }
 0x19b   :  { %v3106_v14 = vmul.f32 %v7811_v12, %v9063_v3  ;;  %v3107_v22 = vmul.f32 %v7815_v10, %v9064_v48  ;;  %v3108_v62 = vmul.f32 %v7803_v34, %v9065_v63  ;;  %v3109_v16 = vmul.f32 %v7806_v32, %v9066_v38  ;;  %v9077_v48 = vld [vmem:[#allocation19_spill] sm:$0xff] }
 0x19c   :  { %v3110_v52 = vmul.f32 %v7821_v24, %v9067_v56  ;;  %v3111_v41 = vmul.f32 %v7825_v7, %v9068_v61  ;;  %v3149_v37 = vrot.slane %v3020_v20, %v9052_v55  ;;  %v3153_v4 = vrot.slane %v3020_v20, %v9053_v58  ;;  %v9078_v56 = vld [vmem:[#allocation41_spill] sm:$0xff] }
 0x19d   :  { %v3157_v28 = vrot.slane %v3020_v20, %v9054_v21  ;;  %v7862_v11 = vmul.f32 %v7794_v29, %v9069_v0  ;;  %v7866_v54 = vmul.f32 %v7797_v30, %v9070_v59  ;;  %v7870_v26 = vmul.f32 %v7811_v12, %v9071_v43 }
 0x19e   :  { %v3158_v39 = vcombine.low %v3149_v37, %v3153_v4  ;;  %v3159_v49 = vcombine.high %v3149_v37, %v3153_v4  ;;  %v7874_v13 = vmul.f32 %v7815_v10, %v9072_v23  ;;  %v7878_v40 = vmul.f32 %v7803_v34, %v9073_v2  ;;  %v9079_v37 = vld [vmem:[#allocation14_spill] sm:$0xff] }
 0x19f   :  { %v3160_v33 = vcombine.high %v3157_v28, %v3157_v28  ;;  %v3181_v20 = vrot.slane %v3157_v28, %v7078_v1  ;;  %v7883_v17 = vmul.f32 %v7806_v32, %v9074_v47  ;;  %v7887_v50 = vmul.f32 %v7821_v24, %v9075_v42  ;;  %v9080_v28 = vld [vmem:[#allocation16_spill] sm:$0xff]  ;;  %v9082_v23 = vld [vmem:[#allocation10_spill] sm:$0xff]  ;;  %v9083_v42 = vld [vmem:[#allocation49_spill] sm:$0xff] }
 0x1a0   :  { %v3167_v60 = vrot.slane %v3158_v39, %v7078_v1  ;;  %v3174_v45 = vrot.slane %v3159_v49, %v7078_v1  ;;  %v7893_v3 = vmul.f32 %v7825_v7, %v9076_v5  ;;  %v7897_v63 = vmul.f32 %v7794_v29, %v9077_v48  ;;  %v9081_v39 = vld [vmem:[#allocation20_spill] sm:$0xff]  ;;  %v9084_v48 = vld [vmem:[#allocation50_spill] sm:$0xff] }
 0x1a1   :  { %v3188_v38 = vrot.slane %v3160_v33, %v7078_v1  ;;  %v7902_v61 = vmul.f32 %v7797_v30, %v9078_v56  ;;  %v7906_v4 = vmul.f32 %v7811_v12, %v9079_v37  ;;  %v7910_v0 = vmul.f32 %v7815_v10, %v9080_v28  ;;  %v9085_v37 = vld [vmem:[#allocation9_spill] sm:$0xff] }
 0x1a2   :  { %v3189_v59 = vcombine.low %v3167_v60, %v3181_v20  ;;  %v3190_v43 = vcombine.high %v3167_v60, %v3181_v20  ;;  %v7914_v49 = vmul.f32 %v7803_v34, %v9081_v39  ;;  %v7918_v2 = vmul.f32 %v7806_v32, %v9082_v23  ;;  %v9087_v39 = vld [vmem:[#allocation11_spill] sm:$0xff] }
 0x1a3   :  { %v3191_v33 = vcombine.low %v3174_v45, %v3188_v38  ;;  %v3192_v47 = vcombine.high %v3174_v45, %v3188_v38  ;;  %v7922_v5 = vmul.f32 %v7821_v24, %v9083_v42  ;;  %v7926_v56 = vmul.f32 %v7825_v7, %v9084_v48  ;;  %v9089_v42 = vld [vmem:[#allocation21_spill] sm:$0xff] }
 0x1a4   :  { %v7929_v20 = vrot.slane %v3189_v59, %v7078_v1  ;;  %v7932_v60 = vrot.slane %v3190_v43, %v7078_v1  ;;  %v7936_v28 = vmul.f32 %v7794_v29, %v9085_v37  ;;  %v7940_v45 = vmul.f32 %v7797_v30, %v9087_v39  ;;  %v9091_v43 = vld [vmem:[#allocation17_spill] sm:$0xff] }
 0x1a5   :  { %v7943_v38 = vrot.slane %v3191_v33, %v7078_v1  ;;  %v7946_v23 = vrot.slane %v3192_v47, %v7078_v1  ;;  %v7950_v59 = vmul.f32 %v7811_v12, %v9089_v42  ;;  %v7954_v48 = vmul.f32 %v7815_v10, %v9091_v43 }
 0x1a6   :  { %9086 = vst [vmem:[#allocation26_spill] sm:$0xff] %v7936_v28  ;;  %9088 = vst [vmem:[#allocation27_spill] sm:$0xff] %v7940_v45  ;;  %v7958_v37 = vcombine.high %v7929_v20, %v7929_v20  ;;  %v7962_v39 = vcombine.high %v7932_v60, %v7932_v60  ;;  %v3233_v33 = vadd.f32 %v7929_v20, %v3096_v31 }
 0x1a7   :  { %9090 = vst [vmem:[#allocation52_spill] sm:$0xff] %v7950_v59  ;;  %9092 = vst [vmem:[#allocation53_spill] sm:$0xff] %v7954_v48  ;;  %v3234_v47 = vadd.f32 %v7932_v60, %v3097_v27  ;;  %v7968_v42 = vcombine.high %v7943_v38, %v7943_v38  ;;  %v7972_v43 = vcombine.high %v7946_v23, %v7946_v23 }
 0x1a8   :  { %v3237_v21 = vadd.f32 %v7943_v38, %v3100_v19  ;;  %v3238_v58 = vadd.f32 %v7946_v23, %v3101_v8  ;;  %v3235_v55 = vadd.f32 %v7958_v37, %v3098_v15  ;;  %v3236_v44 = vadd.f32 %v7962_v39, %v3099_v46 }
 0x1a9   :  { %v3241_v31 = vadd.f32 %v7929_v20, %v3104_v36  ;;  %v3242_v27 = vadd.f32 %v7932_v60, %v3105_v35  ;;  %v3239_v48 = vadd.f32 %v7968_v42, %v3102_v9  ;;  %v3240_v59 = vadd.f32 %v7972_v43, %v3103_v53 }
 0x1aa   :  { %v3243_v45 = vadd.f32 %v7958_v37, %v3106_v14  ;;  %v3244_v28 = vadd.f32 %v7962_v39, %v3107_v22  ;;  %v3245_v19 = vadd.f32 %v7943_v38, %v3108_v62  ;;  %v3246_v8 = vadd.f32 %v7946_v23, %v3109_v16 }
 0x1ab   :  { %v3247_v15 = vadd.f32 %v7968_v42, %v3110_v52  ;;  %v3248_v46 = vadd.f32 %v7972_v43, %v3111_v41  ;;  %v3331_v51 = vcombine.low %v3233_v33, %v3234_v47  ;;  %v3332_v36 = vcombine.low %v3235_v55, %v3236_v44 }
 0x1ac   :  { %v3333_v6 = vcombine.low %v3237_v21, %v3238_v58  ;;  %v3334_v35 = vcombine.low %v3239_v48, %v3240_v59  ;;  %v3398_v18 = vcombine.low %v3241_v31, %v3242_v27  ;;  %v3399_v9 = vcombine.low %v3243_v45, %v3244_v28 }
 0x1ad   :  { %v3400_v25 = vcombine.low %v3245_v19, %v3246_v8  ;;  %v3401_v53 = vcombine.low %v3247_v15, %v3248_v46  ;;  %v3341_v14 = vrot.slane %v3331_v51, %v7078_v1  ;;  %v3348_v22 = vrot.slane %v3332_v36, %v7078_v1 }
 0x1ae   :  { %v3355_v62 = vrot.slane %v3333_v6, %v7078_v1  ;;  %v3362_v16 = vrot.slane %v3334_v35, %v7078_v1  ;;  %v3408_v52 = vrot.slane %v3398_v18, %v7078_v1  ;;  %v3415_v41 = vrot.slane %v3399_v9, %v7078_v1 }
 0x1af   :  { %v3422_v44 = vrot.slane %v3400_v25, %v7078_v1  ;;  %v3429_v55 = vrot.slane %v3401_v53, %v7078_v1  ;;  %v3364_v58 = vcombine.high %v3341_v14, %v3348_v22  ;;  %v3363_v28 = vcombine.low %v3341_v14, %v3348_v22 }
 0x1b0   :  { %v3366_v21 = vcombine.high %v3355_v62, %v3362_v16  ;;  %v3365_v45 = vcombine.low %v3355_v62, %v3362_v16  ;;  %v3431_v59 = vcombine.high %v3408_v52, %v3415_v41  ;;  %v3430_v48 = vcombine.low %v3408_v52, %v3415_v41  ;;  %v5059_v62 = vld [vmem:[%s8473_s4 + $0xb0] ss:$12 sps:$4 sm:$0xff]  }
 0x1b1   :  { %v3433_v51 = vcombine.high %v3422_v44, %v3429_v55  ;;  %v3432_v33 = vcombine.low %v3422_v44, %v3429_v55  ;;  %v3380_v6 = vrot.slane %v3364_v58, %v7078_v1  ;;  %v3373_v18 = vrot.slane %v3363_v28, %v7078_v1  ;;  %v5061_v58 = vld [vmem:[%s8473_s4 + $0x158] ss:$12 sps:$4 sm:$0xff]  }
 0x1b2   :  { %v3394_v47 = vrot.slane %v3366_v21, %v7078_v1  ;;  %v3387_v31 = vrot.slane %v3365_v45, %v7078_v1  ;;  %v3447_v25 = vrot.slane %v3431_v59, %v7078_v1  ;;  %v3440_v19 = vrot.slane %v3430_v48, %v7078_v1 }
 0x1b3   :  { %v3461_v27 = vrot.slane %v3433_v51, %v7078_v1  ;;  %v3454_v8 = vrot.slane %v3432_v33, %v7078_v1  ;;  %v3249_v35 = vadd.f32 %v7929_v20, %v7862_v11  ;;  %v3250_v22 = vadd.f32 %v7932_v60, %v7866_v54 }
 0x1b4   :  { %v3397_v15 = vcombine.low %v3380_v6, %v3394_v47  ;;  %v3396_v46 = vcombine.high %v3373_v18, %v3387_v31  ;;  %v3395_v36 = vcombine.low %v3373_v18, %v3387_v31  ;;  %v3251_v16 = vadd.f32 %v7958_v37, %v7870_v26 }
 0x1b5   :  { %v3464_v9 = vcombine.low %v3447_v25, %v3461_v27  ;;  %v3463_v53 = vcombine.high %v3440_v19, %v3454_v8  ;;  %v3462_v14 = vcombine.low %v3440_v19, %v3454_v8  ;;  %v3252_v52 = vadd.f32 %v7962_v39, %v7874_v13  ;;  %v8033_v13 = vld [vmem:[%s8473_s4 + $0x218] ss:$12 sps:$4 sm:$0xff]   ;;  %v5065_v8 = vld [vmem:[%s8473_s4 + $0x80] ss:$12 sps:$4 sm:$0xff]  }
 0x1b6   :  { %v3253_v41 = vadd.f32 %v7943_v38, %v7878_v40  ;;  %v3254_v11 = vadd.f32 %v7946_v23, %v7883_v17  ;;  %v3255_v26 = vadd.f32 %v7968_v42, %v7887_v50  ;;  %v3256_v40 = vadd.f32 %v7972_v43, %v7893_v3 }
 0x1b7   :  { %v8019_v44 = vpack.c.bf16 %v3464_v9, %v3397_v15  ;;  %v8021_v55 = vpack.c.bf16 %v3463_v53, %v3396_v46  ;;  %v8023_v54 = vpack.c.bf16 %v3462_v14, %v3395_v36  ;;  %v3257_v17 = vadd.f32 %v7929_v20, %v7897_v63  ;;  %v5062_v63 = vld [vmem:[%s8473_s4 + $0x98] ss:$12 sps:$4 sm:$0xff]   ;;  %v9094_v15 = vld [vmem:[#allocation24_spill] sm:$0xff] }
 0x1b8   :  { %v3258_v21 = vadd.f32 %v7932_v60, %v7902_v61  ;;  %v3259_v28 = vadd.f32 %v7958_v37, %v7906_v4  ;;  %v3260_v50 = vadd.f32 %v7962_v39, %v7910_v0  ;;  %v3261_v45 = vadd.f32 %v7943_v38, %v7914_v49  ;;  %v5064_v49 = vld [vmem:[%s8473_s4 + $0x140] ss:$12 sps:$4 sm:$0xff]   ;;  %v5067_v53 = vld [vmem:[%s8473_s4 + $0x128] ss:$12 sps:$4 sm:$0xff]  }
 0x1b9   :  { %4301 = vmatprep.mubr.bf16.mxu0 %v8019_v44  ;;  %4373 = vmatmul.mubr.bf16.vlgmr.msra.gmra.mxu1 %v8021_v55  ;;  %v3262_v3 = vadd.f32 %v7946_v23, %v7918_v2  ;;  %v3263_v61 = vadd.f32 %v7968_v42, %v7922_v5  ;;  %v3264_v4 = vadd.f32 %v7972_v43, %v7926_v56  ;;  %v9093_v48 = vmov 0   ;;  %v8069_v56 = vld [vmem:[%s8473_s4 + $0x200] ss:$12 sps:$4 sm:$0xff]  }
 0x1ba   :  { %4893 = vmatpush3.bf16.msra.mxu1 %v5059_v62  ;;  %4302 = vmatmul.mubr.bf16.vlgmr.msra.gmra.mxu0 %v8023_v54  ;;  %v3465_v0 = vcombine.low %v3249_v35, %v3250_v22  ;;  %v3466_v2 = vcombine.low %v3251_v16, %v3252_v52  ;;  %v3467_v59 = vcombine.low %v3253_v41, %v3254_v11  ;;  %v8091_v52 = vld [vmem:[%s8473_s4 + $0x1e8] ss:$12 sps:$4 sm:$0xff]  }
 0x1bb   :  { %4894 = vmatprep.subr.bf16.mxu1 %v5061_v58  ;;  %4945 = vmatpush3.bf16.msra.mxu0 %v7596_v57  ;;  %v3468_v51 = vcombine.low %v3255_v26, %v3256_v40  ;;  %v3532_v33 = vcombine.low %v3257_v17, %v3258_v21  ;;  %v3533_v6 = vcombine.low %v3259_v28, %v3260_v50  ;;  %v9095_v26 = vld [vmem:[#allocation23_spill] sm:$0xff] }
 0x1bc   :  { %4946 = vmatprep.subr.bf16.mxu0 %v8033_v13  ;;  %4382 = vmatprep.mubr.bf16.mxu1 %v9093_v48  ;;  %v3475_v5 = vrot.slane %v3465_v0, %v7078_v1  ;;  %v3482_v57 = vrot.slane %v3466_v2, %v7078_v1  ;;  %v3489_v47 = vrot.slane %v3467_v59, %v7078_v1  ;;  %v9096_v59 = vld [vmem:[#allocation55_spill] sm:$0xff] }
 0x1bd   :  { %v3496_v18 = vrot.slane %v3468_v51, %v7078_v1  ;;  %v3534_v31 = vcombine.low %v3261_v45, %v3262_v3  ;;  %v3535_v25 = vcombine.low %v3263_v61, %v3264_v4  ;;  %v3542_v27 = vrot.slane %v3532_v33, %v7078_v1  ;;  %v5068_v45 = vld [vmem:[%s8473_s4 + $0x68] ss:$12 sps:$4 sm:$0xff]   ;;  %v5070_v4 = vld [vmem:[%s8473_s4 + $0x110] ss:$12 sps:$4 sm:$0xff]  }
 0x1be   :  { %4895 = vmatpush3.bf16.msra.mxu1 %v5062_v63  ;;  %v3549_v19 = vrot.slane %v3533_v6, %v7078_v1  ;;  %v3132_v46 = vmul.f32 %v7803_v34, %v9094_v15  ;;  %v3498_v36 = vcombine.high %v3475_v5, %v3482_v57  ;;  %v3497_v62 = vcombine.low %v3475_v5, %v3482_v57  ;;  %v8115_v5 = vld [vmem:[%s8473_s4 + $0x1d0] ss:$12 sps:$4 sm:$0xff]  }
 0x1bf   :  { %4896 = vmatprep.subr.bf16.mxu1 %v5064_v49  ;;  %4947 = vmatpush3.bf16.msra.mxu0 %v8033_v13  ;;  %v3500_v35 = vcombine.high %v3489_v47, %v3496_v18  ;;  %v3556_v9 = vrot.slane %v3534_v31, %v7078_v1  ;;  %v3563_v14 = vrot.slane %v3535_v25, %v7078_v1  ;;  %v9097_v6 = vld [vmem:[#allocation48_spill] sm:$0xff] }
 0x1c0   :  { %v3565_v22 = vcombine.high %v3542_v27, %v3549_v19  ;;  %v3499_v16 = vcombine.low %v3489_v47, %v3496_v18  ;;  %4948 = vmatprep.subr.bf16.mxu0 %v8069_v56  ;;  %v3514_v41 = vrot.slane %v3498_v36, %v7078_v1  ;;  %v3564_v58 = vcombine.low %v3542_v27, %v3549_v19  ;;  %v9098_v47 = vld [vmem:[#allocation22_spill] sm:$0xff]  ;;  %v9099_v31 = vld [vmem:[#allocation56_spill] sm:$0xff]  ;;  %v9100_v19 = vld [vmem:[#allocation57_spill] sm:$0xff] }
 0x1c1   :  { %v3528_v11 = vrot.slane %v3500_v35, %v7078_v1  ;;  %v3133_v40 = vmul.f32 %v7806_v32, %v9095_v26  ;;  %v3567_v17 = vcombine.high %v3556_v9, %v3563_v14  ;;  %v3507_v28 = vrot.slane %v3497_v62, %v7078_v1  ;;  %v9101_v15 = vld [vmem:[#allocation36_spill] sm:$0xff]  ;;  %v9102_v35 = vld [vmem:[#allocation51_spill] sm:$0xff] }
 0x1c2   :  { %v3581_v21 = vrot.slane %v3565_v22, %v7078_v1  ;;  %v3521_v50 = vrot.slane %v3499_v16, %v7078_v1  ;;  %4897 = vmatpush3.bf16.msra.mxu1 %v5065_v8  ;;  %v3566_v63 = vcombine.low %v3556_v9, %v3563_v14  ;;  %v3574_v61 = vrot.slane %v3564_v58, %v7078_v1  ;;  %v9103_v22 = vld [vmem:[#allocation25_spill] sm:$0xff]  ;;  %v9104_v16 = vld [vmem:[#allocation35_spill] sm:$0xff] }
 0x1c3   :  { %v3531_v3 = vcombine.low %v3514_v41, %v3528_v11  ;;  %4898 = vmatprep.subr.bf16.mxu1 %v5067_v53  ;;  %4949 = vmatpush3.bf16.msra.mxu0 %v8069_v56  ;;  %v3595_v0 = vrot.slane %v3567_v17, %v7078_v1  ;;  %v3134_v51 = vmul.f32 %v7821_v24, %v9096_v59  ;;  %v9107_v17 = vld [vmem:[#allocation27_spill] sm:$0xff] }
 0x1c4   :  { %v3530_v49 = vcombine.high %v3507_v28, %v3521_v50  ;;  %v3529_v2 = vcombine.low %v3507_v28, %v3521_v50  ;;  %4950 = vmatprep.subr.bf16.mxu0 %v8091_v52  ;;  %v3588_v33 = vrot.slane %v3566_v63, %v7078_v1  ;;  %v3135_v57 = vmul.f32 %v7825_v7, %v9097_v6 }
 0x1c5   :  { %v3136_v18 = vmul.f32 %v7794_v29, %v9098_v47  ;;  %v3137_v25 = vmul.f32 %v7797_v30, %v9099_v31  ;;  %v3598_v27 = vcombine.low %v3581_v21, %v3595_v0  ;;  %v3138_v8 = vmul.f32 %v7811_v12, %v9100_v19  ;;  %v9105_v12 = vld [vmem:[#allocation37_spill] sm:$0xff]  ;;  %v9108_v21 = vld [vmem:[#allocation52_spill] sm:$0xff] }
 0x1c6   :  { %4899 = vmatpush3.bf16.msra.mxu1 %v5068_v45  ;;  %v3139_v36 = vmul.f32 %v7815_v10, %v9101_v15  ;;  %v3140_v9 = vmul.f32 %v7803_v34, %v9102_v35  ;;  %v3597_v53 = vcombine.high %v3574_v61, %v3588_v33  ;;  %v3596_v14 = vcombine.low %v3574_v61, %v3588_v33  ;;  %v9106_v10 = vld [vmem:[#allocation26_spill] sm:$0xff] }
 0x1c7   :  { %4900 = vmatprep.subr.bf16.mxu1 %v5070_v4  ;;  %4951 = vmatpush3.bf16.msra.mxu0 %v8091_v52  ;;  %v3141_v62 = vmul.f32 %v7806_v32, %v9103_v22  ;;  %v8133_v30 = vpack.c.bf16 %v3598_v27, %v3531_v3  ;;  %v3142_v41 = vmul.f32 %v7821_v24, %v9104_v16  ;;  %v5071_v24 = vld [vmem:[%s8473_s4 + $0x50] ss:$12 sps:$4 sm:$0xff]   ;;  %v5073_v61 = vld [vmem:[%s8473_s4 + $0xf8] ss:$12 sps:$4 sm:$0xff]   ;;  %v5077_v22 = vld [vmem:[%s8473_s4 + $0x20] ss:$12 sps:$4 sm:$0xff]  }
 0x1c8   :  { %v3143_v11 = vmul.f32 %v7825_v7, %v9105_v12  ;;  %v3265_v58 = vadd.f32 %v7929_v20, %v9106_v10  ;;  %4952 = vmatprep.subr.bf16.mxu0 %v8115_v5  ;;  %v8142_v34 = vpack.c.bf16 %v3597_v53, %v3530_v49  ;;  %v8144_v26 = vpack.c.bf16 %v3596_v14, %v3529_v2  ;;  %v9109_v7 = vld [vmem:[#allocation53_spill] sm:$0xff] }
 0x1c9   :  { %v3266_v32 = vadd.f32 %v7932_v60, %v9107_v17  ;;  %v3267_v28 = vadd.f32 %v7958_v37, %v9108_v21  ;;  %4311 = vmatprep.mubr.bf16.mxu0 %v8133_v30  ;;  %v3268_v50 = vadd.f32 %v7962_v39, %v9109_v7  ;;  %v3269_v45 = vadd.f32 %v7943_v38, %v3132_v46 }
 0x1ca   :  { %v3270_v3 = vadd.f32 %v7946_v23, %v3133_v40  ;;  %v3271_v63 = vadd.f32 %v7968_v42, %v3134_v51  ;;  %4383 = vmatmul.mubr.bf16.gmra.mxu1 %v8142_v34  ;;  %4312 = vmatmul.mubr.bf16.gmra.mxu0 %v8144_v26  ;;  %v3272_v4 = vadd.f32 %v7972_v43, %v3135_v57  ;;  %v8175_v51 = vld [vmem:[%s8473_s4 + $0x1b8] ss:$12 sps:$4 sm:$0xff]  }
 0x1cb   :  { %v3273_v0 = vadd.f32 %v7929_v20, %v3136_v18  ;;  %v3274_v49 = vadd.f32 %v7932_v60, %v3137_v25  ;;  %4392 = vmatprep.mubr.bf16.mxu1 %v9093_v48  ;;  %v3275_v46 = vadd.f32 %v7958_v37, %v3138_v8  ;;  %v3276_v40 = vadd.f32 %v7962_v39, %v3139_v36  ;;  %v5074_v37 = vld [vmem:[%s8473_s4 + $0x38] ss:$12 sps:$4 sm:$0xff]   ;;  %v5076_v18 = vld [vmem:[%s8473_s4 + $0xe0] ss:$12 sps:$4 sm:$0xff]  }
 0x1cc   :  { %v3277_v2 = vadd.f32 %v7943_v38, %v3140_v9  ;;  %v3278_v59 = vadd.f32 %v7946_v23, %v3141_v62  ;;  %v3279_v33 = vadd.f32 %v7968_v42, %v3142_v41  ;;  %v3280_v6 = vadd.f32 %v7972_v43, %v3143_v11  ;;  %4901 = vmatpush3.bf16.msra.mxu1 %v5071_v24  ;;  %v8196_v36 = vld [vmem:[%s8473_s4 + $0x1a0] ss:$12 sps:$4 sm:$0xff]   ;;  %v5079_v11 = vld [vmem:[%s8473_s4 + $0xc8] ss:$12 sps:$4 sm:$0xff]  }
 0x1cd   :  { %v3599_v60 = vcombine.low %v3265_v58, %v3266_v32  ;;  %v3600_v57 = vcombine.low %v3267_v28, %v3268_v50  ;;  %v3601_v39 = vcombine.low %v3269_v45, %v3270_v3  ;;  %v3602_v38 = vcombine.low %v3271_v63, %v3272_v4  ;;  %4902 = vmatprep.subr.bf16.mxu1 %v5073_v61  ;;  %v5081_v50 = vld [vmem:[%s8473_s4 + $0x188] ss:$12 sps:$4 sm:$0xff]   ;;  %v9110_v63 = vld [vmem:[#allocation34_spill] sm:$0xff] }
 0x1ce   :  { %v3666_v47 = vcombine.low %v3273_v0, %v3274_v49  ;;  %v3667_v23 = vcombine.low %v3275_v46, %v3276_v40  ;;  %v3668_v31 = vcombine.low %v3277_v2, %v3278_v59  ;;  %v3669_v25 = vcombine.low %v3279_v33, %v3280_v6  ;;  %4953 = vmatpush3.bf16.msra.mxu0 %v8115_v5  ;;  %v5080_v4 = vld [vmem:[%s8473_s4 + $0x8] ss:$12 sps:$4 sm:$0xff]  }
 0x1cf   :  { %v3609_v42 = vrot.slane %v3599_v60, %v7078_v1  ;;  %v3616_v43 = vrot.slane %v3600_v57, %v7078_v1  ;;  %v3623_v27 = vrot.slane %v3601_v39, %v7078_v1  ;;  %v3630_v19 = vrot.slane %v3602_v38, %v7078_v1  ;;  %4954 = vmatprep.subr.bf16.mxu0 %v8175_v51 }
 0x1d0   :  { %v3676_v8 = vrot.slane %v3666_v47, %v7078_v1  ;;  %v3683_v15 = vrot.slane %v3667_v23, %v7078_v1  ;;  %v3690_v9 = vrot.slane %v3668_v31, %v7078_v1  ;;  %v3697_v53 = vrot.slane %v3669_v25, %v7078_v1  ;;  %4903 = vmatpush3.bf16.msra.mxu1 %v5074_v37  ;;  %v5121_v37 = vld [vmem:[%s8473_s4 + $0x230] ss:$12 sps:$4 sm:$0xff]  }
 0x1d1   :  { %v3632_v35 = vcombine.high %v3609_v42, %v3616_v43  ;;  %v3631_v14 = vcombine.low %v3609_v42, %v3616_v43  ;;  %v3634_v62 = vcombine.high %v3623_v27, %v3630_v19  ;;  %v3633_v41 = vcombine.low %v3623_v27, %v3630_v19  ;;  %4904 = vmatprep.subr.bf16.mxu1 %v5076_v18 }
 0x1d2   :  { %v3699_v16 = vcombine.high %v3676_v8, %v3683_v15  ;;  %v3698_v12 = vcombine.low %v3676_v8, %v3683_v15  ;;  %v3701_v58 = vcombine.high %v3690_v9, %v3697_v53  ;;  %v3700_v32 = vcombine.low %v3690_v9, %v3697_v53  ;;  %4955 = vmatpush3.bf16.msra.mxu0 %v8175_v51 }
 0x1d3   :  { %v3648_v10 = vrot.slane %v3632_v35, %v7078_v1  ;;  %v3641_v17 = vrot.slane %v3631_v14, %v7078_v1  ;;  %v3662_v21 = vrot.slane %v3634_v62, %v7078_v1  ;;  %v3655_v24 = vrot.slane %v3633_v41, %v7078_v1  ;;  %4956 = vmatprep.subr.bf16.mxu0 %v8196_v36 }
 0x1d4   :  { %v3715_v28 = vrot.slane %v3699_v16, %v7078_v1  ;;  %v3708_v7 = vrot.slane %v3698_v12, %v7078_v1  ;;  %v3729_v45 = vrot.slane %v3701_v58, %v7078_v1  ;;  %v3722_v3 = vrot.slane %v3700_v32, %v7078_v1  ;;  %4905 = vmatpush3.bf16.msra.mxu1 %v5077_v22 }
 0x1d5   :  { %v3144_v61 = vmul.f32 %v7794_v29, %v9110_v63  ;;  %v3665_v0 = vcombine.low %v3648_v10, %v3662_v21  ;;  %v3664_v49 = vcombine.high %v3641_v17, %v3655_v24  ;;  %v3663_v46 = vcombine.low %v3641_v17, %v3655_v24  ;;  %4906 = vmatprep.subr.bf16.mxu1 %v5079_v11 }
 0x1d6   :  { %v3732_v40 = vcombine.low %v3715_v28, %v3729_v45  ;;  %v3731_v2 = vcombine.high %v3708_v7, %v3722_v3  ;;  %v3730_v59 = vcombine.low %v3708_v7, %v3722_v3  ;;  %4957 = vmatpush3.bf16.msra.mxu0 %v8196_v36 }
 0x1d7   :  { %v3281_v33 = vadd.f32 %v7929_v20, %v3144_v61  ;;  %4958 = vmatprep.subr.bf16.mxu0 %v5081_v50 }
 0x1d8   :  { %v3784_v6 = vpack.c.bf16 %v3732_v40, %v3665_v0  ;;  %v3785_v60 = vpack.c.bf16 %v3731_v2, %v3664_v49  ;;  %v3783_v29 = vpack.c.bf16 %v3730_v59, %v3663_v46  ;;  %4907 = vmatpush3.bf16.msra.mxu1 %v5080_v4 }
 0x1d9   :  { %v3739_v57 = vrot.slane %v3281_v33, %v7078_v1  ;;  %4968 = vmatprep.subr.bf16.mxu1 %v5121_v37 }
 0x1da   :  { %4321 = vmatprep.mubr.bf16.mxu0 %v3784_v6  ;;  %4393 = vmatmul.mubr.bf16.gmra.mxu1 %v3785_v60 }
 0x1db   :  { %v3740_v39 = vcombine.high %v3739_v57, %v3739_v57  ;;  %v3747_v38 = vrot.slane %v3739_v57, %v7078_v1  ;;  %4322 = vmatmul.mubr.bf16.gmra.mxu0 %v3783_v29  ;;  %4402 = vmatprep.mubr.bf16.mxu1 %v9093_v48 }
 0x1dc   :  { %4959 = vmatpush3.bf16.msra.mxu0 %v5081_v50 }
 0x1dd   :  { %v3754_v20 = vrot.slane %v3740_v39, %v7078_v1  ;;  %v3755_v47 = vcombine.high %v3747_v38, %v3747_v38  ;;  %v3786_v42 = vpack.c.bf16 %v3747_v38, %v3747_v38 }
 0x1df   :  { %v3787_v23 = vpack.c.bf16 %v3754_v20, %v3754_v20  ;;  %v3788_v18 = vpack.c.bf16 %v3755_v47, %v3755_v47 }
 0x1e1   :  { %4331 = vmatprep.mubr.bf16.mxu0 %v3787_v23 }
 0x1e2   :  { %4403 = vmatmul.mubr.bf16.gmra.mxu1 %v3788_v18 }
 0x1e3   :  { %4332 = vmatmul.mubr.bf16.gmra.mxu0 %v3786_v42  ;;  %4443 = vmatprep.mubr.bf16.mxu1 %v8019_v44 }
 0x1e4   :  { %4960 = vmatprep.mubr.bf16.mxu0 %v8021_v55 }
 0x1ea   :  { %4444 = vmatmul.mubr.bf16.vlgmr.msra.gmra.mxu1 %v8023_v54 }
 0x1eb   :  { %4976 = vmatpush3.bf16.msra.mxu1 %v5121_v37  ;;  %4961 = vmatmul.mubr.bf16.vlgmr.msra.gmra.mxu0 %v8142_v34 }
 0x1ec   :  { %4969 = vmatprep.subr.bf16.mxu1 %v8033_v13  ;;  %4451 = vmatprep.mubr.bf16.mxu1 %v8133_v30 }
 0x1ef   :  { %4977 = vmatpush3.bf16.msra.mxu1 %v8033_v13 }
 0x1f0   :  { %4970 = vmatprep.subr.bf16.mxu1 %v8069_v56 }
 0x1f2   :  { %4452 = vmatmul.mubr.bf16.gmra.mxu1 %v8144_v26 }
 0x1f3   :  { %4978 = vmatpush3.bf16.msra.mxu1 %v8069_v56  ;;  %4459 = vmatprep.mubr.bf16.mxu1 %v3784_v6 }
 0x1f4   :  { %4971 = vmatprep.subr.bf16.mxu1 %v8091_v52 }
 0x1f7   :  { %4979 = vmatpush3.bf16.msra.mxu1 %v8091_v52 }
 0x1f8   :  { %4972 = vmatprep.subr.bf16.mxu1 %v8115_v5 }
 0x1fa   :  { %4460 = vmatmul.mubr.bf16.gmra.mxu1 %v3783_v29 }
 0x1fb   :  { %4980 = vmatpush3.bf16.msra.mxu1 %v8115_v5  ;;  %4467 = vmatprep.mubr.bf16.mxu1 %v3787_v23 }
 0x1fc   :  { %4973 = vmatprep.subr.bf16.mxu1 %v8175_v51 }
 0x1ff   :  { %4981 = vmatpush3.bf16.msra.mxu1 %v8175_v51 }
 0x200   :  { %4974 = vmatprep.subr.bf16.mxu1 %v8196_v36 }
 0x202   :  { %4468 = vmatmul.mubr.bf16.gmra.mxu1 %v3786_v42 }
 0x203   :  { %4982 = vmatpush3.bf16.msra.mxu1 %v8196_v36  ;;  %4964 = vmatprep.mubr.bf16.mxu1 %v3785_v60 }
 0x204   :  { %4975 = vmatprep.subr.bf16.mxu1 %v5081_v50 }
 0x207   :  { %4983 = vmatpush3.bf16.msra.mxu1 %v5081_v50 }
 0x20a   :  { %4965 = vmatmul.mubr.bf16.vlgmr.msra.gmra.mxu1 %v3788_v18 }
 0x279   :  { %v4374_v44 = vpop.f32.mrf.mxu1 }
 0x27a   :  { %v4303_v55 = vpop.f32.mrf.mxu0 }
 0x27b   :  { %v4376_v54 = vpop.f32.mrf.mxu1  ;;  %v8261_v7 = vadd.f32 %v4374_v44, %v4303_v55 }
 0x27c   :  { %v4305_v13 = vpop.f32.mrf.mxu0 }
 0x27d   :  { %v4378_v48 = vpop.f32.mrf.mxu1  ;;  %v8255_v21 = vadd.f32 %v4376_v54, %v4305_v13  ;;  %v4581_v2 = vmul.f32 %v8261_v7, %v8261_v7 }
 0x27e   :  { %v4307_v56 = vpop.f32.mrf.mxu0 }
 0x27f   :  { %v4380_v52 = vpop.f32.mrf.mxu1  ;;  %v8257_v28 = vadd.f32 %v4378_v48, %v4307_v56  ;;  %v4582_v0 = vmul.f32 %v8255_v21, %v8255_v21 }
 0x280   :  { %v4309_v5 = vpop.f32.mrf.mxu0 }
 0x281   :  { %v8251_v58 = vadd.f32 %v4380_v52, %v4309_v5  ;;  %v4584_v49 = vmul.f32 %v8257_v28, %v8257_v28  ;;  %v4539_v59 = vadd.f32 %v8257_v28, %v8261_v7 }
 0x283   :  { %v4585_v45 = vmul.f32 %v8251_v58, %v8251_v58  ;;  %v4552_v61 = vadd.f32 %v8251_v58, %v8255_v21  ;;  %v4602_v42 = vadd.f32 %v4584_v49, %v4581_v2 }
 0x285   :  { %v4615_v29 = vadd.f32 %v4585_v45, %v4582_v0 }
 0x28a   :  { %v4384_v30 = vpop.f32.mrf.mxu1  ;;  %v4313_v34 = vpop.f32.mrf.mxu0 }
 0x28b   :  { %v8267_v3 = vadd.f32 %v4384_v30, %v4313_v34 }
 0x28c   :  { %v4386_v26 = vpop.f32.mrf.mxu1  ;;  %v4315_v51 = vpop.f32.mrf.mxu0 }
 0x28d   :  { %v8259_v24 = vadd.f32 %v4386_v26, %v4315_v51  ;;  %v4587_v57 = vmul.f32 %v8267_v3, %v8267_v3  ;;  %v4540_v38 = vadd.f32 %v4539_v59, %v8267_v3 }
 0x28e   :  { %v4388_v43 = vpop.f32.mrf.mxu1  ;;  %v4317_v31 = vpop.f32.mrf.mxu0 }
 0x28f   :  { %v4588_v46 = vmul.f32 %v8259_v24, %v8259_v24  ;;  %v8281_v40 = vadd.f32 %v4388_v43, %v4317_v31  ;;  %v4553_v33 = vadd.f32 %v4552_v61, %v8259_v24  ;;  %v4603_v30 = vadd.f32 %v4602_v42, %v4587_v57 }
 0x290   :  { %v4390_v25 = vpop.f32.mrf.mxu1  ;;  %v4319_v27 = vpop.f32.mrf.mxu0 }
 0x291   :  { %v8269_v63 = vadd.f32 %v4390_v25, %v4319_v27  ;;  %v4616_v44 = vadd.f32 %v4615_v29, %v4588_v46  ;;  %v4590_v55 = vmul.f32 %v8281_v40, %v8281_v40  ;;  %v4541_v13 = vadd.f32 %v4540_v38, %v8281_v40 }
 0x293   :  { %v4591_v37 = vmul.f32 %v8269_v63, %v8269_v63  ;;  %v4554_v20 = vadd.f32 %v4553_v33, %v8269_v63 }
 0x295   :  { %v4617_v34 = vadd.f32 %v4616_v44, %v4591_v37 }
 0x29a   :  { %v4394_v19 = vpop.f32.mrf.mxu1 }
 0x29b   :  { %v4323_v8 = vpop.f32.mrf.mxu0 }
 0x29c   :  { %v4396_v15 = vpop.f32.mrf.mxu1  ;;  %v8298_v47 = vadd.f32 %v4394_v19, %v4323_v8 }
 0x29d   :  { %v4325_v36 = vpop.f32.mrf.mxu0 }
 0x29e   :  { %v4398_v35 = vpop.f32.mrf.mxu1  ;;  %v8288_v6 = vadd.f32 %v4396_v15, %v4325_v36  ;;  %v4542_v43 = vadd.f32 %v4541_v13, %v8298_v47  ;;  %v4593_v31 = vmul.f32 %v8298_v47, %v8298_v47  ;;  %v4604_v15 = vadd.f32 %v4603_v30, %v4590_v55 }
 0x29f   :  { %v4327_v9 = vpop.f32.mrf.mxu0 }
 0x2a0   :  { %v4400_v53 = vpop.f32.mrf.mxu1  ;;  %v4555_v48 = vadd.f32 %v4554_v20, %v8288_v6  ;;  %v4594_v56 = vmul.f32 %v8288_v6, %v8288_v6  ;;  %v8310_v52 = vadd.f32 %v4398_v35, %v4327_v9 }
 0x2a1   :  { %v4329_v14 = vpop.f32.mrf.mxu0 }
 0x2a2   :  { %v4404_v22 = vpop.f32.mrf.mxu1  ;;  %v8300_v23 = vadd.f32 %v4400_v53, %v4329_v14  ;;  %v4618_v9 = vadd.f32 %v4617_v34, %v4594_v56  ;;  %v4543_v53 = vadd.f32 %v4542_v43, %v8310_v52  ;;  %v4596_v14 = vmul.f32 %v8310_v52, %v8310_v52 }
 0x2a3   :  { %v4333_v62 = vpop.f32.mrf.mxu0 }
 0x2a4   :  { %v4406_v16 = vpop.f32.mrf.mxu1  ;;  %v8304_v54 = vadd.f32 %v4404_v22, %v4333_v62  ;;  %v4556_v25 = vadd.f32 %v4555_v48, %v8300_v23  ;;  %v4597_v27 = vmul.f32 %v8300_v23, %v8300_v23 }
 0x2a5   :  { %v4335_v41 = vpop.f32.mrf.mxu0 }
 0x2a6   :  { %v4408_v12 = vpop.f32.mrf.mxu1  ;;  %v8294_v39 = vadd.f32 %v4406_v16, %v4335_v41  ;;  %v4544_v36 = vsel %vm2307_vm1, %v8304_v54, 0.0  ;;  %v4599_v35 = vmul.f32 %v8304_v54, %v8304_v54  ;;  %v4605_v41 = vadd.f32 %v4604_v15, %v4593_v31 }
 0x2a7   :  { %v4337_v11 = vpop.f32.mrf.mxu0  ;;  %v4619_v12 = vadd.f32 %v4618_v9, %v4597_v27 }
 0x2a8   :  { %v4409_v10 = vpop.f32.mrf.mxu1  ;;  %v4557_v26 = vsel %vm2307_vm1, %v8294_v39, 0.0  ;;  %v4600_v51 = vmul.f32 %v8294_v39, %v8294_v39  ;;  %v4545_v11 = vadd.f32 %v4544_v36, %v4543_v53  ;;  %v4607_v45 = vsel %vm2307_vm1, %v4599_v35, 0.0 }
 0x2a9   :  { %v4338_v17 = vpop.f32.mrf.mxu0  ;;  %v4558_v22 = vadd.f32 %v4557_v26, %v4556_v25  ;;  %v4606_v61 = vadd.f32 %v4605_v41, %v4596_v14 }
 0x2aa   :  { %v8253_v32 = vpop.f32.mrf.mxu1  ;;  %v4620_v16 = vsel %vm2307_vm1, %v4600_v51, 0.0  ;;  %v4546_v2 = vrot.slane %v4545_v11, 4 }
 0x2ab   :  { %v4962_v19 = vpop.f32.mrf.mxu0  ;;  %v4559_v0 = vrot.slane %v4558_v22, 4  ;;  %v4621_v49 = vadd.f32 %v4620_v16, %v4619_v12  ;;  %v4608_v59 = vadd.f32 %v4607_v45, %v4606_v61 }
 0x2ac   :  { %v8263_v50 = vpop.f32.mrf.mxu1  ;;  %v4547_v42 = vadd.f32 %v4546_v2, %v4545_v11 }
 0x2ad   :  { %v4509_v10 = vpop.f32.mrf.mxu0  ;;  %v4560_v57 = vadd.f32 %v4559_v0, %v4558_v22  ;;  %v4622_v37 = vrot.slane %v4621_v49, 4  ;;  %v4609_v44 = vrot.slane %v4608_v59, 4  ;;  %v4910_v48 = vadd.f32 %v8263_v50, %v8253_v32 }
 0x2ae   :  { %v8273_v4 = vpop.f32.mrf.mxu1  ;;  %v4548_v31 = vrot.slane %v4547_v42, 2 }
 0x2af   :  { %v4963_v33 = vpop.f32.mrf.mxu0  ;;  %v4561_v30 = vrot.slane %v4560_v57, 2  ;;  %v4623_v34 = vadd.f32 %v4622_v37, %v4621_v49  ;;  %v4610_v25 = vadd.f32 %v4609_v44, %v4608_v59  ;;  %v8336_v15 = vadd.f32 %v4910_v48, %v4509_v10 }
 0x2b0   :  { %v4912_v60 = vpop.f32.mrf.mxu1 }
 0x2b1   :  { %v4913_v20 = vadd.f32 %v4912_v60, %v8273_v4  ;;  %v4512_v55 = vpop.f32.mrf.mxu0  ;;  %v4562_v60 = vadd.f32 %v4561_v30, %v4560_v57  ;;  %v4624_v36 = vrot.slane %v4623_v34, 2 }
 0x2b2   :  { %v4914_v18 = vpop.f32.mrf.mxu1 }
 0x2b3   :  { %v8334_v51 = vadd.f32 %v4913_v20, %v4512_v55  ;;  %v4563_v22 = vrot.slane %v4562_v60, 1 }
 0x2b4   :  { %v4915_v5 = vpop.f32.mrf.mxu1 }
 0x2b5   :  { %v4916_v56 = vadd.f32 %v4915_v5, %v4914_v18  ;;  %v4586_v32 = vmul.f32 %v8334_v51, %v8334_v51  ;;  %v4549_v18 = vadd.f32 %v4548_v31, %v4547_v42  ;;  %v4611_v5 = vrot.slane %v4610_v25, 2 }
 0x2b6   :  { %v4917_v8 = vpop.f32.mrf.mxu1  ;;  %v4565_v53 = vadd.f32 %v8334_v51, %v8336_v15  ;;  %v4564_v57 = vadd.f32 %v4563_v22, %v4562_v60 }
 0x2b7   :  { %v8338_v4 = vadd.f32 %v4962_v19, %v4916_v56  ;;  %v4550_v61 = vrot.slane %v4549_v18, 1  ;;  %v4612_v0 = vadd.f32 %v4611_v5, %v4610_v25 }
 0x2b8   :  { %v4918_v62 = vpop.f32.mrf.mxu1 }
 0x2b9   :  { %v4919_v43 = vadd.f32 %v4918_v62, %v4917_v8  ;;  %v4583_v8 = vmul.f32 %v8336_v15, %v8336_v15  ;;  %v4589_v19 = vmul.f32 %v8338_v4, %v8338_v4  ;;  %v4625_v62 = vadd.f32 %v4624_v36, %v4623_v34 }
 0x2ba   :  { %v4920_v17 = vpop.f32.mrf.mxu1  ;;  %v4566_v11 = vadd.f32 %v4565_v53, %v8338_v4  ;;  %v4613_v56 = vrot.slane %v4612_v0, 1 }
 0x2bb   :  { %v8342_v50 = vadd.f32 %v4963_v33, %v4919_v43  ;;  %v4628_v12 = vadd.f32 %v4586_v32, %v4583_v8  ;;  %v4626_v20 = vrot.slane %v4625_v62, 1 }
 0x2bc   :  { %v4921_v46 = vpop.f32.mrf.mxu1  ;;  %v4614_v36 = vadd.f32 %v4613_v56, %v4612_v0 }
 0x2bd   :  { %v4922_v14 = vadd.f32 %v4921_v46, %v4920_v17  ;;  %v4592_v10 = vmul.f32 %v8342_v50, %v8342_v50  ;;  %v4629_v59 = vadd.f32 %v4628_v12, %v4589_v19  ;;  %v4567_v17 = vadd.f32 %v4566_v11, %v8342_v50 }
 0x2be   :  { %v4923_v29 = vpop.f32.mrf.mxu1  ;;  %v4627_v43 = vadd.f32 %v4626_v20, %v4625_v62  ;;  %v4641_v53 = vmul.f32 0.020408163, %v4614_v36 }
 0x2bf   :  { %v4630_v44 = vadd.f32 %v4629_v59, %v4592_v10 }
 0x2c0   :  { %v4924_v38 = vpop.f32.mrf.mxu1 }
 0x2c1   :  { %v4925_v33 = vadd.f32 %v4924_v38, %v4923_v29 }
 0x2c2   :  { %v4926_v13 = vpop.f32.mrf.mxu1 }
 0x2c4   :  { %v4927_v26 = vpop.f32.mrf.mxu1 }
 0x2c5   :  { %v4928_v16 = vadd.f32 %v4927_v26, %v4926_v13  ;;  %v4551_v13 = vadd.f32 %v4550_v61, %v4549_v18  ;;  %v4579_v26 = vmul.f32 0.020408163, %v4564_v57  ;;  %v4642_v18 = vmul.f32 0.020408163, %v4627_v43 }
 0x2c6   :  { %v4929_v27 = vpop.f32.mrf.mxu1 }
 0x2c7   :  { %v4578_v60 = vmul.f32 0.020408163, %v4551_v13  ;;  %v4645_v5 = vmul.f32 %v4579_v26, %v4579_v26 }
 0x2c8   :  { %v4930_v35 = vpop.f32.mrf.mxu1 }
 0x2c9   :  { %v4644_v19 = vmul.f32 %v4578_v60, %v4578_v60 }
 0x2ca   :  { %v4966_v9 = vpop.f32.mrf.mxu1 }
 0x2cb   :  { %v8355_v49 = vadd.f32 %v4966_v9, %v4928_v16  ;;  %v4648_v16 = vsub.f32 %v4642_v18, %v4645_v5  ;;  %v4647_v62 = vsub.f32 %v4641_v53, %v4644_v19 }
 0x2cc   :  { %v4525_v41 = vpop.f32.mrf.mxu1 }
 0x2cd   :  { %v8353_v45 = vadd.f32 %v4922_v14, %v4525_v41  ;;  %v4601_v48 = vmul.f32 %v8355_v49, %v8355_v49  ;;  %v4570_v34 = vsel %vm2307_vm1, %v8355_v49, 0.0  ;;  %v4652_v61 = vadd.f32 1e-05, %v4648_v16 }
 0x2ce   :  { %v4967_v2 = vpop.f32.mrf.mxu1  ;;  %v4651_v0 = vadd.f32 1e-05, %v4647_v62 }
 0x2cf   :  { %v4595_v46 = vmul.f32 %v8353_v45, %v8353_v45  ;;  %v4568_v42 = vadd.f32 %v4567_v17, %v8353_v45  ;;  %v4633_v27 = vsel %vm2307_vm1, %v4601_v48, 0.0  ;;  %5088 = vrsqrt.f32 %v4652_v61 }
 0x2d0   :  { %v4528_v37 = vpop.f32.mrf.mxu1  ;;  %5090 = vrsqrt.f32 %v4651_v0 }
 0x2d1   :  { %v8361_v55 = vadd.f32 %v4925_v33, %v4528_v37  ;;  %v4631_v30 = vadd.f32 %v4630_v44, %v4595_v46 }
 0x2d3   :  { %v4569_v29 = vadd.f32 %v4568_v42, %v8361_v55  ;;  %v4598_v38 = vmul.f32 %v8361_v55, %v8361_v55 }
 0x2d5   :  { %v4571_v31 = vadd.f32 %v4570_v34, %v4569_v29  ;;  %v4632_v25 = vadd.f32 %v4631_v30, %v4598_v38  ;;  %v4650_v38 = vld [vmem:[%s8478_s5] sm:$0x7] }
 0x2d7   :  { %v4572_v35 = vrot.slane %v4571_v31, 4  ;;  %v4634_v32 = vadd.f32 %v4633_v27, %v4632_v25  ;;  %v9112_v27 = vld [vmem:[#allocation5_spill] sm:$0xff] }
 0x2d9   :  { %v4573_v9 = vadd.f32 %v4572_v35, %v4571_v31  ;;  %v4635_v8 = vrot.slane %v4634_v32, 4  ;;  %v9111_v31 = vld [vmem:[#allocation3_spill] sm:$0xff] }
 0x2da   :  { %v9113_v35 = vld [vmem:[#allocation7_spill] sm:$0xff] }
 0x2db   :  { %v4574_v14 = vrot.slane %v4573_v9, 2  ;;  %v4636_v22 = vadd.f32 %v4635_v8, %v4634_v32 }
 0x2dc   :  { %v5089_v42 = vpop.eup %5088 }
 0x2dd   :  { %v4575_v41 = vadd.f32 %v4574_v14, %v4573_v9  ;;  %v4637_v12 = vrot.slane %v4636_v22, 2  ;;  %v5091_v44 = vpop.eup %5090 }
 0x2de   :  { %v4660_v13 = vcombine.low %v5091_v44, %v5089_v42 }
 0x2df   :  { %v4576_v11 = vrot.slane %v4575_v41, 1  ;;  %v4638_v10 = vadd.f32 %v4637_v12, %v4636_v22  ;;  %v4685_v22 = vld [vmem:[%s8479_s6] sm:$0x7] }
 0x2e0   :  { %v4667_v56 = vrot.slane %v4660_v13, %v7078_v1 }
 0x2e1   :  { %v4577_v2 = vadd.f32 %v4576_v11, %v4575_v41  ;;  %v4639_v59 = vrot.slane %v4638_v10, 1 }
 0x2e3   :  { %v4580_v33 = vmul.f32 0.020408163, %v4577_v2  ;;  %v4640_v17 = vadd.f32 %v4639_v59, %v4638_v10 }
 0x2e5   :  { %v4643_v46 = vmul.f32 0.020408163, %v4640_v17  ;;  %v4646_v57 = vmul.f32 %v4580_v33, %v4580_v33 }
 0x2e7   :  { %v4649_v37 = vsub.f32 %v4643_v46, %v4646_v57 }
 0x2e9   :  { %v4653_v20 = vadd.f32 1e-05, %v4649_v37 }
 0x2eb   :  { %5092 = vrsqrt.f32 %v4653_v20 }
 0x2f8   :  { %v5093_v48 = vpop.eup %5092 }
 0x2f9   :  { %v4674_v30 = vrot.slane %v5093_v48, %v7078_v1 }
 0x2fb   :  { %v4675_v29 = vcombine.low %v4667_v56, %v4674_v30 }
 0x2fd   :  { %v4682_v34 = vrot.slane %v4675_v29, %v7078_v1 }
 0x2ff   :  { %v4684_v43 = vmul.f32 %v4682_v34, %v4650_v38 }
 0x301   :  { %v4690_v25 = vrot.slane %v4684_v43, %v9111_v31  ;;  %v4694_v36 = vrot.slane %v4684_v43, %v9112_v27  ;;  %v4698_v32 = vrot.slane %v4684_v43, %v9113_v35 }
 0x303   :  { %v4702_v18 = vmul.f32 %v4690_v25, %v4578_v60  ;;  %v4703_v5 = vmul.f32 %v4694_v36, %v4579_v26  ;;  %v4704_v9 = vmul.f32 %v4698_v32, %v4580_v33  ;;  %v4733_v16 = vmul.f32 %v4690_v25, %v8261_v7 }
 0x304   :  { %v4734_v41 = vmul.f32 %v4694_v36, %v8255_v21  ;;  %v4735_v60 = vmul.f32 %v4698_v32, %v8336_v15  ;;  %v4736_v26 = vmul.f32 %v4690_v25, %v8257_v28  ;;  %v4737_v62 = vmul.f32 %v4694_v36, %v8251_v58 }
 0x305   :  { %v4708_v8 = vcombine.low %v4702_v18, %v4703_v5  ;;  %v4722_v19 = vrot.slane %v4704_v9, %v7078_v1  ;;  %v4738_v11 = vmul.f32 %v4698_v32, %v8334_v51  ;;  %v4739_v10 = vmul.f32 %v4690_v25, %v8267_v3 }
 0x306   :  { %v4740_v61 = vmul.f32 %v4694_v36, %v8259_v24  ;;  %v4741_v2 = vmul.f32 %v4698_v32, %v8338_v4  ;;  %v4742_v7 = vmul.f32 %v4690_v25, %v8281_v40  ;;  %v4743_v21 = vmul.f32 %v4694_v36, %v8269_v63 }
 0x307   :  { %v4715_v53 = vrot.slane %v4708_v8, %v7078_v1  ;;  %v4745_v15 = vmul.f32 %v4690_v25, %v8298_v47  ;;  %v4746_v28 = vmul.f32 %v4694_v36, %v8288_v6  ;;  %v4747_v58 = vmul.f32 %v4698_v32, %v8353_v45 }
 0x308   :  { %v4748_v51 = vmul.f32 %v4690_v25, %v8310_v52  ;;  %v4749_v3 = vmul.f32 %v4694_v36, %v8300_v23  ;;  %v4750_v63 = vmul.f32 %v4698_v32, %v8361_v55  ;;  %v4752_v47 = vmul.f32 %v4694_v36, %v8294_v39 }
 0x309   :  { %v4723_v14 = vcombine.low %v4715_v53, %v4722_v19  ;;  %v4753_v6 = vmul.f32 %v4698_v32, %v8355_v49 }
 0x30b   :  { %v4730_v12 = vrot.slane %v4723_v14, %v7078_v1  ;;  %v4744_v1 = vmul.f32 %v4698_v32, %v8342_v50  ;;  %v4751_v50 = vmul.f32 %v4690_v25, %v8304_v54 }
 0x30d   :  { %v4732_v59 = vsub.f32 %v4685_v22, %v4730_v12 }
 0x30f   :  { %v4758_v24 = vrot.slane %v4732_v59, %v9111_v31  ;;  %v4762_v4 = vrot.slane %v4732_v59, %v9112_v27  ;;  %v4766_v40 = vrot.slane %v4732_v59, %v9113_v35 }
 0x311   :  { %v4770_v0 = vadd.f32 %v4758_v24, %v4733_v16  ;;  %v4771_v45 = vadd.f32 %v4762_v4, %v4734_v41  ;;  %v4772_v33 = vadd.f32 %v4766_v40, %v4735_v60  ;;  %v4773_v52 = vadd.f32 %v4758_v24, %v4736_v26 }
 0x312   :  { %v4774_v17 = vadd.f32 %v4762_v4, %v4737_v62  ;;  %v4775_v23 = vadd.f32 %v4766_v40, %v4738_v11  ;;  %v4776_v46 = vadd.f32 %v4758_v24, %v4739_v10  ;;  %v4777_v57 = vadd.f32 %v4762_v4, %v4740_v61 }
 0x313   :  { %v4778_v37 = vadd.f32 %v4766_v40, %v4741_v2  ;;  %v4779_v20 = vadd.f32 %v4758_v24, %v4742_v7  ;;  %v4780_v42 = vadd.f32 %v4762_v4, %v4743_v21  ;;  %v4781_v44 = vadd.f32 %v4766_v40, %v4744_v1  ;;  %4791 = vst [vmem:[%s8480_s7] sm:$0xff] %v4770_v0 }
 0x314   :  { %4792 = vst [vmem:[%s8480_s7 + $0x8] sm:$0xff] %v4771_v45  ;;  %4793 = vst [vmem:[%s8480_s7 + $0x10] sm:$0xff] %v4772_v33  ;;  %v4782_v39 = vadd.f32 %v4758_v24, %v4745_v15  ;;  %v4783_v54 = vadd.f32 %v4762_v4, %v4746_v28  ;;  %v4784_v49 = vadd.f32 %v4766_v40, %v4747_v58 }
 0x315   :  { %4794 = vst [vmem:[%s8480_s7 + $0x18] sm:$0xff] %v4773_v52  ;;  %v4785_v55 = vadd.f32 %v4758_v24, %v4748_v51  ;;  %4795 = vst [vmem:[%s8480_s7 + $0x20] sm:$0xff] %v4774_v17  ;;  %v4786_v13 = vadd.f32 %v4762_v4, %v4749_v3  ;;  %v4787_v48 = vadd.f32 %v4766_v40, %v4750_v63 }
 0x316   :  { %4796 = vst [vmem:[%s8480_s7 + $0x28] sm:$0xff] %v4775_v23  ;;  %4797 = vst [vmem:[%s8480_s7 + $0x30] sm:$0xff] %v4776_v46  ;;  %v4788_v56 = vadd.f32 %v4758_v24, %v4751_v50  ;;  %v4789_v30 = vadd.f32 %v4762_v4, %v4752_v47  ;;  %v4790_v29 = vadd.f32 %v4766_v40, %v4753_v6 }
 0x317   :  { %4798 = vst [vmem:[%s8480_s7 + $0x38] sm:$0xff] %v4777_v57  ;;  %4799 = vst [vmem:[%s8480_s7 + $0x40] sm:$0xff] %v4778_v37 }
 0x318   :  { %4800 = vst [vmem:[%s8480_s7 + $0x48] sm:$0xff] %v4779_v20  ;;  %4801 = vst [vmem:[%s8480_s7 + $0x50] sm:$0xff] %v4780_v42 }
 0x319   :  { %4802 = vst [vmem:[%s8480_s7 + $0x58] sm:$0xff] %v4781_v44  ;;  %4803 = vst [vmem:[%s8480_s7 + $0x60] sm:$0xff] %v4782_v39 }
 0x31a   :  { %4804 = vst [vmem:[%s8480_s7 + $0x68] sm:$0xff] %v4783_v54  ;;  %4805 = vst [vmem:[%s8480_s7 + $0x70] sm:$0xff] %v4784_v49 }
 0x31b   :  { %4806 = vst [vmem:[%s8480_s7 + $0x78] sm:$0xff] %v4785_v55  ;;  %4807 = vst [vmem:[%s8480_s7 + $0x80] sm:$0xff] %v4786_v13 }
 0x31c   :  { %4808 = vst [vmem:[%s8480_s7 + $0x88] sm:$0xff] %v4787_v48  ;;  %4809 = vst [vmem:[%s8480_s7 + $0x90] sm:$0x1] %v4788_v56 }
 0x31d   :  { %4810 = vst [vmem:[%s8480_s7 + $0x98] sm:$0x1] %v4789_v30  ;;  %4811 = vst [vmem:[%s8480_s7 + $0xa0] sm:$0x1] %v4790_v29 }

</bundles_post_ra>
